<compile_context>
chip_gen: v7x
topology: tpu7x:2x2x1
jax: 0.10.0
libtpu: 0.0.40
codegen_flags: <defaults>
</compile_context>

<pallas_src>
import functools

import numpy as np
import jax
import jax.numpy as jnp
from jax import lax
from jax.experimental import pallas as pl
from jax.experimental.pallas import tpu as pltpu


# ----------------------------------------------------------------------------
# Anchor utilities (plain numpy glue, byte-for-byte same math as the reference)
# ----------------------------------------------------------------------------
def generate_anchor_base(base_size=16, ratios=(0.5, 1, 2), anchor_scales=(8, 16, 32)):
    py = base_size / 2.0
    px = base_size / 2.0
    anchor_base = np.zeros((len(ratios) * len(anchor_scales), 4), dtype=np.float32)
    for i in range(len(ratios)):
        for j in range(len(anchor_scales)):
            h = base_size * anchor_scales[j] * np.sqrt(ratios[i])
            w = base_size * anchor_scales[j] * np.sqrt(1.0 / ratios[i])
            index = i * len(anchor_scales) + j
            anchor_base[index, 0] = py - h / 2.0
            anchor_base[index, 1] = px - w / 2.0
            anchor_base[index, 2] = py + h / 2.0
            anchor_base[index, 3] = px + w / 2.0
    return anchor_base


def _enumerate_shifted_anchor(anchor_base, feat_stride, height, width):
    shift_y = np.arange(0, height * feat_stride, feat_stride)
    shift_x = np.arange(0, width * feat_stride, feat_stride)
    shift_x, shift_y = np.meshgrid(shift_x, shift_y)
    shift = np.stack(
        (shift_y.ravel(), shift_x.ravel(), shift_y.ravel(), shift_x.ravel()), axis=1)
    A = anchor_base.shape[0]
    K = shift.shape[0]
    anchor = anchor_base.reshape((1, A, 4)) + shift.reshape((1, K, 4)).transpose((1, 0, 2))
    anchor = anchor.reshape((K * A, 4)).astype(np.float32)
    return anchor


# ----------------------------------------------------------------------------
# Fused RPN kernel: 3x3 conv (9 shifted matmuls) + ReLU + fused 1x1 heads
# + fg sigmoid, all on one [TM, 128] lane-dense output tile per grid step.
# ----------------------------------------------------------------------------
def _rpn_kernel(x_hbm, w1_ref, b1_ref, wh_ref, bh_ref,     # inputs
                out_ref,                                    # output (TM, 128)
                slab, sem,                                  # scratch
                *, h_feat, w_feat, th, n_anchor):
    w_pad = w_feat + 2
    tm = out_ref.shape[0]                 # = th * w_pad
    slab_rows = slab.shape[0]             # = (th + 2) * w_pad + 2

    n = pl.program_id(0)                  # batch index
    i = pl.program_id(1)                  # H row-tile index

    # DMA the padded feature rows this tile needs (flat row-major (h_pad, w_pad)).
    row0 = (n * (h_feat + 2) + i * th) * w_pad
    cp = pltpu.make_async_copy(x_hbm.at[pl.ds(row0, slab_rows)], slab, sem)
    cp.start()
    cp.wait()

    # 3x3 conv == 9 shifted [TM, Cin] @ [Cin, 128] matmuls (bf16 MXU, f32 acc).
    acc = jnp.zeros((tm, 128), jnp.float32)
    for kh in range(3):
        for kw in range(3):
            shift = kh * w_pad + kw
            xk = slab[pl.ds(shift, tm), :].astype(jnp.bfloat16)
            acc = acc + jnp.dot(xk, w1_ref[kh * 3 + kw],
                                preferred_element_type=jnp.float32)

    hact = jnp.maximum(acc + b1_ref[...], 0.0)            # ReLU (f32, VPU)

    # Fused heads: columns [0,4A)=loc, [4A,6A)=scores, [6A,7A)=fg logit, rest pad.
    y = jnp.dot(hact.astype(jnp.bfloat16), wh_ref[...],
                preferred_element_type=jnp.float32) + bh_ref[...]

    # fg probability = 2-class softmax fg = sigmoid(s1 - s0); exp + approx
    # reciprocal both run on the EUP slot.
    col = lax.broadcasted_iota(jnp.int32, y.shape, 1)
    fg_mask = (col >= 6 * n_anchor) & (col < 7 * n_anchor)
    fg = pl.reciprocal(1.0 + jnp.exp(-y), approx=True)
    out_ref[...] = jnp.where(fg_mask, fg, y)


def _pick_row_tile(h_feat, w_feat, target_rows=1024):
    """Largest divisor TH of H with TH*(W+2) a multiple of 8 and <= target rows."""
    w_pad = w_feat + 2
    best = None
    for th in range(1, h_feat + 1):
        if h_feat % th != 0:
            continue
        if (th * w_pad) % 8 != 0:
            continue
        if th * w_pad <= max(target_rows, 8 * w_pad):
            best = th
    if best is None:
        raise ValueError("no valid row tile for H=%d W=%d" % (h_feat, w_feat))
    return best


class RegionProposalNetworkPallas:
    """Pallas/JAX re-implementation of the RPN forward pass."""

    def __init__(self, in_channels=16, mid_channels=32,
                 ratios=(0.5, 1, 2), anchor_scales=(8, 16, 32),
                 feat_stride=16, key=jax.random.PRNGKey(0)):
        self.anchor_base = generate_anchor_base(ratios=list(ratios),
                                                anchor_scales=list(anchor_scales))
        self.feat_stride = feat_stride
        self.in_channels = in_channels
        self.mid_channels = mid_channels
        n_anchor = self.anchor_base.shape[0]
        self.n_anchor = n_anchor
        assert mid_channels <= 128 and 7 * n_anchor <= 128, \
            "packed-head layout assumes mid<=128 and 7*A<=128"

        # normal_init(m, 0, 0.01): weights ~ N(0, 0.01), biases zero
        k1, k2, k3 = jax.random.split(key, 3)
        self.w_conv1 = 0.01 * jax.random.normal(
            k1, (mid_channels, in_channels, 3, 3), jnp.float32)         # OIHW
        self.b_conv1 = jnp.zeros((mid_channels,), jnp.float32)
        self.w_score = 0.01 * jax.random.normal(
            k2, (n_anchor * 2, mid_channels, 1, 1), jnp.float32)        # OIHW
        self.b_score = jnp.zeros((n_anchor * 2,), jnp.float32)
        self.w_loc = 0.01 * jax.random.normal(
            k3, (n_anchor * 4, mid_channels, 1, 1), jnp.float32)        # OIHW
        self.b_loc = jnp.zeros((n_anchor * 4,), jnp.float32)

    # ---------------- weight re-layout (128-lane padded, bf16) ---------------
    def _packed_weights(self):
        cin, mid, A = self.in_channels, self.mid_channels, self.n_anchor
        # conv1 OIHW -> per-tap (9, Cin, 128), hidden width zero-padded to 128
        w1 = jnp.transpose(self.w_conv1, (2, 3, 1, 0)).reshape(9, cin, mid)
        w1 = jnp.pad(w1, ((0, 0), (0, 0), (0, 128 - mid))).astype(jnp.bfloat16)
        b1 = jnp.pad(self.b_conv1, (0, 128 - mid)).reshape(1, 128).astype(jnp.float32)

        # fused head weight: [loc | score | (fg - bg)] , zero-padded to (128, 128)
        wloc = jnp.transpose(self.w_loc[:, :, 0, 0])       # (mid, 4A)
        wsc = jnp.transpose(self.w_score[:, :, 0, 0])      # (mid, 2A)
        wfg = wsc[:, 1::2] - wsc[:, 0::2]                  # (mid, A)
        wh = jnp.concatenate([wloc, wsc, wfg], axis=1)     # (mid, 7A)
        wh = jnp.pad(wh, ((0, 128 - mid), (0, 128 - 7 * A))).astype(jnp.bfloat16)

        bfg = self.b_score[1::2] - self.b_score[0::2]
        bh = jnp.concatenate([self.b_loc, self.b_score, bfg])
        bh = jnp.pad(bh, (0, 128 - 7 * A)).reshape(1, 128).astype(jnp.float32)
        return w1, b1, wh, bh

    # ---------------- forward -------------------------------------------------
    def forward(self, x_nchw, img_size, scale=1.0):
        n, cin, hh, ww = x_nchw.shape
        assert cin == self.in_channels
        A = self.n_anchor
        anchor = _enumerate_shifted_anchor(
            np.array(self.anchor_base), self.feat_stride, hh, ww)

        w_pad = ww + 2
        th = _pick_row_tile(hh, ww)
        tm = th * w_pad
        n_htiles = hh // th
        slab_rows = (th + 2) * w_pad + 2          # halo rows + 2 flat-shift slack

        # NCHW -> padded NHWC -> flat [(n, h_pad, w_pad) rows, Cin]
        x_nhwc = jnp.transpose(x_nchw, (0, 2, 3, 1)).astype(jnp.float32)
        x_padded = jnp.pad(x_nhwc, ((0, 0), (1, 1), (1, 1), (0, 0)))
        x_flat = x_padded.reshape(n * (hh + 2) * w_pad, cin)
        x_flat = jnp.pad(x_flat, ((0, 8), (0, 0)))   # slack so the last slab DMA is in-bounds

        w1, b1, wh, bh = self._packed_weights()

        kernel = functools.partial(_rpn_kernel, h_feat=hh, w_feat=ww,
                                   th=th, n_anchor=A)

        rows_out = n * hh * w_pad
        flops = 2 * rows_out * (9 * cin * 128 + 128 * 128)
        bytes_accessed = int(x_flat.size) * 4 + rows_out * 128 * 4 \
            + int(w1.size) * 2 + int(wh.size) * 2 + 2 * 128 * 4

        packed = pl.pallas_call(
            kernel,
            out_shape=jax.ShapeDtypeStruct((rows_out, 128), jnp.float32),
            grid=(n, n_htiles),
            in_specs=[
                pl.BlockSpec(memory_space=pl.ANY),                        # x (HBM, manual DMA)
                pl.BlockSpec((9, cin, 128), lambda b, i: (0, 0, 0)),      # conv taps (resident)
                pl.BlockSpec((1, 128), lambda b, i: (0, 0)),              # conv bias
                pl.BlockSpec((128, 128), lambda b, i: (0, 0)),            # fused head weight
                pl.BlockSpec((1, 128), lambda b, i: (0, 0)),              # fused head bias
            ],
            out_specs=pl.BlockSpec((tm, 128),
                                   lambda b, i: (b * n_htiles + i, 0)),
            scratch_shapes=[
                pltpu.VMEM((slab_rows, cin), jnp.float32),
                pltpu.SemaphoreType.DMA(()),
            ],
            compiler_params=pltpu.CompilerParams(
                dimension_semantics=("parallel", "parallel"),
                vmem_limit_bytes=32 * 1024 * 1024),
            cost_estimate=pl.CostEstimate(
                flops=flops, transcendentals=rows_out * 128,
                bytes_accessed=bytes_accessed),
        )(x_flat, w1, b1, wh, bh)

        # unpack the lane-dense [rows, 128] result back to PyTorch layouts
        packed = packed.reshape(n, hh, w_pad, 128)[:, :, :ww, :]
        rpn_locs = packed[..., :4 * A].reshape(n, hh * ww * A, 4)
        rpn_scores = packed[..., 4 * A:6 * A].reshape(n, hh * ww * A, 2)
        rpn_fg_scores = packed[..., 6 * A:7 * A].reshape(n, hh * ww * A)

        # TODO(synk): ProposalCreator (loc2bbox + clipping + torchvision NMS) has
        # data-dependent output shapes and no clean Pallas equivalent; rois /
        # roi_indices are returned empty.
        rois = np.zeros((0, 4), dtype=np.float32)
        roi_indices = np.zeros((0,), dtype=np.int32)

        return rpn_locs, rpn_scores, rpn_fg_scores, rois, roi_indices, anchor


# ----------------------------------------------------------------------------
# Pure-JAX reference (lax convs, NCHW like PyTorch, f32 HIGHEST) for checking.
# ----------------------------------------------------------------------------
def _reference_forward(rpn, x_nchw):
    n, _, hh, ww = x_nchw.shape
    A = rpn.n_anchor
    dn = ("NCHW", "OIHW", "NCHW")
    hi = lax.Precision.HIGHEST
    h = lax.conv_general_dilated(x_nchw, rpn.w_conv1, (1, 1), "SAME",
                                 dimension_numbers=dn, precision=hi)
    h = jax.nn.relu(h + rpn.b_conv1[None, :, None, None])
    locs = lax.conv_general_dilated(h, rpn.w_loc, (1, 1), "VALID",
                                    dimension_numbers=dn, precision=hi)
    locs = locs + rpn.b_loc[None, :, None, None]
    scores = lax.conv_general_dilated(h, rpn.w_score, (1, 1), "VALID",
                                      dimension_numbers=dn, precision=hi)
    scores = scores + rpn.b_score[None, :, None, None]
    rpn_locs = jnp.transpose(locs, (0, 2, 3, 1)).reshape(n, -1, 4)
    rpn_scores_nhwc = jnp.transpose(scores, (0, 2, 3, 1))
    soft = jax.nn.softmax(rpn_scores_nhwc.reshape(n, hh, ww, A, 2), axis=4)
    rpn_fg = soft[..., 1].reshape(n, -1)
    rpn_scores = rpn_scores_nhwc.reshape(n, -1, 2)
    return rpn_locs, rpn_scores, rpn_fg


if __name__ == "__main__":
    key = jax.random.PRNGKey(0)
    k_param, k_x = jax.random.split(key)

    # small shapes consistent with the module (in_ch=16, mid=32, 32x32 feature map
    # so that the grid actually has multiple row tiles per batch element).
    batch, in_channels, mid_channels, H, W = 2, 16, 32, 32, 32
    x = jax.random.normal(k_x, (batch, in_channels, H, W), jnp.float32)
    img_size = (H * 16, W * 16)

    rpn = RegionProposalNetworkPallas(in_channels=in_channels,
                                      mid_channels=mid_channels,
                                      key=k_param)

    rpn_locs, rpn_scores, rpn_fg_scores, rois, roi_indices, anchor = rpn.forward(
        x, img_size, scale=1.0)
    jax.block_until_ready((rpn_locs, rpn_scores, rpn_fg_scores))

    # sanity check against a pure-JAX f32 reference (kernel uses bf16 matmuls)
    ref_locs, ref_scores, ref_fg = _reference_forward(rpn, x)
    assert rpn_locs.shape == (batch, H * W * rpn.n_anchor, 4)
    assert rpn_scores.shape == (batch, H * W * rpn.n_anchor, 2)
    assert rpn_fg_scores.shape == (batch, H * W * rpn.n_anchor)
    assert anchor.shape == (H * W * rpn.n_anchor, 4)
    np.testing.assert_allclose(np.asarray(rpn_locs), np.asarray(ref_locs),
                               rtol=2e-2, atol=5e-4)
    np.testing.assert_allclose(np.asarray(rpn_scores), np.asarray(ref_scores),
                               rtol=2e-2, atol=5e-4)
    np.testing.assert_allclose(np.asarray(rpn_fg_scores), np.asarray(ref_fg),
                               rtol=2e-2, atol=2e-3)

    print("KERNEL_OK")
</pallas_src>

<mosaic_0001>
module attributes {stable_mosaic.version = 11 : i64} {
  func.func @_rpn_kernel(%arg0: i32, %arg1: i32, %arg2: memref<2320x16xf32, #tpu.memory_space<any>>, %arg3: memref<9x16x128xbf16, #tpu.memory_space<vmem>>, %arg4: memref<1x128xf32, #tpu.memory_space<vmem>>, %arg5: memref<128x128xbf16, #tpu.memory_space<vmem>>, %arg6: memref<1x128xf32, #tpu.memory_space<vmem>>, %arg7: memref<544x128xf32, #tpu.memory_space<vmem>>, %arg8: memref<614x16xf32, #tpu.memory_space<vmem>>, %arg9: memref<!tpu.dma_semaphore, #tpu.memory_space<semaphore_mem>>) attributes {dimension_semantics = [#tpu.dimension_semantics<parallel>, #tpu.dimension_semantics<parallel>], iteration_bounds = array<i64: 2, 2>, scalar_prefetch = 0 : i64, scratch_operands = 2 : i64, tpu.core_type = #tpu.core_type<tc>, window_params = [{}, {pipeline_mode = #tpu.pipeline_mode<synchronous>, transform_indices = @transform_1, window_bounds = array<i64: 9, 16, 128>}, {pipeline_mode = #tpu.pipeline_mode<synchronous>, transform_indices = @transform_2, window_bounds = array<i64: 1, 128>}, {pipeline_mode = #tpu.pipeline_mode<synchronous>, transform_indices = @transform_3, window_bounds = array<i64: 128, 128>}, {pipeline_mode = #tpu.pipeline_mode<synchronous>, transform_indices = @transform_4, window_bounds = array<i64: 1, 128>}, {transform_indices = @transform_5, window_bounds = array<i64: 544, 128>}]} {
    %c34_i32 = arith.constant 34 : i32
    %0 = arith.muli %arg0, %c34_i32 : i32
    %c16_i32 = arith.constant 16 : i32
    %1 = arith.muli %arg1, %c16_i32 : i32
    %2 = arith.addi %0, %1 : i32
    %c34_i32_0 = arith.constant 34 : i32
    %3 = arith.muli %2, %c34_i32_0 : i32
    %c0_i32 = arith.constant 0 : i32
    %4 = tpu.memref_slice %arg2[%3, %c0_i32] : memref<2320x16xf32, #tpu.memory_space<any>> -> memref<614x16xf32, #tpu.memory_space<any>>
    tpu.enqueue_dma source(%4 : memref<614x16xf32, #tpu.memory_space<any>>) target(%arg8 : memref<614x16xf32, #tpu.memory_space<vmem>>) target_semaphore(%arg9 : memref<!tpu.dma_semaphore, #tpu.memory_space<semaphore_mem>>)
    %c0_i32_1 = arith.constant 0 : i32
    %5 = tpu.memref_slice %arg2[%3, %c0_i32_1] : memref<2320x16xf32, #tpu.memory_space<any>> -> memref<614x16xf32, #tpu.memory_space<any>>
    tpu.wait_dma2 semaphore(%arg9 : memref<!tpu.dma_semaphore, #tpu.memory_space<semaphore_mem>>) src(%5 : memref<614x16xf32, #tpu.memory_space<any>>) dst(%arg8 : memref<614x16xf32, #tpu.memory_space<vmem>>)
    %cst = arith.constant 0.000000e+00 : f32
    %6 = vector.broadcast %cst : f32 to vector<544x128xf32>
    %c0 = arith.constant 0 : index
    %c0_2 = arith.constant 0 : index
    %7 = vector.load %arg8[%c0, %c0_2] : memref<614x16xf32, #tpu.memory_space<vmem>>, vector<544x16xf32>
    %8 = arith.truncf %7 : vector<544x16xf32> to vector<544x16xbf16>
    %c0_3 = arith.constant 0 : index
    %c0_4 = arith.constant 0 : index
    %c0_5 = arith.constant 0 : index
    %9 = vector.load %arg3[%c0_3, %c0_4, %c0_5] : memref<9x16x128xbf16, #tpu.memory_space<vmem>>, vector<1x16x128xbf16>
    %10 = vector.shape_cast %9 : vector<1x16x128xbf16> to vector<16x128xbf16>
    %cst_6 = arith.constant dense<0.000000e+00> : vector<544x128xf32>
    %11 = tpu.matmul %8, %10, %cst_6 {dimension_numbers = #tpu.dot_dimension_numbers<[1], [0], [0], [1], [0, 0, 1, 1], [], []>} : vector<544x16xbf16>, vector<16x128xbf16>, vector<544x128xf32> -> vector<544x128xf32>
    %12 = arith.addf %6, %11 : vector<544x128xf32>
    %c1 = arith.constant 1 : index
    %c0_7 = arith.constant 0 : index
    %13 = vector.load %arg8[%c1, %c0_7] : memref<614x16xf32, #tpu.memory_space<vmem>>, vector<544x16xf32>
    %14 = arith.truncf %13 : vector<544x16xf32> to vector<544x16xbf16>
    %c1_8 = arith.constant 1 : index
    %c0_9 = arith.constant 0 : index
    %c0_10 = arith.constant 0 : index
    %15 = vector.load %arg3[%c1_8, %c0_9, %c0_10] : memref<9x16x128xbf16, #tpu.memory_space<vmem>>, vector<1x16x128xbf16>
    %16 = vector.shape_cast %15 : vector<1x16x128xbf16> to vector<16x128xbf16>
    %cst_11 = arith.constant dense<0.000000e+00> : vector<544x128xf32>
    %17 = tpu.matmul %14, %16, %cst_11 {dimension_numbers = #tpu.dot_dimension_numbers<[1], [0], [0], [1], [0, 0, 1, 1], [], []>} : vector<544x16xbf16>, vector<16x128xbf16>, vector<544x128xf32> -> vector<544x128xf32>
    %18 = arith.addf %12, %17 : vector<544x128xf32>
    %c2 = arith.constant 2 : index
    %c0_12 = arith.constant 0 : index
    %19 = vector.load %arg8[%c2, %c0_12] : memref<614x16xf32, #tpu.memory_space<vmem>>, vector<544x16xf32>
    %20 = arith.truncf %19 : vector<544x16xf32> to vector<544x16xbf16>
    %c2_13 = arith.constant 2 : index
    %c0_14 = arith.constant 0 : index
    %c0_15 = arith.constant 0 : index
    %21 = vector.load %arg3[%c2_13, %c0_14, %c0_15] : memref<9x16x128xbf16, #tpu.memory_space<vmem>>, vector<1x16x128xbf16>
    %22 = vector.shape_cast %21 : vector<1x16x128xbf16> to vector<16x128xbf16>
    %cst_16 = arith.constant dense<0.000000e+00> : vector<544x128xf32>
    %23 = tpu.matmul %20, %22, %cst_16 {dimension_numbers = #tpu.dot_dimension_numbers<[1], [0], [0], [1], [0, 0, 1, 1], [], []>} : vector<544x16xbf16>, vector<16x128xbf16>, vector<544x128xf32> -> vector<544x128xf32>
    %24 = arith.addf %18, %23 : vector<544x128xf32>
    %c34 = arith.constant 34 : index
    %c0_17 = arith.constant 0 : index
    %25 = vector.load %arg8[%c34, %c0_17] : memref<614x16xf32, #tpu.memory_space<vmem>>, vector<544x16xf32>
    %26 = arith.truncf %25 : vector<544x16xf32> to vector<544x16xbf16>
    %c3 = arith.constant 3 : index
    %c0_18 = arith.constant 0 : index
    %c0_19 = arith.constant 0 : index
    %27 = vector.load %arg3[%c3, %c0_18, %c0_19] : memref<9x16x128xbf16, #tpu.memory_space<vmem>>, vector<1x16x128xbf16>
    %28 = vector.shape_cast %27 : vector<1x16x128xbf16> to vector<16x128xbf16>
    %cst_20 = arith.constant dense<0.000000e+00> : vector<544x128xf32>
    %29 = tpu.matmul %26, %28, %cst_20 {dimension_numbers = #tpu.dot_dimension_numbers<[1], [0], [0], [1], [0, 0, 1, 1], [], []>} : vector<544x16xbf16>, vector<16x128xbf16>, vector<544x128xf32> -> vector<544x128xf32>
    %30 = arith.addf %24, %29 : vector<544x128xf32>
    %c35 = arith.constant 35 : index
    %c0_21 = arith.constant 0 : index
    %31 = vector.load %arg8[%c35, %c0_21] : memref<614x16xf32, #tpu.memory_space<vmem>>, vector<544x16xf32>
    %32 = arith.truncf %31 : vector<544x16xf32> to vector<544x16xbf16>
    %c4 = arith.constant 4 : index
    %c0_22 = arith.constant 0 : index
    %c0_23 = arith.constant 0 : index
    %33 = vector.load %arg3[%c4, %c0_22, %c0_23] : memref<9x16x128xbf16, #tpu.memory_space<vmem>>, vector<1x16x128xbf16>
    %34 = vector.shape_cast %33 : vector<1x16x128xbf16> to vector<16x128xbf16>
    %cst_24 = arith.constant dense<0.000000e+00> : vector<544x128xf32>
    %35 = tpu.matmul %32, %34, %cst_24 {dimension_numbers = #tpu.dot_dimension_numbers<[1], [0], [0], [1], [0, 0, 1, 1], [], []>} : vector<544x16xbf16>, vector<16x128xbf16>, vector<544x128xf32> -> vector<544x128xf32>
    %36 = arith.addf %30, %35 : vector<544x128xf32>
    %c36 = arith.constant 36 : index
    %c0_25 = arith.constant 0 : index
    %37 = vector.load %arg8[%c36, %c0_25] : memref<614x16xf32, #tpu.memory_space<vmem>>, vector<544x16xf32>
    %38 = arith.truncf %37 : vector<544x16xf32> to vector<544x16xbf16>
    %c5 = arith.constant 5 : index
    %c0_26 = arith.constant 0 : index
    %c0_27 = arith.constant 0 : index
    %39 = vector.load %arg3[%c5, %c0_26, %c0_27] : memref<9x16x128xbf16, #tpu.memory_space<vmem>>, vector<1x16x128xbf16>
    %40 = vector.shape_cast %39 : vector<1x16x128xbf16> to vector<16x128xbf16>
    %cst_28 = arith.constant dense<0.000000e+00> : vector<544x128xf32>
    %41 = tpu.matmul %38, %40, %cst_28 {dimension_numbers = #tpu.dot_dimension_numbers<[1], [0], [0], [1], [0, 0, 1, 1], [], []>} : vector<544x16xbf16>, vector<16x128xbf16>, vector<544x128xf32> -> vector<544x128xf32>
    %42 = arith.addf %36, %41 : vector<544x128xf32>
    %c68 = arith.constant 68 : index
    %c0_29 = arith.constant 0 : index
    %43 = vector.load %arg8[%c68, %c0_29] : memref<614x16xf32, #tpu.memory_space<vmem>>, vector<544x16xf32>
    %44 = arith.truncf %43 : vector<544x16xf32> to vector<544x16xbf16>
    %c6 = arith.constant 6 : index
    %c0_30 = arith.constant 0 : index
    %c0_31 = arith.constant 0 : index
    %45 = vector.load %arg3[%c6, %c0_30, %c0_31] : memref<9x16x128xbf16, #tpu.memory_space<vmem>>, vector<1x16x128xbf16>
    %46 = vector.shape_cast %45 : vector<1x16x128xbf16> to vector<16x128xbf16>
    %cst_32 = arith.constant dense<0.000000e+00> : vector<544x128xf32>
    %47 = tpu.matmul %44, %46, %cst_32 {dimension_numbers = #tpu.dot_dimension_numbers<[1], [0], [0], [1], [0, 0, 1, 1], [], []>} : vector<544x16xbf16>, vector<16x128xbf16>, vector<544x128xf32> -> vector<544x128xf32>
    %48 = arith.addf %42, %47 : vector<544x128xf32>
    %c69 = arith.constant 69 : index
    %c0_33 = arith.constant 0 : index
    %49 = vector.load %arg8[%c69, %c0_33] : memref<614x16xf32, #tpu.memory_space<vmem>>, vector<544x16xf32>
    %50 = arith.truncf %49 : vector<544x16xf32> to vector<544x16xbf16>
    %c7 = arith.constant 7 : index
    %c0_34 = arith.constant 0 : index
    %c0_35 = arith.constant 0 : index
    %51 = vector.load %arg3[%c7, %c0_34, %c0_35] : memref<9x16x128xbf16, #tpu.memory_space<vmem>>, vector<1x16x128xbf16>
    %52 = vector.shape_cast %51 : vector<1x16x128xbf16> to vector<16x128xbf16>
    %cst_36 = arith.constant dense<0.000000e+00> : vector<544x128xf32>
    %53 = tpu.matmul %50, %52, %cst_36 {dimension_numbers = #tpu.dot_dimension_numbers<[1], [0], [0], [1], [0, 0, 1, 1], [], []>} : vector<544x16xbf16>, vector<16x128xbf16>, vector<544x128xf32> -> vector<544x128xf32>
    %54 = arith.addf %48, %53 : vector<544x128xf32>
    %c70 = arith.constant 70 : index
    %c0_37 = arith.constant 0 : index
    %55 = vector.load %arg8[%c70, %c0_37] : memref<614x16xf32, #tpu.memory_space<vmem>>, vector<544x16xf32>
    %56 = arith.truncf %55 : vector<544x16xf32> to vector<544x16xbf16>
    %c8 = arith.constant 8 : index
    %c0_38 = arith.constant 0 : index
    %c0_39 = arith.constant 0 : index
    %57 = vector.load %arg3[%c8, %c0_38, %c0_39] : memref<9x16x128xbf16, #tpu.memory_space<vmem>>, vector<1x16x128xbf16>
    %58 = vector.shape_cast %57 : vector<1x16x128xbf16> to vector<16x128xbf16>
    %cst_40 = arith.constant dense<0.000000e+00> : vector<544x128xf32>
    %59 = tpu.matmul %56, %58, %cst_40 {dimension_numbers = #tpu.dot_dimension_numbers<[1], [0], [0], [1], [0, 0, 1, 1], [], []>} : vector<544x16xbf16>, vector<16x128xbf16>, vector<544x128xf32> -> vector<544x128xf32>
    %60 = arith.addf %54, %59 : vector<544x128xf32>
    %c0_41 = arith.constant 0 : index
    %c0_42 = arith.constant 0 : index
    %61 = vector.load %arg4[%c0_41, %c0_42] : memref<1x128xf32, #tpu.memory_space<vmem>>, vector<1x128xf32>
    %62 = vector.broadcast %61 : vector<1x128xf32> to vector<544x128xf32>
    %63 = arith.addf %60, %62 : vector<544x128xf32>
    %cst_43 = arith.constant 0.000000e+00 : f32
    %64 = vector.broadcast %cst_43 : f32 to vector<544x128xf32>
    %65 = arith.maximumf %63, %64 : vector<544x128xf32>
    %66 = arith.truncf %65 : vector<544x128xf32> to vector<544x128xbf16>
    %c0_44 = arith.constant 0 : index
    %c0_45 = arith.constant 0 : index
    %67 = vector.load %arg5[%c0_44, %c0_45] : memref<128x128xbf16, #tpu.memory_space<vmem>>, vector<128x128xbf16>
    %cst_46 = arith.constant dense<0.000000e+00> : vector<544x128xf32>
    %68 = tpu.matmul %66, %67, %cst_46 {dimension_numbers = #tpu.dot_dimension_numbers<[1], [0], [0], [1], [0, 0, 1, 1], [], []>} : vector<544x128xbf16>, vector<128x128xbf16>, vector<544x128xf32> -> vector<544x128xf32>
    %c0_47 = arith.constant 0 : index
    %c0_48 = arith.constant 0 : index
    %69 = vector.load %arg6[%c0_47, %c0_48] : memref<1x128xf32, #tpu.memory_space<vmem>>, vector<1x128xf32>
    %70 = vector.broadcast %69 : vector<1x128xf32> to vector<544x128xf32>
    %71 = arith.addf %68, %70 : vector<544x128xf32>
    %72 = tpu.iota {dimensions = array<i32: 1>} : vector<544x128xi32>
    %c54_i32 = arith.constant 54 : i32
    %73 = vector.broadcast %c54_i32 : i32 to vector<544x128xi32>
    %74 = arith.cmpi sge, %72, %73 : vector<544x128xi32>
    %c63_i32 = arith.constant 63 : i32
    %75 = vector.broadcast %c63_i32 : i32 to vector<544x128xi32>
    %76 = arith.cmpi slt, %72, %75 : vector<544x128xi32>
    %77 = arith.andi %74, %76 : vector<544x128xi1>
    %cst_49 = arith.constant 0.000000e+00 : f32
    %78 = vector.broadcast %cst_49 : f32 to vector<544x128xf32>
    %79 = arith.subf %78, %71 : vector<544x128xf32>
    %80 = math.exp %79 : vector<544x128xf32>
    %cst_50 = arith.constant 1.000000e+00 : f32
    %81 = vector.broadcast %cst_50 : f32 to vector<544x128xf32>
    %82 = arith.addf %81, %80 : vector<544x128xf32>
    %83 = tpu.reciprocal %82 {approx = true} : vector<544x128xf32> -> vector<544x128xf32>
    %84 = arith.select %77, %83, %71 : vector<544x128xi1>, vector<544x128xf32>
    %c0_51 = arith.constant 0 : index
    %c0_52 = arith.constant 0 : index
    %85 = vector.load %arg7[%c0_51, %c0_52] : memref<544x128xf32, #tpu.memory_space<vmem>>, vector<544x128xf32>
    tpu.vector_store %arg7[%c0_51, %c0_52], %84 {strides = array<i32>} : memref<544x128xf32, #tpu.memory_space<vmem>>, vector<544x128xf32>,
    return
  }
  func.func @transform_1(%arg0: i32, %arg1: i32) -> (i32, i32, i32) {
    %c0_i32 = arith.constant 0 : i32
    %c0_i32_0 = arith.constant 0 : i32
    %c0_i32_1 = arith.constant 0 : i32
    %c0_i32_2 = arith.constant 0 : i32
    return %c0_i32, %c0_i32_0, %c0_i32_1 : i32, i32, i32
  }
  func.func @transform_2(%arg0: i32, %arg1: i32) -> (i32, i32) {
    %c0_i32 = arith.constant 0 : i32
    %c0_i32_0 = arith.constant 0 : i32
    %c0_i32_1 = arith.constant 0 : i32
    return %c0_i32, %c0_i32_0 : i32, i32
  }
  func.func @transform_3(%arg0: i32, %arg1: i32) -> (i32, i32) {
    %c0_i32 = arith.constant 0 : i32
    %c0_i32_0 = arith.constant 0 : i32
    %c0_i32_1 = arith.constant 0 : i32
    return %c0_i32, %c0_i32_0 : i32, i32
  }
  func.func @transform_4(%arg0: i32, %arg1: i32) -> (i32, i32) {
    %c0_i32 = arith.constant 0 : i32
    %c0_i32_0 = arith.constant 0 : i32
    %c0_i32_1 = arith.constant 0 : i32
    return %c0_i32, %c0_i32_0 : i32, i32
  }
  func.func @transform_5(%arg0: i32, %arg1: i32) -> (i32, i32) {
    %c2_i32 = arith.constant 2 : i32
    %0 = arith.muli %arg0, %c2_i32 : i32
    %1 = arith.addi %0, %arg1 : i32
    %c0_i32 = arith.constant 0 : i32
    %c0_i32_0 = arith.constant 0 : i32
    return %1, %c0_i32 : i32, i32
  }
}

</mosaic_0001>

<bundles_post_ra>
// kernel: tpu_custom_call.1
= control target key start
LH: loop header
LB: loop body
LE: loop exit
PB: predicated region body
PF: predicated region fallthrough
CT: control target
= control target key end

     0   :  { %10 = vsyncpa [#allocation5], 0  ;;  %s10839_s0 = inlined_call_operand.vmem [shape: f32[2320,16], index: 0, kind: input, shape index: {}]   ;;  %s10840_s1 = inlined_call_operand.vmem [shape: bf16[9,16,128], index: 1, kind: input, shape index: {}]   ;;  %s10841_s2 = inlined_call_operand.vmem [shape: f32[1,128], index: 2, kind: input, shape index: {}]   ;;  %s10842_s3 = inlined_call_operand.vmem [shape: bf16[128,128], index: 3, kind: input, shape index: {}]   ;;  %s10843_s4 = inlined_call_operand.vmem [shape: f32[1,128], index: 4, kind: input, shape index: {}]   ;;  %s10844_s5 = inlined_call_operand.hbm [shape: f32[2176,128], index: 5, kind: output, shape index: {}]  }
   0x1   :  { %12 = vsyncpa [#allocation5 + $0x1], 0  ;;  %s9150_s18 = smov 0   ;;  %s9152_s19 = smov 0  }
   0x2   :  { %s9154_s20 = smov 0   ;;  %s9156_s21 = smov 0  }
   0x3   :  { %s9158_s22 = smov 0   ;;  %s9160_s23 = smov 0  }
   0x4   :  { %s9162_s24 = smov 0   ;;  %s9164_s25 = smov 0  }
   0x5 LB: > { %s6685_s26 = sadd.s32 4294967295, %s9115_s25   ;;  %s27_s27 = sadd.s32 1, %s9107_s23  ;;  %s9115_s25 = sphi %s9164_s25, %s18_s25   ;;  %s9111_s24 = sphi %s9162_s24, %s10897_s24   ;;  %s9107_s23 = sphi %s9160_s23, %s10896_s23   ;;  %s9103_s22 = sphi %s9158_s22, %s10895_s22   ;;  %s9099_s21 = sphi %s9156_s21, %s10894_s21   ;;  %s9095_s20 = sphi %s9154_s20, %s10893_s20   ;;  %s9091_s19 = sphi %s9152_s19, %s10892_s19   ;;  %s9087_s18 = sphi %s9150_s18, %s10891_s18  }
   0x6   : > { %s30_s28 = sadd.s32 1, %s9111_s24  ;;  %p28_p0 = scmp.ge.s32.totalorder %s27_s27, 2 }
   0x7   : > { %s6687_s29 = sshll.u32 %s9111_s24, 1  ;;  %s6686_s30 = sadd.s32 4294967294, %s9115_s25  }
   0x8   : > { %s119_s6 = sadd.s32 %s9107_s23, %s6687_s29  ;;  %s10899_s27 = smov (%p28_p0, %s27_s27), 0 }
   0x9   : > { %s10901_s28 = smov (!%p28_p0, %s30_s28), %s9111_s24  ;;  %p135_p1 = scmp.ne.s32.totalorder %s9095_s20, %s9091_s19 }
   0xa   : > { %p136_p2 = scmp.eq.s32.totalorder %s6685_s26, 3  ;;  %p32_p3 = scmp.ge.s32.totalorder %s10901_s28, 2 }
   0xb   : > { %p141_p4 = scmp.ne.s32.totalorder %s9091_s19, %s9087_s18  ;;  %p142_p6 = scmp.eq.s32.totalorder %s6686_s30, 3 }
   0xc   : > { %p9203_p5 = por %p136_p2, %p135_p1  ;;  %s10903_s28 = smov (%p32_p3, %s10901_s28), 0 }
   0xd   : > { %p9209_p7 = por %p142_p6, %p141_p4  ;;  %p6690_p8 = scmp.ge.s32.totalorder %s9115_s25, 1 }
   0xe   : > { %s6688_s9 = sshll.u32 %s10903_s28, 1  ;;  %p172_p9 = scmp.lt.s32.totalorder %s9115_s25, 5 }
   0xf   : > { %s121_s10 = sadd.s32 %s6688_s9, %s10899_s27  ;;  %s125_s11 = sadd.s32 1, %s9095_s20 }
  0x10   : > { %s122_s12 = ssub.s32 %s119_s6, %s121_s10  ;;  %p173_p10 = pnand %p6690_p8, %p172_p9 }
  0x11   : > { %p123_p11 = scmp.eq.s32.totalorder %s122_s12, 0 }
  0x12   : > { %176 = sbr.rel (%p173_p10) target bundleno = 1242 (0x4da), region = 36 }
  0x13   : > { %s9219_s13 = scalar_select %p123_p11, %s9095_s20, %s125_s11  }
  0x19   : > { %s190_s14 = sand.u32 1, %s9091_s19   ;;  %s197_s15 = smul.u32 34, %s9103_s22 }
  0x1a   : > { %s9225_s16 = smul.u32 544, %s190_s14  ;;  %s6691_s17 = sshll.u32 %s9099_s21, 4 }
  0x1b   : > { %s199_s26 = sadd.s32 %s6691_s17, %s197_s15 }
  0x1c   : > { %s200_s29 = smul.u32 34, %s199_s26  ;;  %s9311_s10 = scalar_lea.vmem [#allocation4], %s9225_s16 }
  0x1e   : > { %s9231_s6 = scalar_lea.vmem %s10839_s0, %s200_s29 }
  0x1f   : > { %v239_v0 = vld [vmem:[%s9231_s6] sm:$0xff]  ;;  %v241_v1 = vld [vmem:[%s9231_s6 + $0x8] sm:$0xff]  ;;  %v243_v2 = vld [vmem:[%s9231_s6 + $0x10] sm:$0xff] }
  0x20   : > { %240 = vst [vmem:[#allocation2] sm:$0xff] %v239_v0  ;;  %242 = vst [vmem:[#allocation2 + $0x8] sm:$0xff] %v241_v1  ;;  %v245_v3 = vld [vmem:[%s9231_s6 + $0x18] sm:$0xff]  ;;  %v247_v4 = vld [vmem:[%s9231_s6 + $0x20] sm:$0xff] }
  0x21   : > { %244 = vst [vmem:[#allocation2 + $0x10] sm:$0xff] %v243_v2  ;;  %v249_v5 = vld [vmem:[%s9231_s6 + $0x28] sm:$0xff]  ;;  %246 = vst [vmem:[#allocation2 + $0x18] sm:$0xff] %v245_v3  ;;  %v251_v6 = vld [vmem:[%s9231_s6 + $0x30] sm:$0xff] }
  0x22   : > { %248 = vst [vmem:[#allocation2 + $0x20] sm:$0xff] %v247_v4  ;;  %250 = vst [vmem:[#allocation2 + $0x28] sm:$0xff] %v249_v5  ;;  %v253_v7 = vld [vmem:[%s9231_s6 + $0x38] sm:$0xff]  ;;  %v255_v8 = vld [vmem:[%s9231_s6 + $0x40] sm:$0xff] }
  0x23   : > { %252 = vst [vmem:[#allocation2 + $0x30] sm:$0xff] %v251_v6  ;;  %254 = vst [vmem:[#allocation2 + $0x38] sm:$0xff] %v253_v7  ;;  %v257_v9 = vld [vmem:[%s9231_s6 + $0x48] sm:$0xff]  ;;  %v259_v10 = vld [vmem:[%s9231_s6 + $0x50] sm:$0xff] }
  0x24   : > { %256 = vst [vmem:[#allocation2 + $0x40] sm:$0xff] %v255_v8  ;;  %v261_v11 = vld [vmem:[%s9231_s6 + $0x58] sm:$0xff]  ;;  %258 = vst [vmem:[#allocation2 + $0x48] sm:$0xff] %v257_v9  ;;  %v263_v12 = vld [vmem:[%s9231_s6 + $0x60] sm:$0xff] }
  0x25   : > { %260 = vst [vmem:[#allocation2 + $0x50] sm:$0xff] %v259_v10  ;;  %262 = vst [vmem:[#allocation2 + $0x58] sm:$0xff] %v261_v11  ;;  %v265_v13 = vld [vmem:[%s9231_s6 + $0x68] sm:$0xff]  ;;  %v267_v14 = vld [vmem:[%s9231_s6 + $0x70] sm:$0xff] }
  0x26   : > { %264 = vst [vmem:[#allocation2 + $0x60] sm:$0xff] %v263_v12  ;;  %266 = vst [vmem:[#allocation2 + $0x68] sm:$0xff] %v265_v13  ;;  %v269_v15 = vld [vmem:[%s9231_s6 + $0x78] sm:$0xff]  ;;  %v271_v16 = vld [vmem:[%s9231_s6 + $0x80] sm:$0xff] }
  0x27   : > { %268 = vst [vmem:[#allocation2 + $0x70] sm:$0xff] %v267_v14  ;;  %v273_v17 = vld [vmem:[%s9231_s6 + $0x88] sm:$0xff]  ;;  %270 = vst [vmem:[#allocation2 + $0x78] sm:$0xff] %v269_v15  ;;  %v275_v18 = vld [vmem:[%s9231_s6 + $0x90] sm:$0xff] }
  0x28   : > { %272 = vst [vmem:[#allocation2 + $0x80] sm:$0xff] %v271_v16  ;;  %274 = vst [vmem:[#allocation2 + $0x88] sm:$0xff] %v273_v17  ;;  %v277_v19 = vld [vmem:[%s9231_s6 + $0x98] sm:$0xff]  ;;  %v279_v20 = vld [vmem:[%s9231_s6 + $0xa0] sm:$0xff] }
  0x29   : > { %276 = vst [vmem:[#allocation2 + $0x90] sm:$0xff] %v275_v18  ;;  %278 = vst [vmem:[#allocation2 + $0x98] sm:$0xff] %v277_v19  ;;  %v281_v21 = vld [vmem:[%s9231_s6 + $0xa8] sm:$0xff]  ;;  %v283_v22 = vld [vmem:[%s9231_s6 + $0xb0] sm:$0xff] }
  0x2a   : > { %280 = vst [vmem:[#allocation2 + $0xa0] sm:$0xff] %v279_v20  ;;  %v285_v23 = vld [vmem:[%s9231_s6 + $0xb8] sm:$0xff]  ;;  %282 = vst [vmem:[#allocation2 + $0xa8] sm:$0xff] %v281_v21  ;;  %v287_v24 = vld [vmem:[%s9231_s6 + $0xc0] sm:$0xff] }
  0x2b   : > { %284 = vst [vmem:[#allocation2 + $0xb0] sm:$0xff] %v283_v22  ;;  %286 = vst [vmem:[#allocation2 + $0xb8] sm:$0xff] %v285_v23  ;;  %v289_v25 = vld [vmem:[%s9231_s6 + $0xc8] sm:$0xff]  ;;  %v291_v26 = vld [vmem:[%s9231_s6 + $0xd0] sm:$0xff] }
  0x2c   : > { %288 = vst [vmem:[#allocation2 + $0xc0] sm:$0xff] %v287_v24  ;;  %290 = vst [vmem:[#allocation2 + $0xc8] sm:$0xff] %v289_v25  ;;  %v293_v27 = vld [vmem:[%s9231_s6 + $0xd8] sm:$0xff]  ;;  %v295_v28 = vld [vmem:[%s9231_s6 + $0xe0] sm:$0xff] }
  0x2d   : > { %292 = vst [vmem:[#allocation2 + $0xd0] sm:$0xff] %v291_v26  ;;  %v297_v29 = vld [vmem:[%s9231_s6 + $0xe8] sm:$0xff]  ;;  %294 = vst [vmem:[#allocation2 + $0xd8] sm:$0xff] %v293_v27  ;;  %v299_v30 = vld [vmem:[%s9231_s6 + $0xf0] sm:$0xff] }
  0x2e   : > { %296 = vst [vmem:[#allocation2 + $0xe0] sm:$0xff] %v295_v28  ;;  %298 = vst [vmem:[#allocation2 + $0xe8] sm:$0xff] %v297_v29  ;;  %v301_v31 = vld [vmem:[%s9231_s6 + $0xf8] sm:$0xff]  ;;  %v303_v32 = vld [vmem:[%s9231_s6 + $0x100] sm:$0xff] }
  0x2f   : > { %300 = vst [vmem:[#allocation2 + $0xf0] sm:$0xff] %v299_v30  ;;  %302 = vst [vmem:[#allocation2 + $0xf8] sm:$0xff] %v301_v31  ;;  %v305_v33 = vld [vmem:[%s9231_s6 + $0x108] sm:$0xff]  ;;  %v307_v34 = vld [vmem:[%s9231_s6 + $0x110] sm:$0xff] }
  0x30   : > { %304 = vst [vmem:[#allocation2 + $0x100] sm:$0xff] %v303_v32  ;;  %v309_v35 = vld [vmem:[%s9231_s6 + $0x118] sm:$0xff]  ;;  %306 = vst [vmem:[#allocation2 + $0x108] sm:$0xff] %v305_v33  ;;  %v311_v36 = vld [vmem:[%s9231_s6 + $0x120] sm:$0xff] }
  0x31   : > { %308 = vst [vmem:[#allocation2 + $0x110] sm:$0xff] %v307_v34  ;;  %310 = vst [vmem:[#allocation2 + $0x118] sm:$0xff] %v309_v35  ;;  %v313_v37 = vld [vmem:[%s9231_s6 + $0x128] sm:$0xff]  ;;  %v315_v38 = vld [vmem:[%s9231_s6 + $0x130] sm:$0xff] }
  0x32   : > { %312 = vst [vmem:[#allocation2 + $0x120] sm:$0xff] %v311_v36  ;;  %314 = vst [vmem:[#allocation2 + $0x128] sm:$0xff] %v313_v37  ;;  %v317_v39 = vld [vmem:[%s9231_s6 + $0x138] sm:$0xff]  ;;  %v319_v40 = vld [vmem:[%s9231_s6 + $0x140] sm:$0xff] }
  0x33   : > { %316 = vst [vmem:[#allocation2 + $0x130] sm:$0xff] %v315_v38  ;;  %v321_v41 = vld [vmem:[%s9231_s6 + $0x148] sm:$0xff]  ;;  %318 = vst [vmem:[#allocation2 + $0x138] sm:$0xff] %v317_v39  ;;  %v323_v42 = vld [vmem:[%s9231_s6 + $0x150] sm:$0xff] }
  0x34   : > { %320 = vst [vmem:[#allocation2 + $0x140] sm:$0xff] %v319_v40  ;;  %322 = vst [vmem:[#allocation2 + $0x148] sm:$0xff] %v321_v41  ;;  %v325_v43 = vld [vmem:[%s9231_s6 + $0x158] sm:$0xff]  ;;  %v327_v44 = vld [vmem:[%s9231_s6 + $0x160] sm:$0xff] }
  0x35   : > { %324 = vst [vmem:[#allocation2 + $0x150] sm:$0xff] %v323_v42  ;;  %326 = vst [vmem:[#allocation2 + $0x158] sm:$0xff] %v325_v43  ;;  %v329_v45 = vld [vmem:[%s9231_s6 + $0x168] sm:$0xff]  ;;  %v331_v46 = vld [vmem:[%s9231_s6 + $0x170] sm:$0xff] }
  0x36   : > { %328 = vst [vmem:[#allocation2 + $0x160] sm:$0xff] %v327_v44  ;;  %v333_v47 = vld [vmem:[%s9231_s6 + $0x178] sm:$0xff]  ;;  %330 = vst [vmem:[#allocation2 + $0x168] sm:$0xff] %v329_v45  ;;  %v335_v48 = vld [vmem:[%s9231_s6 + $0x180] sm:$0xff] }
  0x37   : > { %332 = vst [vmem:[#allocation2 + $0x170] sm:$0xff] %v331_v46  ;;  %334 = vst [vmem:[#allocation2 + $0x178] sm:$0xff] %v333_v47  ;;  %v337_v49 = vld [vmem:[%s9231_s6 + $0x188] sm:$0xff]  ;;  %v339_v50 = vld [vmem:[%s9231_s6 + $0x190] sm:$0xff] }
  0x38   : > { %336 = vst [vmem:[#allocation2 + $0x180] sm:$0xff] %v335_v48  ;;  %338 = vst [vmem:[#allocation2 + $0x188] sm:$0xff] %v337_v49  ;;  %v341_v51 = vld [vmem:[%s9231_s6 + $0x198] sm:$0xff]  ;;  %v343_v52 = vld [vmem:[%s9231_s6 + $0x1a0] sm:$0xff] }
  0x39   : > { %340 = vst [vmem:[#allocation2 + $0x190] sm:$0xff] %v339_v50  ;;  %v345_v53 = vld [vmem:[%s9231_s6 + $0x1a8] sm:$0xff]  ;;  %342 = vst [vmem:[#allocation2 + $0x198] sm:$0xff] %v341_v51  ;;  %v347_v54 = vld [vmem:[%s9231_s6 + $0x1b0] sm:$0xff] }
  0x3a   : > { %344 = vst [vmem:[#allocation2 + $0x1a0] sm:$0xff] %v343_v52  ;;  %346 = vst [vmem:[#allocation2 + $0x1a8] sm:$0xff] %v345_v53  ;;  %v349_v55 = vld [vmem:[%s9231_s6 + $0x1b8] sm:$0xff]  ;;  %v351_v56 = vld [vmem:[%s9231_s6 + $0x1c0] sm:$0xff] }
  0x3b   : > { %348 = vst [vmem:[#allocation2 + $0x1b0] sm:$0xff] %v347_v54  ;;  %350 = vst [vmem:[#allocation2 + $0x1b8] sm:$0xff] %v349_v55  ;;  %v353_v57 = vld [vmem:[%s9231_s6 + $0x1c8] sm:$0xff]  ;;  %v355_v58 = vld [vmem:[%s9231_s6 + $0x1d0] sm:$0xff] }
  0x3c   : > { %352 = vst [vmem:[#allocation2 + $0x1c0] sm:$0xff] %v351_v56  ;;  %v357_v59 = vld [vmem:[%s9231_s6 + $0x1d8] sm:$0xff]  ;;  %354 = vst [vmem:[#allocation2 + $0x1c8] sm:$0xff] %v353_v57  ;;  %v359_v60 = vld [vmem:[%s9231_s6 + $0x1e0] sm:$0xff] }
  0x3d   : > { %356 = vst [vmem:[#allocation2 + $0x1d0] sm:$0xff] %v355_v58  ;;  %358 = vst [vmem:[#allocation2 + $0x1d8] sm:$0xff] %v357_v59  ;;  %v361_v61 = vld [vmem:[%s9231_s6 + $0x1e8] sm:$0xff]  ;;  %v363_v62 = vld [vmem:[%s9231_s6 + $0x1f0] sm:$0xff] }
  0x3e   : > { %360 = vst [vmem:[#allocation2 + $0x1e0] sm:$0xff] %v359_v60  ;;  %362 = vst [vmem:[#allocation2 + $0x1e8] sm:$0xff] %v361_v61  ;;  %v365_v63 = vld [vmem:[%s9231_s6 + $0x1f8] sm:$0xff]  ;;  %v367_v0 = vld [vmem:[%s9231_s6 + $0x200] sm:$0xff] }
  0x3f   : > { %364 = vst [vmem:[#allocation2 + $0x1f0] sm:$0xff] %v363_v62  ;;  %v369_v1 = vld [vmem:[%s9231_s6 + $0x208] sm:$0xff]  ;;  %366 = vst [vmem:[#allocation2 + $0x1f8] sm:$0xff] %v365_v63  ;;  %v371_v2 = vld [vmem:[%s9231_s6 + $0x210] sm:$0xff] }
  0x40   : > { %368 = vst [vmem:[#allocation2 + $0x200] sm:$0xff] %v367_v0  ;;  %370 = vst [vmem:[#allocation2 + $0x208] sm:$0xff] %v369_v1  ;;  %v373_v3 = vld [vmem:[%s9231_s6 + $0x218] sm:$0xff]  ;;  %v375_v4 = vld [vmem:[%s9231_s6 + $0x220] sm:$0xff] }
  0x41   : > { %372 = vst [vmem:[#allocation2 + $0x210] sm:$0xff] %v371_v2  ;;  %374 = vst [vmem:[#allocation2 + $0x218] sm:$0xff] %v373_v3  ;;  %v377_v5 = vld [vmem:[%s9231_s6 + $0x228] sm:$0xff]  ;;  %v379_v6 = vld [vmem:[%s9231_s6 + $0x230] sm:$0xff] }
  0x42   : > { %376 = vst [vmem:[#allocation2 + $0x220] sm:$0xff] %v375_v4  ;;  %v381_v7 = vld [vmem:[%s9231_s6 + $0x238] sm:$0xff]  ;;  %378 = vst [vmem:[#allocation2 + $0x228] sm:$0xff] %v377_v5  ;;  %v383_v8 = vld [vmem:[%s9231_s6 + $0x240] sm:$0xff] }
  0x43   : > { %380 = vst [vmem:[#allocation2 + $0x230] sm:$0xff] %v379_v6  ;;  %382 = vst [vmem:[#allocation2 + $0x238] sm:$0xff] %v381_v7  ;;  %v385_v9 = vld [vmem:[%s9231_s6 + $0x248] sm:$0xff]  ;;  %v387_v10 = vld [vmem:[%s9231_s6 + $0x250] sm:$0xff] }
  0x44   : > { %384 = vst [vmem:[#allocation2 + $0x240] sm:$0xff] %v383_v8  ;;  %386 = vst [vmem:[#allocation2 + $0x248] sm:$0xff] %v385_v9  ;;  %v389_v11 = vld [vmem:[%s9231_s6 + $0x258] sm:$0xff]  ;;  %v6692_v12 = vld [vmem:[%s9231_s6 + $0x260] sm:$0x3f] }
  0x45   : > { %388 = vst [vmem:[#allocation2 + $0x250] sm:$0xff] %v387_v10  ;;  %390 = vst [vmem:[#allocation2 + $0x258] sm:$0xff] %v389_v11 }
  0x46   : > { %401 = vst [vmem:[#allocation2 + $0x260] sm:$0x3f] %v6692_v12 }
  0x47   : > { %405 = vsyncadd [#allocation3], 9824 }
  0x48   : > { %9079 = dma.done.wait [#allocation3], 9824 }
  0x49   : > { %9080 = vsyncadd [#allocation3], 4294957472  ;;  %v8729_v13 = vld [vmem:[%s10840_s1 + $0x8] sm:$0xff]   ;;  %v8730_v14 = vld [vmem:[%s10840_s1 + $0x20] sm:$0xff]   ;;  %vm624_vm0 = vcmask 130048   ;;  %s7034_s11 = sshll.u32 %s9103_s22, 1 }
  0x4a   : > { %7397 = vmatprep.subr.bf16.mxu1 %v8729_v13  ;;  %v513_v15 = vld [vmem:[#allocation2 + $0x1] sm:$0xff]  ;;  %v514_v16 = vld [vmem:[#allocation2 + $0x9] sm:$0xff]  ;;  %7677 = vmatprep.subr.bf16.mxu0 %v8730_v14  ;;  %v515_v20 = vld [vmem:[#allocation2 + $0x11] sm:$0xff]  ;;  %s6590_s12 = sadd.s32 %s9099_s21, %s7034_s11  ;;  %s6597_s22 = sshll.u32 %s9311_s10, 4  ;;  %s10779_s22 = int_to_ptr.vmem [resolvable:$true] %s6597_s22 }
  0x4b   : > { %v2617_v17 = vld [vmem:[#allocation2 + $0x23] sm:$0xff]  ;;  %7398 = vmatpush3.bf16.msra.mxu1 %v8729_v13  ;;  %v581_v18 = vpack.c.bf16 %v514_v16, %v513_v15  ;;  %v2618_v19 = vld [vmem:[#allocation2 + $0x2b] sm:$0xff]  ;;  %v516_v21 = vld [vmem:[#allocation2 + $0x19] sm:$0xff]  ;;  %7678 = vmatpush3.bf16.msra.mxu0 %v8730_v14  ;;  %s7039_s21 = smul.u32 8704, %s6590_s12  ;;  %s10787_s26 = scalar_lea.sflag [#allocation5], %s190_s14 }
  0x4c   : > { %v2685_v22 = vpack.c.bf16 %v2618_v19, %v2617_v17  ;;  %v582_v23 = vpack.c.bf16 %v516_v21, %v515_v20  ;;  %v2619_v24 = vld [vmem:[#allocation2 + $0x33] sm:$0xff]  ;;  %v2620_v25 = vld [vmem:[#allocation2 + $0x3b] sm:$0xff]  ;;  %v8731_v27 = vld [vmem:[%s10840_s1 + $0x28] sm:$0xff]   ;;  %s9019_s29 = scalar_lea.vmem %s10779_s22, 8704  ;;  %s9117_s30 = smov [#allocation4]  }
  0x4d   : > { %7399 = vmatprep.mubr.msk.bf16.mxu1 %vm624_vm0, %v581_v18  ;;  %v2686_v26 = vpack.c.bf16 %v2620_v25, %v2619_v24  ;;  %v517_v28 = vld [vmem:[#allocation2 + $0x21] sm:$0xff]  ;;  %v518_v29 = vld [vmem:[#allocation2 + $0x29] sm:$0xff]  ;;  %7747 = vmatprep.subr.bf16.mxu0 %v8731_v27  ;;  %v519_v34 = vld [vmem:[#allocation2 + $0x31] sm:$0xff]  ;;  %s10777_s16 = scalar_lea.hbm %s10844_s5, %s7039_s21  ;;  %p9020_p12 = scmp.ne.s32.totalorder %s10779_s22, %s9019_s29 }
  0x4e   : > { %7679 = vmatprep.mubr.msk.bf16.mxu0 %vm624_vm0, %v2685_v22  ;;  %7400 = vmatmul.mubr.msk.bf16.vlgmr.msra.gmra.mrb[0].mxu1 %vm624_vm0, %v582_v23  ;;  %v2621_v30 = vld [vmem:[#allocation2 + $0x43] sm:$0xff]  ;;  %v2622_v31 = vld [vmem:[#allocation2 + $0x4b] sm:$0xff]  ;;  %v583_v32 = vpack.c.bf16 %v518_v29, %v517_v28  ;;  %v520_v35 = vld [vmem:[#allocation2 + $0x39] sm:$0xff]  ;;  %s9023_s9 = sshll.u32 %s9117_s30, 4  ;;  %s9024_s9 = int_to_ptr.vmem [resolvable:$false] %s9023_s9 }
  0x4f   : > { %7680 = vmatmul.mubr.msk.bf16.vlgmr.msra.gmra.mrb[0].mxu0 %vm624_vm0, %v2686_v26  ;;  %v2687_v33 = vpack.c.bf16 %v2622_v31, %v2621_v30  ;;  %v2623_v36 = vld [vmem:[#allocation2 + $0x53] sm:$0xff]  ;;  %v2624_v37 = vld [vmem:[#allocation2 + $0x5b] sm:$0xff]  ;;  %v522_v39 = vld [vmem:[#allocation2 + $0x49] sm:$0xff]  ;;  %v584_v42 = vpack.c.bf16 %v520_v35, %v519_v34  ;;  %p9021_p13 = pnand %p9020_p12, %p9203_p5  ;;  %s9025_s6 = scalar_lea.vmem %s9024_s9, 17408 }
  0x50   : > { %7748 = vmatpush3.bf16.msra.mxu0 %v8731_v27  ;;  %v521_v38 = vld [vmem:[#allocation2 + $0x41] sm:$0xff]  ;;  %7403 = vmatprep.mubr.msk.bf16.mxu1 %vm624_vm0, %v583_v32  ;;  %v2626_v41 = vld [vmem:[#allocation2 + $0x6b] sm:$0xff]  ;;  %v2688_v43 = vpack.c.bf16 %v2624_v37, %v2623_v36  ;;  %v524_v47 = vld [vmem:[#allocation2 + $0x59] sm:$0xff]  ;;  %p9026_p1 = scmp.lt.s32.totalorder %s10779_s22, %s9024_s9  ;;  %p9027_p2 = scmp.lt.s32.totalorder %s9025_s6, %s9019_s29 }
  0x51   : > { %7683 = vmatprep.mubr.msk.bf16.mxu0 %vm624_vm0, %v2687_v33  ;;  %v2625_v40 = vld [vmem:[#allocation2 + $0x63] sm:$0xff]  ;;  %v585_v44 = vpack.c.bf16 %v522_v39, %v521_v38  ;;  %v523_v46 = vld [vmem:[#allocation2 + $0x51] sm:$0xff]  ;;  %v2628_v49 = vld [vmem:[#allocation2 + $0x7b] sm:$0xff]  ;;  %p9022_p0 = pneg %p9021_p13 }
  0x52   : > { %v2689_v45 = vpack.c.bf16 %v2626_v41, %v2625_v40  ;;  %v2627_v48 = vld [vmem:[#allocation2 + $0x73] sm:$0xff]  ;;  %v525_v50 = vld [vmem:[#allocation2 + $0x61] sm:$0xff]  ;;  %v526_v51 = vld [vmem:[#allocation2 + $0x69] sm:$0xff]  ;;  %v586_v54 = vpack.c.bf16 %v524_v47, %v523_v46  ;;  %p9028_p3 = por %p9027_p2, %p9026_p1 }
  0x53   : > { %v2629_v52 = vld [vmem:[#allocation2 + $0x83] sm:$0xff]  ;;  %v2630_v53 = vld [vmem:[#allocation2 + $0x8b] sm:$0xff]  ;;  %v2690_v55 = vpack.c.bf16 %v2628_v49, %v2627_v48  ;;  %v587_v56 = vpack.c.bf16 %v526_v51, %v525_v50  ;;  %v528_v59 = vld [vmem:[#allocation2 + $0x79] sm:$0xff] }
  0x54   : > { %v2691_v57 = vpack.c.bf16 %v2630_v53, %v2629_v52  ;;  %v527_v58 = vld [vmem:[#allocation2 + $0x71] sm:$0xff]  ;;  %v2632_v61 = vld [vmem:[#allocation2 + $0x9b] sm:$0xff]  ;;  %v530_v63 = vld [vmem:[#allocation2 + $0x89] sm:$0xff]  ;;  %p9029_p4 = pnand %p9028_p3, %p9022_p0 }
  0x55   : > { %v2631_v60 = vld [vmem:[#allocation2 + $0x93] sm:$0xff]  ;;  %v529_v62 = vld [vmem:[#allocation2 + $0x81] sm:$0xff]  ;;  %v2634_v1 = vld [vmem:[#allocation2 + $0xab] sm:$0xff]  ;;  %v588_v2 = vpack.c.bf16 %v528_v59, %v527_v58 }
  0x56   : > { %7404 = vmatmul.mubr.msk.bf16.gmra.mrb[4].mxu1 %vm624_vm0, %v584_v42  ;;  %v2633_v0 = vld [vmem:[#allocation2 + $0xa3] sm:$0xff]  ;;  %v2692_v3 = vpack.c.bf16 %v2632_v61, %v2631_v60  ;;  %v589_v4 = vpack.c.bf16 %v530_v63, %v529_v62  ;;  %v531_v6 = vld [vmem:[#allocation2 + $0x91] sm:$0xff]  ;;  %v532_v7 = vld [vmem:[#allocation2 + $0x99] sm:$0xff] }
  0x57   : > { %7684 = vmatmul.mubr.msk.bf16.gmra.mrb[4].mxu0 %vm624_vm0, %v2688_v43  ;;  %7407 = vmatprep.mubr.msk.bf16.mxu1 %vm624_vm0, %v585_v44  ;;  %v2693_v5 = vpack.c.bf16 %v2634_v1, %v2633_v0  ;;  %v2635_v8 = vld [vmem:[#allocation2 + $0xb3] sm:$0xff]  ;;  %v2636_v9 = vld [vmem:[#allocation2 + $0xbb] sm:$0xff]  ;;  %v534_v11 = vld [vmem:[#allocation2 + $0xa9] sm:$0xff]  ;;  %v590_v14 = vpack.c.bf16 %v532_v7, %v531_v6 }
  0x58   : > { %7687 = vmatprep.mubr.msk.bf16.mxu0 %vm624_vm0, %v2689_v45  ;;  %v533_v10 = vld [vmem:[#allocation2 + $0xa1] sm:$0xff]  ;;  %v2638_v13 = vld [vmem:[#allocation2 + $0xcb] sm:$0xff]  ;;  %v2694_v15 = vpack.c.bf16 %v2636_v9, %v2635_v8  ;;  %v536_v19 = vld [vmem:[#allocation2 + $0xb9] sm:$0xff] }
  0x59   : > { %v2637_v12 = vld [vmem:[#allocation2 + $0xc3] sm:$0xff]  ;;  %v591_v16 = vpack.c.bf16 %v534_v11, %v533_v10  ;;  %v535_v18 = vld [vmem:[#allocation2 + $0xb1] sm:$0xff]  ;;  %v2640_v21 = vld [vmem:[#allocation2 + $0xdb] sm:$0xff] }
  0x5a   : > { %v2695_v17 = vpack.c.bf16 %v2638_v13, %v2637_v12  ;;  %v2639_v20 = vld [vmem:[#allocation2 + $0xd3] sm:$0xff]  ;;  %v537_v22 = vld [vmem:[#allocation2 + $0xc1] sm:$0xff]  ;;  %v538_v23 = vld [vmem:[#allocation2 + $0xc9] sm:$0xff]  ;;  %v592_v26 = vpack.c.bf16 %v536_v19, %v535_v18 }
  0x5b   : > { %v2641_v24 = vld [vmem:[#allocation2 + $0xe3] sm:$0xff]  ;;  %v2642_v25 = vld [vmem:[#allocation2 + $0xeb] sm:$0xff]  ;;  %v2696_v27 = vpack.c.bf16 %v2640_v21, %v2639_v20  ;;  %v593_v28 = vpack.c.bf16 %v538_v23, %v537_v22  ;;  %v540_v31 = vld [vmem:[#allocation2 + $0xd9] sm:$0xff] }
  0x5c   : > { %v2697_v29 = vpack.c.bf16 %v2642_v25, %v2641_v24  ;;  %v539_v30 = vld [vmem:[#allocation2 + $0xd1] sm:$0xff]  ;;  %v2644_v33 = vld [vmem:[#allocation2 + $0xfb] sm:$0xff]  ;;  %v542_v35 = vld [vmem:[#allocation2 + $0xe9] sm:$0xff] }
  0x5d   : > { %v2643_v32 = vld [vmem:[#allocation2 + $0xf3] sm:$0xff]  ;;  %v541_v34 = vld [vmem:[#allocation2 + $0xe1] sm:$0xff]  ;;  %v2646_v37 = vld [vmem:[#allocation2 + $0x10b] sm:$0xff]  ;;  %v594_v39 = vpack.c.bf16 %v540_v31, %v539_v30 }
  0x5e   : > { %7408 = vmatmul.mubr.msk.bf16.gmra.mrb[8].mxu1 %vm624_vm0, %v586_v54  ;;  %v2645_v36 = vld [vmem:[#allocation2 + $0x103] sm:$0xff]  ;;  %v2698_v40 = vpack.c.bf16 %v2644_v33, %v2643_v32  ;;  %v595_v41 = vpack.c.bf16 %v542_v35, %v541_v34  ;;  %v9354_v43 = vld [vmem:[%s10840_s1 + $0x30] sm:$0xff]   ;;  %v544_v45 = vld [vmem:[#allocation2 + $0xf9] sm:$0xff] }
  0x5f   : > { %7688 = vmatmul.mubr.msk.bf16.gmra.mrb[8].mxu0 %vm624_vm0, %v2690_v55  ;;  %7411 = vmatprep.mubr.msk.bf16.mxu1 %vm624_vm0, %v587_v56  ;;  %v8732_v38 = vld [vmem:[%s10840_s1] sm:$0xff]   ;;  %v2699_v42 = vpack.c.bf16 %v2646_v37, %v2645_v36  ;;  %v543_v44 = vld [vmem:[#allocation2 + $0xf1] sm:$0xff]  ;;  %v546_v49 = vld [vmem:[#allocation2 + $0x109] sm:$0xff] }
  0x60   : > { %7691 = vmatprep.mubr.msk.bf16.mxu0 %vm624_vm0, %v2691_v57  ;;  %7467 = vmatprep.subr.bf16.mxu1 %v8732_v38  ;;  %v2647_v46 = vld [vmem:[#allocation2 + $0x113] sm:$0xff]  ;;  %v2648_v47 = vld [vmem:[#allocation2 + $0x11b] sm:$0xff]  ;;  %v2649_v50 = vld [vmem:[#allocation2 + $0x123] sm:$0xff]  ;;  %v596_v52 = vpack.c.bf16 %v544_v45, %v543_v44 }
  0x61   : > { %7468 = vmatpush3.bf16.msra.mxu1 %v8732_v38  ;;  %7817 = vmatprep.subr.bf16.mxu0 %v9354_v43  ;;  %v545_v48 = vld [vmem:[#allocation2 + $0x101] sm:$0xff]  ;;  %v2650_v51 = vld [vmem:[#allocation2 + $0x12b] sm:$0xff]  ;;  %v2700_v53 = vpack.c.bf16 %v2648_v47, %v2647_v46  ;;  %v548_v57 = vld [vmem:[#allocation2 + $0x119] sm:$0xff] }
  0x62   : > { %v597_v54 = vpack.c.bf16 %v546_v49, %v545_v48  ;;  %v2701_v55 = vpack.c.bf16 %v2650_v51, %v2649_v50  ;;  %v547_v56 = vld [vmem:[#allocation2 + $0x111] sm:$0xff]  ;;  %v2652_v59 = vld [vmem:[#allocation2 + $0x13b] sm:$0xff]  ;;  %v550_v61 = vld [vmem:[#allocation2 + $0x129] sm:$0xff] }
  0x63   : > { %v2651_v58 = vld [vmem:[#allocation2 + $0x133] sm:$0xff]  ;;  %v549_v60 = vld [vmem:[#allocation2 + $0x121] sm:$0xff]  ;;  %v2654_v63 = vld [vmem:[#allocation2 + $0x14b] sm:$0xff]  ;;  %v598_v0 = vpack.c.bf16 %v548_v57, %v547_v56 }
  0x64   : > { %v2653_v62 = vld [vmem:[#allocation2 + $0x143] sm:$0xff]  ;;  %v2702_v1 = vpack.c.bf16 %v2652_v59, %v2651_v58  ;;  %v2655_v6 = vld [vmem:[#allocation2 + $0x153] sm:$0xff]  ;;  %v2656_v7 = vld [vmem:[#allocation2 + $0x15b] sm:$0xff] }
  0x65   : > { %v553_v8 = vld [vmem:[#allocation2 + $0x141] sm:$0xff]  ;;  %v554_v9 = vld [vmem:[#allocation2 + $0x149] sm:$0xff]  ;;  %v2704_v13 = vpack.c.bf16 %v2656_v7, %v2655_v6  ;;  %v2659_v18 = vld [vmem:[#allocation2 + $0x173] sm:$0xff] }
  0x66   : > { %7412 = vmatmul.mubr.msk.bf16.gmra.mrb[12].mxu1 %vm624_vm0, %v588_v2  ;;  %v599_v2 = vpack.c.bf16 %v550_v61, %v549_v60  ;;  %v2657_v10 = vld [vmem:[#allocation2 + $0x163] sm:$0xff]  ;;  %v2658_v11 = vld [vmem:[#allocation2 + $0x16b] sm:$0xff]  ;;  %v2660_v19 = vld [vmem:[#allocation2 + $0x17b] sm:$0xff] }
  0x67   : > { %7692 = vmatmul.mubr.msk.bf16.gmra.mrb[12].mxu0 %vm624_vm0, %v2692_v3  ;;  %7415 = vmatprep.mubr.msk.bf16.mxu1 %vm624_vm0, %v589_v4  ;;  %v2703_v3 = vpack.c.bf16 %v2654_v63, %v2653_v62  ;;  %v551_v4 = vld [vmem:[#allocation2 + $0x131] sm:$0xff]  ;;  %v557_v20 = vld [vmem:[#allocation2 + $0x161] sm:$0xff]  ;;  %v558_v21 = vld [vmem:[#allocation2 + $0x169] sm:$0xff]  ;;  %v2706_v25 = vpack.c.bf16 %v2660_v19, %v2659_v18 }
  0x68   : > { %7695 = vmatprep.mubr.msk.bf16.mxu0 %vm624_vm0, %v2693_v5  ;;  %v552_v5 = vld [vmem:[#allocation2 + $0x139] sm:$0xff]  ;;  %v2661_v22 = vld [vmem:[#allocation2 + $0x183] sm:$0xff]  ;;  %v2662_v23 = vld [vmem:[#allocation2 + $0x18b] sm:$0xff] }
  0x69   : > { %v600_v12 = vpack.c.bf16 %v552_v5, %v551_v4  ;;  %v2663_v30 = vld [vmem:[#allocation2 + $0x193] sm:$0xff]  ;;  %v2664_v31 = vld [vmem:[#allocation2 + $0x19b] sm:$0xff]  ;;  %v562_v33 = vld [vmem:[#allocation2 + $0x189] sm:$0xff] }
  0x6a   : > { %v561_v32 = vld [vmem:[#allocation2 + $0x181] sm:$0xff]  ;;  %v2666_v35 = vld [vmem:[#allocation2 + $0x1ab] sm:$0xff]  ;;  %v2708_v37 = vpack.c.bf16 %v2664_v31, %v2663_v30 }
  0x6b   : > { %v2665_v34 = vld [vmem:[#allocation2 + $0x1a3] sm:$0xff]  ;;  %v605_v38 = vpack.c.bf16 %v562_v33, %v561_v32  ;;  %v2668_v44 = vld [vmem:[#allocation2 + $0x1bb] sm:$0xff]  ;;  %v2670_v48 = vld [vmem:[#allocation2 + $0x1cb] sm:$0xff] }
  0x6c   : > { %v565_v45 = vld [vmem:[#allocation2 + $0x1a1] sm:$0xff]  ;;  %v566_v46 = vld [vmem:[#allocation2 + $0x1a9] sm:$0xff] }
  0x6d   : > { %v2669_v47 = vld [vmem:[#allocation2 + $0x1c3] sm:$0xff]  ;;  %v607_v51 = vpack.c.bf16 %v566_v46, %v565_v45  ;;  %v2672_v56 = vld [vmem:[#allocation2 + $0x1db] sm:$0xff]  ;;  %v2674_v60 = vld [vmem:[#allocation2 + $0x1eb] sm:$0xff] }
  0x6e   : > { %7416 = vmatmul.mubr.msk.bf16.gmra.mrb[16].mxu1 %vm624_vm0, %v590_v14  ;;  %v601_v14 = vpack.c.bf16 %v554_v9, %v553_v8  ;;  %v569_v57 = vld [vmem:[#allocation2 + $0x1c1] sm:$0xff]  ;;  %v570_v58 = vld [vmem:[#allocation2 + $0x1c9] sm:$0xff] }
  0x6f   : > { %7696 = vmatmul.mubr.msk.bf16.gmra.mrb[16].mxu0 %vm624_vm0, %v2694_v15  ;;  %7419 = vmatprep.mubr.msk.bf16.mxu1 %vm624_vm0, %v591_v16  ;;  %v2705_v15 = vpack.c.bf16 %v2658_v11, %v2657_v10  ;;  %v555_v16 = vld [vmem:[#allocation2 + $0x151] sm:$0xff]  ;;  %v2673_v59 = vld [vmem:[#allocation2 + $0x1e3] sm:$0xff]  ;;  %v609_v63 = vpack.c.bf16 %v570_v58, %v569_v57  ;;  %v2676_v4 = vld [vmem:[#allocation2 + $0x1fb] sm:$0xff] }
  0x70   : > { %7699 = vmatprep.mubr.msk.bf16.mxu0 %vm624_vm0, %v2695_v17  ;;  %v556_v17 = vld [vmem:[#allocation2 + $0x159] sm:$0xff]  ;;  %v573_v5 = vld [vmem:[#allocation2 + $0x1e1] sm:$0xff]  ;;  %v574_v6 = vld [vmem:[#allocation2 + $0x1e9] sm:$0xff] }
  0x71   : > { %v602_v24 = vpack.c.bf16 %v556_v17, %v555_v16  ;;  %v2677_v7 = vld [vmem:[#allocation2 + $0x203] sm:$0xff]  ;;  %v2678_v8 = vld [vmem:[#allocation2 + $0x20b] sm:$0xff]  ;;  %v611_v11 = vpack.c.bf16 %v574_v6, %v573_v5  ;;  %v2680_v16 = vld [vmem:[#allocation2 + $0x21b] sm:$0xff] }
  0x72   : > { %v577_v17 = vld [vmem:[#allocation2 + $0x201] sm:$0xff]  ;;  %v578_v18 = vld [vmem:[#allocation2 + $0x209] sm:$0xff] }
  0x73   : > { %v2681_v19 = vld [vmem:[#allocation2 + $0x223] sm:$0xff]  ;;  %v3204_v32 = vld [vmem:[#allocation2 + $0x2c] sm:$0xff] }
  0x74   : > { %v410_v30 = vld [vmem:[#allocation2 + $0x8] sm:$0xff] }
  0x75   : > { %v3203_v31 = vld [vmem:[#allocation2 + $0x24] sm:$0xff]  ;;  %v3208_v45 = vld [vmem:[#allocation2 + $0x4c] sm:$0xff] }
  0x76   : > { %7420 = vmatmul.mubr.msk.bf16.gmra.mrb[20].mxu1 %vm624_vm0, %v592_v26  ;;  %v603_v26 = vpack.c.bf16 %v558_v21, %v557_v20  ;;  %v2682_v20 = vld [vmem:[#allocation2 + $0x22b] sm:$0xff] }
  0x77   : > { %7700 = vmatmul.mubr.msk.bf16.gmra.mrb[20].mxu0 %vm624_vm0, %v2696_v27  ;;  %7423 = vmatprep.mubr.msk.bf16.mxu1 %vm624_vm0, %v593_v28  ;;  %v2707_v27 = vpack.c.bf16 %v2662_v23, %v2661_v22  ;;  %v559_v28 = vld [vmem:[#allocation2 + $0x171] sm:$0xff]  ;;  %v613_v23 = vpack.c.bf16 %v578_v18, %v577_v17  ;;  %v3211_v57 = vld [vmem:[#allocation2 + $0x64] sm:$0xff] }
  0x78   : > { %7703 = vmatprep.mubr.msk.bf16.mxu0 %vm624_vm0, %v2697_v29  ;;  %v560_v29 = vld [vmem:[#allocation2 + $0x179] sm:$0xff]  ;;  %v3212_v58 = vld [vmem:[#allocation2 + $0x6c] sm:$0xff]  ;;  %v3215_v5 = vld [vmem:[#allocation2 + $0x84] sm:$0xff] }
  0x79   : > { %v604_v36 = vpack.c.bf16 %v560_v29, %v559_v28  ;;  %v2684_v28 = vld [vmem:[#allocation2 + $0x23b] sm:$0xff]  ;;  %v3216_v6 = vld [vmem:[#allocation2 + $0x8c] sm:$0xff]  ;;  %v3219_v17 = vld [vmem:[#allocation2 + $0xa4] sm:$0xff] }
  0x7a   : > { %v409_v29 = vld [vmem:[#allocation2] sm:$0xff]  ;;  %v3220_v18 = vld [vmem:[#allocation2 + $0xac] sm:$0xff] }
  0x7e   : > { %7424 = vmatmul.mubr.msk.bf16.gmra.mrb[24].mxu1 %vm624_vm0, %v594_v39  ;;  %v2709_v39 = vpack.c.bf16 %v2666_v35, %v2665_v34  ;;  %v477_v35 = vpack.c.bf16 %v410_v30, %v409_v29  ;;  %v3223_v29 = vld [vmem:[#allocation2 + $0xc4] sm:$0xff]  ;;  %v3224_v30 = vld [vmem:[#allocation2 + $0xcc] sm:$0xff] }
  0x7f   : > { %7704 = vmatmul.mubr.msk.bf16.gmra.mrb[24].mxu0 %vm624_vm0, %v2698_v40  ;;  %7427 = vmatprep.mubr.msk.bf16.mxu1 %vm624_vm0, %v595_v41  ;;  %v563_v40 = vld [vmem:[#allocation2 + $0x191] sm:$0xff]  ;;  %v564_v41 = vld [vmem:[#allocation2 + $0x199] sm:$0xff] }
  0x80   : > { %7707 = vmatprep.mubr.msk.bf16.mxu0 %vm624_vm0, %v2699_v42  ;;  %v2667_v42 = vld [vmem:[#allocation2 + $0x1b3] sm:$0xff]  ;;  %v606_v49 = vpack.c.bf16 %v564_v41, %v563_v40  ;;  %v3206_v40 = vld [vmem:[#allocation2 + $0x3c] sm:$0xff] }
  0x81   : > { %v2710_v50 = vpack.c.bf16 %v2668_v44, %v2667_v42  ;;  %v413_v41 = vld [vmem:[#allocation2 + $0x20] sm:$0xff]  ;;  %v414_v42 = vld [vmem:[#allocation2 + $0x28] sm:$0xff] }
  0x82   : > { %v3207_v44 = vld [vmem:[#allocation2 + $0x44] sm:$0xff] }
  0x86   : > { %7428 = vmatmul.mubr.msk.bf16.gmra.mrb[28].mxu1 %vm624_vm0, %v596_v52  ;;  %v2711_v52 = vpack.c.bf16 %v2670_v48, %v2669_v47  ;;  %v479_v48 = vpack.c.bf16 %v414_v42, %v413_v41  ;;  %v3227_v41 = vld [vmem:[#allocation2 + $0xe4] sm:$0xff]  ;;  %v3228_v42 = vld [vmem:[#allocation2 + $0xec] sm:$0xff] }
  0x87   : > { %7708 = vmatmul.mubr.msk.bf16.gmra.mrb[28].mxu0 %vm624_vm0, %v2700_v53  ;;  %7431 = vmatprep.mubr.msk.bf16.mxu1 %vm624_vm0, %v597_v54  ;;  %v567_v53 = vld [vmem:[#allocation2 + $0x1b1] sm:$0xff]  ;;  %v568_v54 = vld [vmem:[#allocation2 + $0x1b9] sm:$0xff] }
  0x88   : > { %7711 = vmatprep.mubr.msk.bf16.mxu0 %vm624_vm0, %v2701_v55  ;;  %v2671_v55 = vld [vmem:[#allocation2 + $0x1d3] sm:$0xff]  ;;  %v608_v61 = vpack.c.bf16 %v568_v54, %v567_v53  ;;  %v3210_v54 = vld [vmem:[#allocation2 + $0x5c] sm:$0xff] }
  0x89   : > { %v2712_v62 = vpack.c.bf16 %v2672_v56, %v2671_v55  ;;  %v8734_v53 = vld [vmem:[%s10840_s1 + $0x10] sm:$0xff]   ;;  %v417_v55 = vld [vmem:[#allocation2 + $0x40] sm:$0xff]  ;;  %v418_v56 = vld [vmem:[#allocation2 + $0x48] sm:$0xff] }
  0x8a   : > { %7537 = vmatprep.subr.bf16.mxu1 %v8734_v53 }
  0x8e   : > { %7432 = vmatmul.mubr.msk.bf16.gmra.mrb[32].mxu1 %vm624_vm0, %v598_v0  ;;  %v2713_v0 = vpack.c.bf16 %v2674_v60, %v2673_v59 }
  0x8f   : > { %7712 = vmatmul.mubr.msk.bf16.gmra.mrb[32].mxu0 %vm624_vm0, %v2702_v1  ;;  %7435 = vmatprep.mubr.msk.bf16.mxu1 %vm624_vm0, %v599_v2  ;;  %v571_v1 = vld [vmem:[#allocation2 + $0x1d1] sm:$0xff]  ;;  %v572_v2 = vld [vmem:[#allocation2 + $0x1d9] sm:$0xff] }
  0x90   : > { %7715 = vmatprep.mubr.msk.bf16.mxu0 %vm624_vm0, %v2703_v3  ;;  %v2675_v3 = vld [vmem:[#allocation2 + $0x1f3] sm:$0xff]  ;;  %v610_v9 = vpack.c.bf16 %v572_v2, %v571_v1  ;;  %v3214_v2 = vld [vmem:[#allocation2 + $0x7c] sm:$0xff] }
  0x91   : > { %v2714_v10 = vpack.c.bf16 %v2676_v4, %v2675_v3  ;;  %v9423_v1 = vld [vmem:[%s10840_s1 + $0x38] sm:$0xff]   ;;  %v421_v3 = vld [vmem:[#allocation2 + $0x60] sm:$0xff]  ;;  %v422_v4 = vld [vmem:[#allocation2 + $0x68] sm:$0xff] }
  0x96   : > { %7436 = vmatmul.mubr.msk.bf16.gmra.mrb[36].mxu1 %vm624_vm0, %v600_v12  ;;  %v2715_v12 = vpack.c.bf16 %v2678_v8, %v2677_v7 }
  0x97   : > { %7716 = vmatmul.mubr.msk.bf16.gmra.mrb[36].mxu0 %vm624_vm0, %v2704_v13  ;;  %7439 = vmatprep.mubr.msk.bf16.mxu1 %vm624_vm0, %v601_v14  ;;  %v575_v13 = vld [vmem:[#allocation2 + $0x1f1] sm:$0xff]  ;;  %v576_v14 = vld [vmem:[#allocation2 + $0x1f9] sm:$0xff] }
  0x98   : > { %7719 = vmatprep.mubr.msk.bf16.mxu0 %vm624_vm0, %v2705_v15  ;;  %v2679_v15 = vld [vmem:[#allocation2 + $0x213] sm:$0xff]  ;;  %v612_v21 = vpack.c.bf16 %v576_v14, %v575_v13  ;;  %v3218_v14 = vld [vmem:[#allocation2 + $0x9c] sm:$0xff] }
  0x99   : > { %v2716_v22 = vpack.c.bf16 %v2680_v16, %v2679_v15  ;;  %v3217_v13 = vld [vmem:[#allocation2 + $0x94] sm:$0xff]  ;;  %v425_v15 = vld [vmem:[#allocation2 + $0x80] sm:$0xff]  ;;  %v426_v16 = vld [vmem:[#allocation2 + $0x88] sm:$0xff] }
  0x9e   : > { %7440 = vmatmul.mubr.msk.bf16.gmra.mrb[40].mxu1 %vm624_vm0, %v602_v24  ;;  %v2717_v24 = vpack.c.bf16 %v2682_v20, %v2681_v19  ;;  %v9438_v20 = vpack.c.bf16 %v3218_v14, %v3217_v13  ;;  %v443_v13 = vld [vmem:[#allocation2 + $0x110] sm:$0xff]  ;;  %v444_v14 = vld [vmem:[#allocation2 + $0x118] sm:$0xff] }
  0x9f   : > { %7720 = vmatmul.mubr.msk.bf16.gmra.mrb[40].mxu0 %vm624_vm0, %v2706_v25  ;;  %7443 = vmatprep.mubr.msk.bf16.mxu1 %vm624_vm0, %v603_v26  ;;  %v579_v25 = vld [vmem:[#allocation2 + $0x211] sm:$0xff]  ;;  %v580_v26 = vld [vmem:[#allocation2 + $0x219] sm:$0xff] }
  0xa0   : > { %7723 = vmatprep.mubr.msk.bf16.mxu0 %vm624_vm0, %v2707_v27  ;;  %v2683_v27 = vld [vmem:[#allocation2 + $0x233] sm:$0xff]  ;;  %v614_v33 = vpack.c.bf16 %v580_v26, %v579_v25  ;;  %v3222_v26 = vld [vmem:[#allocation2 + $0xbc] sm:$0xff] }
  0xa1   : > { %v2718_v34 = vpack.c.bf16 %v2684_v28, %v2683_v27  ;;  %v3221_v25 = vld [vmem:[#allocation2 + $0xb4] sm:$0xff]  ;;  %v429_v27 = vld [vmem:[#allocation2 + $0xa0] sm:$0xff]  ;;  %v430_v28 = vld [vmem:[#allocation2 + $0xa8] sm:$0xff] }
  0xa6   : > { %7444 = vmatmul.mubr.msk.bf16.gmra.mrb[44].mxu1 %vm624_vm0, %v604_v36  ;;  %v3271_v36 = vpack.c.bf16 %v3204_v32, %v3203_v31  ;;  %v9448_v32 = vpack.c.bf16 %v3222_v26, %v3221_v25 }
  0xa7   : > { %7724 = vmatmul.mubr.msk.bf16.gmra.mrb[44].mxu0 %vm624_vm0, %v2708_v37  ;;  %7447 = vmatprep.mubr.msk.bf16.mxu1 %vm624_vm0, %v605_v38  ;;  %v411_v37 = vld [vmem:[#allocation2 + $0x10] sm:$0xff]  ;;  %v412_v38 = vld [vmem:[#allocation2 + $0x18] sm:$0xff] }
  0xa8   : > { %7727 = vmatprep.mubr.msk.bf16.mxu0 %vm624_vm0, %v2709_v39  ;;  %v3205_v39 = vld [vmem:[#allocation2 + $0x34] sm:$0xff]  ;;  %v478_v46 = vpack.c.bf16 %v412_v38, %v411_v37  ;;  %v3226_v38 = vld [vmem:[#allocation2 + $0xdc] sm:$0xff] }
  0xa9   : > { %v3272_v47 = vpack.c.bf16 %v3206_v40, %v3205_v39  ;;  %v3225_v37 = vld [vmem:[#allocation2 + $0xd4] sm:$0xff]  ;;  %v433_v39 = vld [vmem:[#allocation2 + $0xc0] sm:$0xff]  ;;  %v434_v40 = vld [vmem:[#allocation2 + $0xc8] sm:$0xff] }
  0xae   : > { %7448 = vmatmul.mubr.msk.bf16.gmra.mrb[48].mxu1 %vm624_vm0, %v606_v49  ;;  %v9401_v49 = vpack.c.bf16 %v3208_v45, %v3207_v44  ;;  %v9458_v45 = vpack.c.bf16 %v3226_v38, %v3225_v37 }
  0xaf   : > { %7728 = vmatmul.mubr.msk.bf16.gmra.mrb[48].mxu0 %vm624_vm0, %v2710_v50  ;;  %7451 = vmatprep.mubr.msk.bf16.mxu1 %vm624_vm0, %v607_v51  ;;  %v415_v50 = vld [vmem:[#allocation2 + $0x30] sm:$0xff]  ;;  %v416_v51 = vld [vmem:[#allocation2 + $0x38] sm:$0xff] }
  0xb0   : > { %7731 = vmatprep.mubr.msk.bf16.mxu0 %vm624_vm0, %v2711_v52  ;;  %v3209_v52 = vld [vmem:[#allocation2 + $0x54] sm:$0xff]  ;;  %v480_v59 = vpack.c.bf16 %v416_v51, %v415_v50 }
  0xb1   : > { %v9412_v60 = vpack.c.bf16 %v3210_v54, %v3209_v52  ;;  %v436_v50 = vld [vmem:[#allocation2 + $0xd8] sm:$0xff]  ;;  %v438_v54 = vld [vmem:[#allocation2 + $0xe8] sm:$0xff] }
  0xb2   : > { %v3229_v51 = vld [vmem:[#allocation2 + $0xf4] sm:$0xff]  ;;  %v3230_v52 = vld [vmem:[#allocation2 + $0xfc] sm:$0xff] }
  0xb6   : > { %7452 = vmatmul.mubr.msk.bf16.gmra.mrb[52].mxu1 %vm624_vm0, %v608_v61  ;;  %v481_v61 = vpack.c.bf16 %v418_v56, %v417_v55  ;;  %v3231_v55 = vld [vmem:[#allocation2 + $0x104] sm:$0xff]  ;;  %v3232_v56 = vld [vmem:[#allocation2 + $0x10c] sm:$0xff] }
  0xb7   : > { %7732 = vmatmul.mubr.msk.bf16.gmra.mrb[52].mxu0 %vm624_vm0, %v2712_v62  ;;  %7455 = vmatprep.mubr.msk.bf16.mxu1 %vm624_vm0, %v609_v63  ;;  %v9414_v62 = vpack.c.bf16 %v3212_v58, %v3211_v57  ;;  %v419_v63 = vld [vmem:[#allocation2 + $0x50] sm:$0xff]  ;;  %v9468_v58 = vpack.c.bf16 %v3230_v52, %v3229_v51  ;;  %v3247_v51 = vld [vmem:[#allocation2 + $0x184] sm:$0xff] }
  0xb8   : > { %7735 = vmatprep.mubr.msk.bf16.mxu0 %vm624_vm0, %v2713_v0  ;;  %v3213_v0 = vld [vmem:[#allocation2 + $0x74] sm:$0xff]  ;;  %v3248_v52 = vld [vmem:[#allocation2 + $0x18c] sm:$0xff] }
  0xb9   : > { %v9428_v8 = vpack.c.bf16 %v3214_v2, %v3213_v0  ;;  %v3233_v0 = vld [vmem:[#allocation2 + $0x114] sm:$0xff]  ;;  %v3234_v2 = vld [vmem:[#allocation2 + $0x11c] sm:$0xff] }
  0xbe   : > { %7456 = vmatmul.mubr.msk.bf16.gmra.mrb[56].mxu1 %vm624_vm0, %v610_v9  ;;  %v483_v9 = vpack.c.bf16 %v422_v4, %v421_v3  ;;  %v441_v3 = vld [vmem:[#allocation2 + $0x100] sm:$0xff]  ;;  %v442_v4 = vld [vmem:[#allocation2 + $0x108] sm:$0xff] }
  0xbf   : > { %7736 = vmatmul.mubr.msk.bf16.gmra.mrb[56].mxu0 %vm624_vm0, %v2714_v10  ;;  %7459 = vmatprep.mubr.msk.bf16.mxu1 %vm624_vm0, %v611_v11  ;;  %v9430_v10 = vpack.c.bf16 %v3216_v6, %v3215_v5  ;;  %v423_v11 = vld [vmem:[#allocation2 + $0x70] sm:$0xff]  ;;  %v3235_v5 = vld [vmem:[#allocation2 + $0x124] sm:$0xff] }
  0xc0   : > { %7739 = vmatprep.mubr.msk.bf16.mxu0 %vm624_vm0, %v2715_v12  ;;  %v424_v12 = vld [vmem:[#allocation2 + $0x78] sm:$0xff]  ;;  %v3236_v6 = vld [vmem:[#allocation2 + $0x12c] sm:$0xff] }
  0xc1   : > { %v484_v19 = vpack.c.bf16 %v424_v12, %v423_v11  ;;  %v493_v11 = vpack.c.bf16 %v442_v4, %v441_v3  ;;  %v9480_v12 = vpack.c.bf16 %v3236_v6, %v3235_v5  ;;  %v3251_v3 = vld [vmem:[#allocation2 + $0x1a4] sm:$0xff]  ;;  %v3252_v4 = vld [vmem:[#allocation2 + $0x1ac] sm:$0xff] }
  0xc6   : > { %7460 = vmatmul.mubr.msk.bf16.gmra.mrb[60].mxu1 %vm624_vm0, %v612_v21  ;;  %v485_v21 = vpack.c.bf16 %v426_v16, %v425_v15  ;;  %v3237_v15 = vld [vmem:[#allocation2 + $0x134] sm:$0xff]  ;;  %v3238_v16 = vld [vmem:[#allocation2 + $0x13c] sm:$0xff] }
  0xc7   : > { %7740 = vmatmul.mubr.msk.bf16.gmra.mrb[60].mxu0 %vm624_vm0, %v2716_v22  ;;  %7463 = vmatprep.mubr.msk.bf16.mxu1 %vm624_vm0, %v613_v23  ;;  %v9440_v22 = vpack.c.bf16 %v3220_v18, %v3219_v17  ;;  %v427_v23 = vld [vmem:[#allocation2 + $0x90] sm:$0xff]  ;;  %v445_v17 = vld [vmem:[#allocation2 + $0x120] sm:$0xff]  ;;  %v446_v18 = vld [vmem:[#allocation2 + $0x128] sm:$0xff] }
  0xc8   : > { %7743 = vmatprep.mubr.msk.bf16.mxu0 %vm624_vm0, %v2717_v24  ;;  %v428_v24 = vld [vmem:[#allocation2 + $0x98] sm:$0xff]  ;;  %v495_v25 = vpack.c.bf16 %v446_v18, %v445_v17  ;;  %v461_v17 = vld [vmem:[#allocation2 + $0x1a0] sm:$0xff]  ;;  %v462_v18 = vld [vmem:[#allocation2 + $0x1a8] sm:$0xff] }
  0xc9   : > { %v486_v31 = vpack.c.bf16 %v428_v24, %v427_v23  ;;  %v494_v23 = vpack.c.bf16 %v444_v14, %v443_v13  ;;  %v9488_v24 = vpack.c.bf16 %v3238_v16, %v3237_v15  ;;  %v459_v13 = vld [vmem:[#allocation2 + $0x190] sm:$0xff]  ;;  %v460_v14 = vld [vmem:[#allocation2 + $0x198] sm:$0xff] }
  0xca   : > { %v3253_v15 = vld [vmem:[#allocation2 + $0x1b4] sm:$0xff]  ;;  %v3254_v16 = vld [vmem:[#allocation2 + $0x1bc] sm:$0xff] }
  0xce   : > { %7464 = vmatmul.mubr.msk.bf16.gmra.mrb[64].mxu1 %vm624_vm0, %v614_v33  ;;  %v487_v33 = vpack.c.bf16 %v430_v28, %v429_v27  ;;  %v447_v27 = vld [vmem:[#allocation2 + $0x130] sm:$0xff]  ;;  %v448_v28 = vld [vmem:[#allocation2 + $0x138] sm:$0xff] }
  0xcf   : > { %7744 = vmatmul.mubr.msk.bf16.gmra.mrb[64].mxu0 %vm624_vm0, %v2718_v34  ;;  %7469 = vmatprep.mubr.msk.bf16.mxu1 %vm624_vm0, %v477_v35  ;;  %v9450_v34 = vpack.c.bf16 %v3224_v30, %v3223_v29  ;;  %v431_v35 = vld [vmem:[#allocation2 + $0xb0] sm:$0xff]  ;;  %v3242_v30 = vld [vmem:[#allocation2 + $0x15c] sm:$0xff]  ;;  %v496_v37 = vpack.c.bf16 %v448_v28, %v447_v27  ;;  %v503_v27 = vpack.c.bf16 %v462_v18, %v461_v17 }
  0xd0   : > { %7749 = vmatprep.mubr.msk.bf16.mxu0 %vm624_vm0, %v3271_v36  ;;  %v432_v36 = vld [vmem:[#allocation2 + $0xb8] sm:$0xff] }
  0xd1   : > { %v488_v44 = vpack.c.bf16 %v432_v36, %v431_v35  ;;  %v3241_v29 = vld [vmem:[#allocation2 + $0x154] sm:$0xff]  ;;  %v3243_v35 = vld [vmem:[#allocation2 + $0x164] sm:$0xff]  ;;  %v3244_v36 = vld [vmem:[#allocation2 + $0x16c] sm:$0xff] }
  0xd2   : > { %v9498_v38 = vpack.c.bf16 %v3242_v30, %v3241_v29  ;;  %v463_v29 = vld [vmem:[#allocation2 + $0x1b0] sm:$0xff]  ;;  %v464_v30 = vld [vmem:[#allocation2 + $0x1b8] sm:$0xff] }
  0xd6   : > { %7470 = vmatmul.mubr.msk.bf16.vlgmr.msra.gmra.mrb[0].mxu1 %vm624_vm0, %v478_v46  ;;  %v489_v46 = vpack.c.bf16 %v434_v40, %v433_v39  ;;  %v9500_v40 = vpack.c.bf16 %v3244_v36, %v3243_v35  ;;  %v465_v35 = vld [vmem:[#allocation2 + $0x1c0] sm:$0xff]  ;;  %v466_v36 = vld [vmem:[#allocation2 + $0x1c8] sm:$0xff] }
  0xd7   : > { %7750 = vmatmul.mubr.msk.bf16.vlgmr.msra.gmra.mrb[0].mxu0 %vm624_vm0, %v3272_v47  ;;  %7473 = vmatprep.mubr.msk.bf16.mxu1 %vm624_vm0, %v479_v48  ;;  %v9460_v47 = vpack.c.bf16 %v3228_v42, %v3227_v41  ;;  %v435_v48 = vld [vmem:[#allocation2 + $0xd0] sm:$0xff]  ;;  %v452_v42 = vld [vmem:[#allocation2 + $0x158] sm:$0xff] }
  0xd8   : > { %7818 = vmatpush3.bf16.msra.mxu0 %v9354_v43  ;;  %7753 = vmatprep.mubr.msk.bf16.mxu0 %vm624_vm0, %v9401_v49  ;;  %v420_v43 = vld [vmem:[#allocation2 + $0x58] sm:$0xff]  ;;  %v490_v57 = vpack.c.bf16 %v436_v50, %v435_v48  ;;  %v451_v41 = vld [vmem:[#allocation2 + $0x150] sm:$0xff]  ;;  %v453_v48 = vld [vmem:[#allocation2 + $0x160] sm:$0xff] }
  0xd9   : > { %7538 = vmatpush3.bf16.msra.mxu1 %v8734_v53  ;;  %7887 = vmatprep.subr.bf16.mxu0 %v9423_v1  ;;  %v482_v7 = vpack.c.bf16 %v420_v43, %v419_v63  ;;  %v437_v53 = vld [vmem:[#allocation2 + $0xe0] sm:$0xff]  ;;  %v439_v63 = vld [vmem:[#allocation2 + $0xf0] sm:$0xff]  ;;  %v440_v43 = vld [vmem:[#allocation2 + $0xf8] sm:$0xff] }
  0xda   : > { %v454_v50 = vld [vmem:[#allocation2 + $0x168] sm:$0xff] }
  0xde   : > { %7474 = vmatmul.mubr.msk.bf16.gmra.mrb[4].mxu1 %vm624_vm0, %v480_v59  ;;  %v491_v59 = vpack.c.bf16 %v438_v54, %v437_v53  ;;  %v498_v53 = vpack.c.bf16 %v452_v42, %v451_v41  ;;  %v504_v41 = vpack.c.bf16 %v464_v30, %v463_v29  ;;  %v3269_v29 = vld [vmem:[#allocation2 + $0x234] sm:$0xff]  ;;  %v3270_v30 = vld [vmem:[#allocation2 + $0x23c] sm:$0xff] }
  0xdf   : > { %7754 = vmatmul.mubr.msk.bf16.gmra.mrb[4].mxu0 %vm624_vm0, %v9412_v60  ;;  %7477 = vmatprep.mubr.msk.bf16.mxu1 %vm624_vm0, %v481_v61  ;;  %v9470_v61 = vpack.c.bf16 %v3232_v56, %v3231_v55  ;;  %v499_v55 = vpack.c.bf16 %v454_v50, %v453_v48  ;;  %v9510_v56 = vpack.c.bf16 %v3248_v52, %v3247_v51  ;;  %v467_v48 = vld [vmem:[#allocation2 + $0x1d0] sm:$0xff]  ;;  %v468_v50 = vld [vmem:[#allocation2 + $0x1d8] sm:$0xff] }
  0xe0   : > { %7757 = vmatprep.mubr.msk.bf16.mxu0 %vm624_vm0, %v9414_v62  ;;  %v3261_v51 = vld [vmem:[#allocation2 + $0x1f4] sm:$0xff]  ;;  %v3262_v52 = vld [vmem:[#allocation2 + $0x1fc] sm:$0xff] }
  0xe6   : > { %7478 = vmatmul.mubr.msk.bf16.gmra.mrb[8].mxu1 %vm624_vm0, %v482_v7  ;;  %v492_v7 = vpack.c.bf16 %v440_v43, %v439_v63  ;;  %v3249_v63 = vld [vmem:[#allocation2 + $0x194] sm:$0xff]  ;;  %v3250_v43 = vld [vmem:[#allocation2 + $0x19c] sm:$0xff] }
  0xe7   : > { %7758 = vmatmul.mubr.msk.bf16.gmra.mrb[8].mxu0 %vm624_vm0, %v9428_v8  ;;  %7481 = vmatprep.mubr.msk.bf16.mxu1 %vm624_vm0, %v483_v9  ;;  %v9478_v9 = vpack.c.bf16 %v3234_v2, %v3233_v0  ;;  %v457_v0 = vld [vmem:[#allocation2 + $0x180] sm:$0xff]  ;;  %v458_v2 = vld [vmem:[#allocation2 + $0x188] sm:$0xff]  ;;  %v9518_v6 = vpack.c.bf16 %v3250_v43, %v3249_v63  ;;  %v506_v63 = vpack.c.bf16 %v468_v50, %v467_v48 }
  0xe8   : > { %7761 = vmatprep.mubr.msk.bf16.mxu0 %vm624_vm0, %v9430_v10  ;;  %v9548_v43 = vpack.c.bf16 %v3262_v52, %v3261_v51  ;;  %v1450_v48 = vld [vmem:[#allocation2 + $0x2a] sm:$0xff]  ;;  %v1451_v52 = vld [vmem:[#allocation2 + $0x32] sm:$0xff] }
  0xee   : > { %7482 = vmatmul.mubr.msk.bf16.gmra.mrb[12].mxu1 %vm624_vm0, %v484_v19  ;;  %v3239_v19 = vld [vmem:[#allocation2 + $0x144] sm:$0xff] }
  0xef   : > { %7762 = vmatmul.mubr.msk.bf16.gmra.mrb[12].mxu0 %vm624_vm0, %v9438_v20  ;;  %7485 = vmatprep.mubr.msk.bf16.mxu1 %vm624_vm0, %v485_v21  ;;  %v3240_v21 = vld [vmem:[#allocation2 + $0x14c] sm:$0xff] }
  0xf0   : > { %7765 = vmatprep.mubr.msk.bf16.mxu0 %vm624_vm0, %v9440_v22  ;;  %v9490_v26 = vpack.c.bf16 %v3240_v21, %v3239_v19  ;;  %v3255_v19 = vld [vmem:[#allocation2 + $0x1c4] sm:$0xff]  ;;  %v3256_v21 = vld [vmem:[#allocation2 + $0x1cc] sm:$0xff] }
  0xf1   : > { %v9530_v28 = vpack.c.bf16 %v3256_v21, %v3255_v19 }
  0xf6   : > { %7486 = vmatmul.mubr.msk.bf16.gmra.mrb[16].mxu1 %vm624_vm0, %v486_v31  ;;  %v449_v31 = vld [vmem:[#allocation2 + $0x140] sm:$0xff] }
  0xf7   : > { %7766 = vmatmul.mubr.msk.bf16.gmra.mrb[16].mxu0 %vm624_vm0, %v9448_v32  ;;  %7489 = vmatprep.mubr.msk.bf16.mxu1 %vm624_vm0, %v487_v33  ;;  %v450_v33 = vld [vmem:[#allocation2 + $0x148] sm:$0xff] }
  0xf8   : > { %7769 = vmatprep.mubr.msk.bf16.mxu0 %vm624_vm0, %v9450_v34  ;;  %v497_v39 = vpack.c.bf16 %v450_v33, %v449_v31  ;;  %v3257_v31 = vld [vmem:[#allocation2 + $0x1d4] sm:$0xff]  ;;  %v3258_v33 = vld [vmem:[#allocation2 + $0x1dc] sm:$0xff] }
  0xf9   : > { %v9538_v42 = vpack.c.bf16 %v3258_v33, %v3257_v31  ;;  %v1445_v31 = vld [vmem:[#allocation2 + $0x2] sm:$0xff]  ;;  %v1446_v33 = vld [vmem:[#allocation2 + $0xa] sm:$0xff] }
  0xfe   : > { %7490 = vmatmul.mubr.msk.bf16.gmra.mrb[20].mxu1 %vm624_vm0, %v488_v44  ;;  %v3245_v44 = vld [vmem:[#allocation2 + $0x174] sm:$0xff] }
  0xff   : > { %7770 = vmatmul.mubr.msk.bf16.gmra.mrb[20].mxu0 %vm624_vm0, %v9458_v45  ;;  %7493 = vmatprep.mubr.msk.bf16.mxu1 %vm624_vm0, %v489_v46  ;;  %v3246_v46 = vld [vmem:[#allocation2 + $0x17c] sm:$0xff] }
 0x100   : > { %7773 = vmatprep.mubr.msk.bf16.mxu0 %vm624_vm0, %v9460_v47  ;;  %v9508_v54 = vpack.c.bf16 %v3246_v46, %v3245_v44  ;;  %v505_v44 = vpack.c.bf16 %v466_v36, %v465_v35  ;;  %v9568_v36 = vpack.c.bf16 %v3270_v30, %v3269_v29  ;;  %v1470_v29 = vld [vmem:[#allocation2 + $0xca] sm:$0xff] }
 0x106   : > { %7494 = vmatmul.mubr.msk.bf16.gmra.mrb[24].mxu1 %vm624_vm0, %v490_v57  ;;  %v455_v57 = vld [vmem:[#allocation2 + $0x170] sm:$0xff] }
 0x107   : > { %7774 = vmatmul.mubr.msk.bf16.gmra.mrb[24].mxu0 %vm624_vm0, %v9468_v58  ;;  %7497 = vmatprep.mubr.msk.bf16.mxu1 %vm624_vm0, %v491_v59  ;;  %v456_v59 = vld [vmem:[#allocation2 + $0x178] sm:$0xff] }
 0x108   : > { %7777 = vmatprep.mubr.msk.bf16.mxu0 %vm624_vm0, %v9470_v61  ;;  %v500_v5 = vpack.c.bf16 %v456_v59, %v455_v57  ;;  %v3263_v57 = vld [vmem:[#allocation2 + $0x204] sm:$0xff]  ;;  %v3264_v59 = vld [vmem:[#allocation2 + $0x20c] sm:$0xff] }
 0x10e   : > { %7498 = vmatmul.mubr.msk.bf16.gmra.mrb[28].mxu1 %vm624_vm0, %v492_v7  ;;  %v501_v7 = vpack.c.bf16 %v458_v2, %v457_v0  ;;  %v9550_v2 = vpack.c.bf16 %v3264_v59, %v3263_v57  ;;  %v1454_v57 = vld [vmem:[#allocation2 + $0x4a] sm:$0xff] }
 0x10f   : > { %7778 = vmatmul.mubr.msk.bf16.gmra.mrb[28].mxu0 %vm624_vm0, %v9478_v9  ;;  %7501 = vmatprep.mubr.msk.bf16.mxu1 %vm624_vm0, %v493_v11  ;;  %v9520_v11 = vpack.c.bf16 %v3252_v4, %v3251_v3  ;;  %v471_v3 = vld [vmem:[#allocation2 + $0x1f0] sm:$0xff]  ;;  %v472_v4 = vld [vmem:[#allocation2 + $0x1f8] sm:$0xff] }
 0x110   : > { %7781 = vmatprep.mubr.msk.bf16.mxu0 %vm624_vm0, %v9480_v12  ;;  %v508_v17 = vpack.c.bf16 %v472_v4, %v471_v3  ;;  %v1458_v3 = vld [vmem:[#allocation2 + $0x6a] sm:$0xff] }
 0x116   : > { %7502 = vmatmul.mubr.msk.bf16.gmra.mrb[32].mxu1 %vm624_vm0, %v494_v23  ;;  %v502_v23 = vpack.c.bf16 %v460_v14, %v459_v13  ;;  %v473_v13 = vld [vmem:[#allocation2 + $0x200] sm:$0xff]  ;;  %v474_v14 = vld [vmem:[#allocation2 + $0x208] sm:$0xff] }
 0x117   : > { %7782 = vmatmul.mubr.msk.bf16.gmra.mrb[32].mxu0 %vm624_vm0, %v9488_v24  ;;  %7505 = vmatprep.mubr.msk.bf16.mxu1 %vm624_vm0, %v495_v25  ;;  %v9528_v25 = vpack.c.bf16 %v3254_v16, %v3253_v15  ;;  %v3267_v15 = vld [vmem:[#allocation2 + $0x224] sm:$0xff]  ;;  %v3268_v16 = vld [vmem:[#allocation2 + $0x22c] sm:$0xff]  ;;  %v509_v19 = vpack.c.bf16 %v474_v14, %v473_v13 }
 0x118   : > { %7785 = vmatprep.mubr.msk.bf16.mxu0 %vm624_vm0, %v9490_v26  ;;  %v9560_v21 = vpack.c.bf16 %v3268_v16, %v3267_v15  ;;  %v1462_v13 = vld [vmem:[#allocation2 + $0x8a] sm:$0xff]  ;;  %v1464_v16 = vld [vmem:[#allocation2 + $0x9a] sm:$0xff] }
 0x11e   : > { %7506 = vmatmul.mubr.msk.bf16.gmra.mrb[36].mxu1 %vm624_vm0, %v496_v37  ;;  %v3259_v37 = vld [vmem:[#allocation2 + $0x1e4] sm:$0xff] }
 0x11f   : > { %7786 = vmatmul.mubr.msk.bf16.gmra.mrb[36].mxu0 %vm624_vm0, %v9498_v38  ;;  %7509 = vmatprep.mubr.msk.bf16.mxu1 %vm624_vm0, %v497_v39  ;;  %v3260_v39 = vld [vmem:[#allocation2 + $0x1ec] sm:$0xff] }
 0x120   : > { %7789 = vmatprep.mubr.msk.bf16.mxu0 %vm624_vm0, %v9500_v40  ;;  %v9540_v46 = vpack.c.bf16 %v3260_v39, %v3259_v37  ;;  %v1513_v37 = vpack.c.bf16 %v1446_v33, %v1445_v31  ;;  %v1447_v39 = vld [vmem:[#allocation2 + $0x12] sm:$0xff]  ;;  %v1472_v33 = vld [vmem:[#allocation2 + $0xda] sm:$0xff] }
 0x126   : > { %7510 = vmatmul.mubr.msk.bf16.gmra.mrb[40].mxu1 %vm624_vm0, %v498_v53  ;;  %v469_v53 = vld [vmem:[#allocation2 + $0x1e0] sm:$0xff] }
 0x127   : > { %7790 = vmatmul.mubr.msk.bf16.gmra.mrb[40].mxu0 %vm624_vm0, %v9508_v54  ;;  %7513 = vmatprep.mubr.msk.bf16.mxu1 %vm624_vm0, %v499_v55  ;;  %v470_v55 = vld [vmem:[#allocation2 + $0x1e8] sm:$0xff] }
 0x128   : > { %7793 = vmatprep.mubr.msk.bf16.mxu0 %vm624_vm0, %v9510_v56  ;;  %v507_v0 = vpack.c.bf16 %v470_v55, %v469_v53  ;;  %v1452_v53 = vld [vmem:[#allocation2 + $0x3a] sm:$0xff] }
 0x129   : > { %v8736_v55 = vld [vmem:[%s10840_s1 + $0x18] sm:$0xff]   ;;  %v9589_v59 = vpack.c.bf16 %v1452_v53, %v1451_v52  ;;  %v1482_v53 = vld [vmem:[#allocation2 + $0x12a] sm:$0xff] }
 0x12a   : > { %7607 = vmatprep.subr.bf16.mxu1 %v8736_v55  ;;  %v1480_v52 = vld [vmem:[#allocation2 + $0x11a] sm:$0xff] }
 0x12e   : > { %7514 = vmatmul.mubr.msk.bf16.gmra.mrb[44].mxu1 %vm624_vm0, %v500_v5  ;;  %v3265_v5 = vld [vmem:[#allocation2 + $0x214] sm:$0xff] }
 0x12f   : > { %7794 = vmatmul.mubr.msk.bf16.gmra.mrb[44].mxu0 %vm624_vm0, %v9518_v6  ;;  %7517 = vmatprep.mubr.msk.bf16.mxu1 %vm624_vm0, %v501_v7  ;;  %v3266_v7 = vld [vmem:[#allocation2 + $0x21c] sm:$0xff] }
 0x130   : > { %7797 = vmatprep.mubr.msk.bf16.mxu0 %vm624_vm0, %v9520_v11  ;;  %v9558_v18 = vpack.c.bf16 %v3266_v7, %v3265_v5  ;;  %v1459_v5 = vld [vmem:[#allocation2 + $0x72] sm:$0xff]  ;;  %v1460_v7 = vld [vmem:[#allocation2 + $0x7a] sm:$0xff] }
 0x131   : > { %v9619_v14 = vpack.c.bf16 %v1460_v7, %v1459_v5  ;;  %v1490_v5 = vld [vmem:[#allocation2 + $0x16a] sm:$0xff] }
 0x136   : > { %7518 = vmatmul.mubr.msk.bf16.gmra.mrb[48].mxu1 %vm624_vm0, %v502_v23  ;;  %v475_v23 = vld [vmem:[#allocation2 + $0x210] sm:$0xff] }
 0x137   : > { %7798 = vmatmul.mubr.msk.bf16.gmra.mrb[48].mxu0 %vm624_vm0, %v9528_v25  ;;  %7521 = vmatprep.mubr.msk.bf16.mxu1 %vm624_vm0, %v503_v27  ;;  %v476_v27 = vld [vmem:[#allocation2 + $0x218] sm:$0xff] }
 0x138   : > { %7801 = vmatprep.mubr.msk.bf16.mxu0 %vm624_vm0, %v9530_v28  ;;  %v510_v35 = vpack.c.bf16 %v476_v27, %v475_v23  ;;  %v1468_v27 = vld [vmem:[#allocation2 + $0xba] sm:$0xff] }
 0x13e   : > { %7522 = vmatmul.mubr.msk.bf16.gmra.mrb[52].mxu1 %vm624_vm0, %v504_v41  ;;  %v1448_v41 = vld [vmem:[#allocation2 + $0x1a] sm:$0xff] }
 0x13f   : > { %7802 = vmatmul.mubr.msk.bf16.gmra.mrb[52].mxu0 %vm624_vm0, %v9538_v42  ;;  %7525 = vmatprep.mubr.msk.bf16.mxu1 %vm624_vm0, %v505_v44  ;;  %v1449_v44 = vld [vmem:[#allocation2 + $0x22] sm:$0xff]  ;;  %v1514_v50 = vpack.c.bf16 %v1448_v41, %v1447_v39  ;;  %v1476_v41 = vld [vmem:[#allocation2 + $0xfa] sm:$0xff] }
 0x140   : > { %7805 = vmatprep.mubr.msk.bf16.mxu0 %vm624_vm0, %v9540_v46  ;;  %v9576_v51 = vpack.c.bf16 %v1450_v48, %v1449_v44  ;;  %v1478_v44 = vld [vmem:[#allocation2 + $0x10a] sm:$0xff] }
 0x146   : > { %7526 = vmatmul.mubr.msk.bf16.gmra.mrb[56].mxu1 %vm624_vm0, %v506_v63  ;;  %v1456_v63 = vld [vmem:[#allocation2 + $0x5a] sm:$0xff] }
 0x147   : > { %7806 = vmatmul.mubr.msk.bf16.gmra.mrb[56].mxu0 %vm624_vm0, %v9548_v43  ;;  %7529 = vmatprep.mubr.msk.bf16.mxu1 %vm624_vm0, %v507_v0  ;;  %v1457_v0 = vld [vmem:[#allocation2 + $0x62] sm:$0xff] }
 0x148   : > { %7809 = vmatprep.mubr.msk.bf16.mxu0 %vm624_vm0, %v9550_v2 }
 0x14e   : > { %7530 = vmatmul.mubr.msk.bf16.gmra.mrb[60].mxu1 %vm624_vm0, %v508_v17  ;;  %v1466_v17 = vld [vmem:[#allocation2 + $0xaa] sm:$0xff] }
 0x14f   : > { %7810 = vmatmul.mubr.msk.bf16.gmra.mrb[60].mxu0 %vm624_vm0, %v9558_v18  ;;  %7533 = vmatprep.mubr.msk.bf16.mxu1 %vm624_vm0, %v509_v19 }
 0x150   : > { %7813 = vmatprep.mubr.msk.bf16.mxu0 %vm624_vm0, %v9560_v21 }
 0x156   : > { %7534 = vmatmul.mubr.msk.bf16.gmra.mrb[64].mxu1 %vm624_vm0, %v510_v35  ;;  %v1474_v35 = vld [vmem:[#allocation2 + $0xea] sm:$0xff] }
 0x157   : > { %7814 = vmatmul.mubr.msk.bf16.gmra.mrb[64].mxu0 %vm624_vm0, %v9568_v36  ;;  %7539 = vmatprep.mubr.msk.bf16.mxu1 %vm624_vm0, %v1513_v37 }
 0x158   : > { %7819 = vmatprep.mubr.msk.bf16.mxu0 %vm624_vm0, %v9401_v49  ;;  %v1453_v49 = vld [vmem:[#allocation2 + $0x42] sm:$0xff] }
 0x15e   : > { %7540 = vmatmul.mubr.msk.bf16.vlgmr.msra.gmra.mrb[0].mxu1 %vm624_vm0, %v1514_v50 }
 0x15f   : > { %7820 = vmatmul.mubr.msk.bf16.vlgmr.msra.gmra.mrb[0].mxu0 %vm624_vm0, %v9412_v60  ;;  %7543 = vmatprep.mubr.msk.bf16.mxu1 %vm624_vm0, %v9576_v51  ;;  %v9591_v60 = vpack.c.bf16 %v1454_v57, %v1453_v49  ;;  %v1484_v57 = vld [vmem:[#allocation2 + $0x13a] sm:$0xff] }
 0x160   : > { %7888 = vmatpush3.bf16.msra.mxu0 %v9423_v1  ;;  %7823 = vmatprep.mubr.msk.bf16.mxu0 %vm624_vm0, %v9414_v62  ;;  %v1455_v1 = vld [vmem:[#allocation2 + $0x52] sm:$0xff]  ;;  %v9602_v62 = vld [vmem:[%s10840_s1 + $0x40] sm:$0xff]  }
 0x161   : > { %7608 = vmatpush3.bf16.msra.mxu1 %v8736_v55  ;;  %7957 = vmatprep.subr.bf16.mxu0 %v9602_v62  ;;  %v9607_v4 = vpack.c.bf16 %v1456_v63, %v1455_v1  ;;  %v1486_v1 = vld [vmem:[#allocation2 + $0x14a] sm:$0xff] }
 0x166   : > { %7544 = vmatmul.mubr.msk.bf16.gmra.mrb[4].mxu1 %vm624_vm0, %v9589_v59 }
 0x167   : > { %7824 = vmatmul.mubr.msk.bf16.gmra.mrb[4].mxu0 %vm624_vm0, %v9428_v8  ;;  %7547 = vmatprep.mubr.msk.bf16.mxu1 %vm624_vm0, %v9591_v60  ;;  %v9609_v8 = vpack.c.bf16 %v1458_v3, %v1457_v0  ;;  %v1488_v3 = vld [vmem:[#allocation2 + $0x15a] sm:$0xff] }
 0x168   : > { %7827 = vmatprep.mubr.msk.bf16.mxu0 %vm624_vm0, %v9430_v10  ;;  %v1461_v10 = vld [vmem:[#allocation2 + $0x82] sm:$0xff] }
 0x169   : > { %v9621_v15 = vpack.c.bf16 %v1462_v13, %v1461_v10  ;;  %v1492_v13 = vld [vmem:[#allocation2 + $0x17a] sm:$0xff] }
 0x16e   : > { %7548 = vmatmul.mubr.msk.bf16.gmra.mrb[8].mxu1 %vm624_vm0, %v9607_v4 }
 0x16f   : > { %7828 = vmatmul.mubr.msk.bf16.gmra.mrb[8].mxu0 %vm624_vm0, %v9438_v20  ;;  %7551 = vmatprep.mubr.msk.bf16.mxu1 %vm624_vm0, %v9609_v8  ;;  %v1463_v20 = vld [vmem:[#allocation2 + $0x92] sm:$0xff] }
 0x170   : > { %7831 = vmatprep.mubr.msk.bf16.mxu0 %vm624_vm0, %v9440_v22  ;;  %v1465_v22 = vld [vmem:[#allocation2 + $0xa2] sm:$0xff]  ;;  %v9631_v19 = vpack.c.bf16 %v1464_v16, %v1463_v20  ;;  %v1494_v20 = vld [vmem:[#allocation2 + $0x18a] sm:$0xff] }
 0x171   : > { %v9633_v23 = vpack.c.bf16 %v1466_v17, %v1465_v22  ;;  %v1496_v17 = vld [vmem:[#allocation2 + $0x19a] sm:$0xff] }
 0x176   : > { %7552 = vmatmul.mubr.msk.bf16.gmra.mrb[12].mxu1 %vm624_vm0, %v9619_v14 }
 0x177   : > { %7832 = vmatmul.mubr.msk.bf16.gmra.mrb[12].mxu0 %vm624_vm0, %v9448_v32  ;;  %7555 = vmatprep.mubr.msk.bf16.mxu1 %vm624_vm0, %v9621_v15  ;;  %v1467_v32 = vld [vmem:[#allocation2 + $0xb2] sm:$0xff] }
 0x178   : > { %7835 = vmatprep.mubr.msk.bf16.mxu0 %vm624_vm0, %v9450_v34  ;;  %v1469_v34 = vld [vmem:[#allocation2 + $0xc2] sm:$0xff]  ;;  %v9643_v30 = vpack.c.bf16 %v1468_v27, %v1467_v32  ;;  %v1498_v32 = vld [vmem:[#allocation2 + $0x1aa] sm:$0xff] }
 0x179   : > { %v9645_v31 = vpack.c.bf16 %v1470_v29, %v1469_v34  ;;  %v1500_v29 = vld [vmem:[#allocation2 + $0x1ba] sm:$0xff] }
 0x17e   : > { %7556 = vmatmul.mubr.msk.bf16.gmra.mrb[16].mxu1 %vm624_vm0, %v9631_v19 }
 0x17f   : > { %7836 = vmatmul.mubr.msk.bf16.gmra.mrb[16].mxu0 %vm624_vm0, %v9458_v45  ;;  %7559 = vmatprep.mubr.msk.bf16.mxu1 %vm624_vm0, %v9633_v23  ;;  %v1471_v45 = vld [vmem:[#allocation2 + $0xd2] sm:$0xff] }
 0x180   : > { %7839 = vmatprep.mubr.msk.bf16.mxu0 %vm624_vm0, %v9460_v47  ;;  %v1473_v47 = vld [vmem:[#allocation2 + $0xe2] sm:$0xff]  ;;  %v9655_v37 = vpack.c.bf16 %v1472_v33, %v1471_v45  ;;  %v1502_v45 = vld [vmem:[#allocation2 + $0x1ca] sm:$0xff] }
 0x181   : > { %v9657_v39 = vpack.c.bf16 %v1474_v35, %v1473_v47  ;;  %v1504_v35 = vld [vmem:[#allocation2 + $0x1da] sm:$0xff] }
 0x186   : > { %7560 = vmatmul.mubr.msk.bf16.gmra.mrb[20].mxu1 %vm624_vm0, %v9643_v30 }
 0x187   : > { %7840 = vmatmul.mubr.msk.bf16.gmra.mrb[20].mxu0 %vm624_vm0, %v9468_v58  ;;  %7563 = vmatprep.mubr.msk.bf16.mxu1 %vm624_vm0, %v9645_v31  ;;  %v1475_v58 = vld [vmem:[#allocation2 + $0xf2] sm:$0xff] }
 0x188   : > { %7843 = vmatprep.mubr.msk.bf16.mxu0 %vm624_vm0, %v9470_v61  ;;  %v1477_v61 = vld [vmem:[#allocation2 + $0x102] sm:$0xff]  ;;  %v9667_v48 = vpack.c.bf16 %v1476_v41, %v1475_v58  ;;  %v1506_v58 = vld [vmem:[#allocation2 + $0x1ea] sm:$0xff] }
 0x189   : > { %v9669_v50 = vpack.c.bf16 %v1478_v44, %v1477_v61  ;;  %v1508_v44 = vld [vmem:[#allocation2 + $0x1fa] sm:$0xff] }
 0x18e   : > { %7564 = vmatmul.mubr.msk.bf16.gmra.mrb[24].mxu1 %vm624_vm0, %v9655_v37 }
 0x18f   : > { %7844 = vmatmul.mubr.msk.bf16.gmra.mrb[24].mxu0 %vm624_vm0, %v9478_v9  ;;  %7567 = vmatprep.mubr.msk.bf16.mxu1 %vm624_vm0, %v9657_v39  ;;  %v1479_v9 = vld [vmem:[#allocation2 + $0x112] sm:$0xff] }
 0x190   : > { %7847 = vmatprep.mubr.msk.bf16.mxu0 %vm624_vm0, %v9480_v12  ;;  %v1481_v12 = vld [vmem:[#allocation2 + $0x122] sm:$0xff]  ;;  %v9679_v55 = vpack.c.bf16 %v1480_v52, %v1479_v9  ;;  %v1510_v9 = vld [vmem:[#allocation2 + $0x20a] sm:$0xff] }
 0x191   : > { %v9681_v49 = vpack.c.bf16 %v1482_v53, %v1481_v12  ;;  %v3853_v52 = vld [vmem:[#allocation2 + $0x244] sm:$0xff]  ;;  %v3854_v12 = vld [vmem:[#allocation2 + $0x24c] sm:$0xff] }
 0x196   : > { %7568 = vmatmul.mubr.msk.bf16.gmra.mrb[28].mxu1 %vm624_vm0, %v9667_v48 }
 0x197   : > { %7848 = vmatmul.mubr.msk.bf16.gmra.mrb[28].mxu0 %vm624_vm0, %v9488_v24  ;;  %7571 = vmatprep.mubr.msk.bf16.mxu1 %vm624_vm0, %v9669_v50  ;;  %v1483_v24 = vld [vmem:[#allocation2 + $0x132] sm:$0xff] }
 0x198   : > { %7851 = vmatprep.mubr.msk.bf16.mxu0 %vm624_vm0, %v9490_v26  ;;  %v1485_v26 = vld [vmem:[#allocation2 + $0x142] sm:$0xff]  ;;  %v9691_v63 = vpack.c.bf16 %v1484_v57, %v1483_v24  ;;  %v3889_v57 = vpack.c.bf16 %v3854_v12, %v3853_v52 }
 0x199   : > { %v9693_v0 = vpack.c.bf16 %v1486_v1, %v1485_v26  ;;  %v3855_v26 = vld [vmem:[#allocation2 + $0x254] sm:$0xff]  ;;  %v3856_v1 = vld [vmem:[#allocation2 + $0x25c] sm:$0xff] }
 0x19e   : > { %7572 = vmatmul.mubr.msk.bf16.gmra.mrb[32].mxu1 %vm624_vm0, %v9679_v55 }
 0x19f   : > { %7852 = vmatmul.mubr.msk.bf16.gmra.mrb[32].mxu0 %vm624_vm0, %v9498_v38  ;;  %7575 = vmatprep.mubr.msk.bf16.mxu1 %vm624_vm0, %v9681_v49  ;;  %v1487_v38 = vld [vmem:[#allocation2 + $0x152] sm:$0xff] }
 0x1a0   : > { %7855 = vmatprep.mubr.msk.bf16.mxu0 %vm624_vm0, %v9500_v40  ;;  %v1489_v40 = vld [vmem:[#allocation2 + $0x162] sm:$0xff]  ;;  %v9703_v7 = vpack.c.bf16 %v1488_v3, %v1487_v38  ;;  %v4376_v3 = vld [vmem:[#allocation2 + $0x4d] sm:$0xff] }
 0x1a1   : > { %v9705_v10 = vpack.c.bf16 %v1490_v5, %v1489_v40  ;;  %v4375_v38 = vld [vmem:[#allocation2 + $0x45] sm:$0xff]  ;;  %v3890_v5 = vpack.c.bf16 %v3856_v1, %v3855_v26 }
 0x1a2   : > { %v4403_v1 = vld [vmem:[#allocation2 + $0x125] sm:$0xff] }
 0x1a6   : > { %7576 = vmatmul.mubr.msk.bf16.gmra.mrb[36].mxu1 %vm624_vm0, %v9691_v63 }
 0x1a7   : > { %7856 = vmatmul.mubr.msk.bf16.gmra.mrb[36].mxu0 %vm624_vm0, %v9508_v54  ;;  %7579 = vmatprep.mubr.msk.bf16.mxu1 %vm624_vm0, %v9693_v0  ;;  %v1491_v54 = vld [vmem:[#allocation2 + $0x172] sm:$0xff] }
 0x1a8   : > { %7859 = vmatprep.mubr.msk.bf16.mxu0 %vm624_vm0, %v9510_v56  ;;  %v1493_v56 = vld [vmem:[#allocation2 + $0x182] sm:$0xff]  ;;  %v9715_v16 = vpack.c.bf16 %v1492_v13, %v1491_v54  ;;  %v4443_v54 = vpack.c.bf16 %v4376_v3, %v4375_v38  ;;  %v4404_v38 = vld [vmem:[#allocation2 + $0x12d] sm:$0xff] }
 0x1a9   : > { %v9717_v22 = vpack.c.bf16 %v1494_v20, %v1493_v56  ;;  %v4378_v13 = vld [vmem:[#allocation2 + $0x5d] sm:$0xff]  ;;  %v4379_v56 = vld [vmem:[#allocation2 + $0x65] sm:$0xff]  ;;  %v4380_v20 = vld [vmem:[#allocation2 + $0x6d] sm:$0xff] }
 0x1ae   : > { %7580 = vmatmul.mubr.msk.bf16.gmra.mrb[40].mxu1 %vm624_vm0, %v9703_v7 }
 0x1af   : > { %7860 = vmatmul.mubr.msk.bf16.gmra.mrb[40].mxu0 %vm624_vm0, %v9518_v6  ;;  %7583 = vmatprep.mubr.msk.bf16.mxu1 %vm624_vm0, %v9705_v10  ;;  %v1495_v6 = vld [vmem:[#allocation2 + $0x192] sm:$0xff] }
 0x1b0   : > { %7863 = vmatprep.mubr.msk.bf16.mxu0 %vm624_vm0, %v9520_v11  ;;  %v1497_v11 = vld [vmem:[#allocation2 + $0x1a2] sm:$0xff]  ;;  %v9727_v27 = vpack.c.bf16 %v1496_v17, %v1495_v6  ;;  %v4445_v17 = vpack.c.bf16 %v4380_v20, %v4379_v56 }
 0x1b1   : > { %v9729_v34 = vpack.c.bf16 %v1498_v32, %v1497_v11  ;;  %v4382_v11 = vld [vmem:[#allocation2 + $0x7d] sm:$0xff]  ;;  %v4383_v32 = vld [vmem:[#allocation2 + $0x85] sm:$0xff] }
 0x1b2   : > { %v4411_v20 = vld [vmem:[#allocation2 + $0x165] sm:$0xff] }
 0x1b6   : > { %7584 = vmatmul.mubr.msk.bf16.gmra.mrb[44].mxu1 %vm624_vm0, %v9715_v16 }
 0x1b7   : > { %7864 = vmatmul.mubr.msk.bf16.gmra.mrb[44].mxu0 %vm624_vm0, %v9528_v25  ;;  %7587 = vmatprep.mubr.msk.bf16.mxu1 %vm624_vm0, %v9717_v22  ;;  %v1499_v25 = vld [vmem:[#allocation2 + $0x1b2] sm:$0xff] }
 0x1b8   : > { %7867 = vmatprep.mubr.msk.bf16.mxu0 %vm624_vm0, %v9530_v28  ;;  %v1501_v28 = vld [vmem:[#allocation2 + $0x1c2] sm:$0xff]  ;;  %v9739_v33 = vpack.c.bf16 %v1500_v29, %v1499_v25  ;;  %v4384_v25 = vld [vmem:[#allocation2 + $0x8d] sm:$0xff] }
 0x1b9   : > { %v9741_v47 = vpack.c.bf16 %v1502_v45, %v1501_v28  ;;  %v4447_v28 = vpack.c.bf16 %v4384_v25, %v4383_v32  ;;  %v4388_v45 = vld [vmem:[#allocation2 + $0xad] sm:$0xff] }
 0x1ba   : > { %v4416_v32 = vld [vmem:[#allocation2 + $0x18d] sm:$0xff] }
 0x1be   : > { %7588 = vmatmul.mubr.msk.bf16.gmra.mrb[48].mxu1 %vm624_vm0, %v9727_v27 }
 0x1bf   : > { %7868 = vmatmul.mubr.msk.bf16.gmra.mrb[48].mxu0 %vm624_vm0, %v9538_v42  ;;  %7591 = vmatprep.mubr.msk.bf16.mxu1 %vm624_vm0, %v9729_v34  ;;  %v1503_v42 = vld [vmem:[#allocation2 + $0x1d2] sm:$0xff] }
 0x1c0   : > { %7871 = vmatprep.mubr.msk.bf16.mxu0 %vm624_vm0, %v9540_v46  ;;  %v1505_v46 = vld [vmem:[#allocation2 + $0x1e2] sm:$0xff]  ;;  %v9751_v41 = vpack.c.bf16 %v1504_v35, %v1503_v42 }
 0x1c1   : > { %v9753_v61 = vpack.c.bf16 %v1506_v58, %v1505_v46  ;;  %v4391_v46 = vld [vmem:[#allocation2 + $0xc5] sm:$0xff]  ;;  %v4392_v58 = vld [vmem:[#allocation2 + $0xcd] sm:$0xff] }
 0x1c6   : > { %7592 = vmatmul.mubr.msk.bf16.gmra.mrb[52].mxu1 %vm624_vm0, %v9739_v33 }
 0x1c7   : > { %7872 = vmatmul.mubr.msk.bf16.gmra.mrb[52].mxu0 %vm624_vm0, %v9548_v43  ;;  %7595 = vmatprep.mubr.msk.bf16.mxu1 %vm624_vm0, %v9741_v47  ;;  %v1507_v43 = vld [vmem:[#allocation2 + $0x1f2] sm:$0xff] }
 0x1c8   : > { %7875 = vmatprep.mubr.msk.bf16.mxu0 %vm624_vm0, %v9550_v2  ;;  %v1509_v2 = vld [vmem:[#allocation2 + $0x202] sm:$0xff]  ;;  %v9763_v53 = vpack.c.bf16 %v1508_v44, %v1507_v43  ;;  %v4451_v44 = vpack.c.bf16 %v4392_v58, %v4391_v46  ;;  %v4428_v46 = vld [vmem:[#allocation2 + $0x1ed] sm:$0xff] }
 0x1c9   : > { %v9765_v24 = vpack.c.bf16 %v1510_v9, %v1509_v2  ;;  %v4395_v2 = vld [vmem:[#allocation2 + $0xe5] sm:$0xff]  ;;  %v4396_v9 = vld [vmem:[#allocation2 + $0xed] sm:$0xff] }
 0x1ca   : > { %v4453_v12 = vpack.c.bf16 %v4396_v9, %v4395_v2 }
 0x1ce   : > { %7596 = vmatmul.mubr.msk.bf16.gmra.mrb[56].mxu1 %vm624_vm0, %v9751_v41 }
 0x1cf   : > { %7876 = vmatmul.mubr.msk.bf16.gmra.mrb[56].mxu0 %vm624_vm0, %v9558_v18  ;;  %7599 = vmatprep.mubr.msk.bf16.mxu1 %vm624_vm0, %v9753_v61  ;;  %v1511_v18 = vld [vmem:[#allocation2 + $0x212] sm:$0xff] }
 0x1d0   : > { %7879 = vmatprep.mubr.msk.bf16.mxu0 %vm624_vm0, %v9560_v21  ;;  %v1512_v21 = vld [vmem:[#allocation2 + $0x21a] sm:$0xff] }
 0x1d1   : > { %v9774_v40 = vpack.c.bf16 %v1512_v21, %v1511_v18  ;;  %v4400_v18 = vld [vmem:[#allocation2 + $0x10d] sm:$0xff] }
 0x1d6   : > { %7600 = vmatmul.mubr.msk.bf16.gmra.mrb[60].mxu1 %vm624_vm0, %v9763_v53 }
 0x1d7   : > { %7880 = vmatmul.mubr.msk.bf16.gmra.mrb[60].mxu0 %vm624_vm0, %v9568_v36  ;;  %7603 = vmatprep.mubr.msk.bf16.mxu1 %vm624_vm0, %v9765_v24  ;;  %v4377_v36 = vld [vmem:[#allocation2 + $0x55] sm:$0xff] }
 0x1d8   : > { %7883 = vmatprep.mubr.msk.bf16.mxu0 %vm624_vm0, %v3889_v57  ;;  %v4444_v6 = vpack.c.bf16 %v4378_v13, %v4377_v36  ;;  %v4399_v57 = vld [vmem:[#allocation2 + $0x105] sm:$0xff]  ;;  %v4408_v36 = vld [vmem:[#allocation2 + $0x14d] sm:$0xff] }
 0x1d9   : > { %v4455_v26 = vpack.c.bf16 %v4400_v18, %v4399_v57  ;;  %v4438_v57 = vld [vmem:[#allocation2 + $0x23d] sm:$0xff] }
 0x1da   : > { %v2095_v18 = vld [vmem:[#allocation2 + $0x222] sm:$0xff] }
 0x1de   : > { %7604 = vmatmul.mubr.msk.bf16.gmra.mrb[64].mxu1 %vm624_vm0, %v9774_v40 }
 0x1df   : > { %7884 = vmatmul.mubr.msk.bf16.gmra.mrb[64].mxu0 %vm624_vm0, %v3890_v5  ;;  %7609 = vmatprep.mubr.msk.bf16.mxu1 %vm624_vm0, %v9576_v51  ;;  %v4381_v51 = vld [vmem:[#allocation2 + $0x75] sm:$0xff]  ;;  %v4457_v5 = vpack.c.bf16 %v4404_v38, %v4403_v1 }
 0x1e0   : > { %7889 = vmatprep.mubr.msk.bf16.mxu0 %vm624_vm0, %v4443_v54  ;;  %v4446_v29 = vpack.c.bf16 %v4382_v11, %v4381_v51  ;;  %v4407_v54 = vld [vmem:[#allocation2 + $0x145] sm:$0xff]  ;;  %v2098_v38 = vld [vmem:[#allocation2 + $0x23a] sm:$0xff] }
 0x1e1   : > { %v4459_v56 = vpack.c.bf16 %v4408_v36, %v4407_v54  ;;  %v4415_v11 = vld [vmem:[#allocation2 + $0x185] sm:$0xff] }
 0x1e6   : > { %7610 = vmatmul.mubr.msk.bf16.vlgmr.msra.gmra.mrb[0].mxu1 %vm624_vm0, %v9589_v59  ;;  %v4385_v59 = vld [vmem:[#allocation2 + $0x95] sm:$0xff] }
 0x1e7   : > { %7890 = vmatmul.mubr.msk.bf16.vlgmr.msra.gmra.mrb[0].mxu0 %vm624_vm0, %v4444_v6  ;;  %7613 = vmatprep.mubr.msk.bf16.mxu1 %vm624_vm0, %v9591_v60  ;;  %v4386_v60 = vld [vmem:[#allocation2 + $0x9d] sm:$0xff]  ;;  %v4412_v6 = vld [vmem:[#allocation2 + $0x16d] sm:$0xff] }
 0x1e8   : > { %7958 = vmatpush3.bf16.msra.mxu0 %v9602_v62  ;;  %7893 = vmatprep.mubr.msk.bf16.mxu0 %vm624_vm0, %v4445_v17  ;;  %v4387_v62 = vld [vmem:[#allocation2 + $0xa5] sm:$0xff]  ;;  %v4448_v42 = vpack.c.bf16 %v4386_v60, %v4385_v59  ;;  %v4461_v51 = vpack.c.bf16 %v4412_v6, %v4411_v20  ;;  %v4420_v59 = vld [vmem:[#allocation2 + $0x1ad] sm:$0xff] }
 0x1e9   : > { %v4449_v35 = vpack.c.bf16 %v4388_v45, %v4387_v62  ;;  %v4423_v45 = vld [vmem:[#allocation2 + $0x1c5] sm:$0xff]  ;;  %v4966_v20 = vld [vmem:[#allocation2 + $0x6e] sm:$0xff] }
 0x1ee   : > { %7614 = vmatmul.mubr.msk.bf16.gmra.mrb[4].mxu1 %vm624_vm0, %v9607_v4  ;;  %v4389_v4 = vld [vmem:[#allocation2 + $0xb5] sm:$0xff] }
 0x1ef   : > { %7894 = vmatmul.mubr.msk.bf16.gmra.mrb[4].mxu0 %vm624_vm0, %v4446_v29  ;;  %7617 = vmatprep.mubr.msk.bf16.mxu1 %vm624_vm0, %v9609_v8  ;;  %v4390_v8 = vld [vmem:[#allocation2 + $0xbd] sm:$0xff]  ;;  %v4463_v29 = vpack.c.bf16 %v4416_v32, %v4415_v11  ;;  %v4970_v11 = vld [vmem:[#allocation2 + $0x8e] sm:$0xff] }
 0x1f0   : > { %7897 = vmatprep.mubr.msk.bf16.mxu0 %vm624_vm0, %v4447_v28  ;;  %v4450_v43 = vpack.c.bf16 %v4390_v8, %v4389_v4  ;;  %v4419_v28 = vld [vmem:[#allocation2 + $0x1a5] sm:$0xff] }
 0x1f1   : > { %v4465_v62 = vpack.c.bf16 %v4420_v59, %v4419_v28  ;;  %v4427_v8 = vld [vmem:[#allocation2 + $0x1e5] sm:$0xff]  ;;  %v4974_v28 = vld [vmem:[#allocation2 + $0xae] sm:$0xff]  ;;  %v8741_v59 = vld [vmem:[%s10842_s3 + $0x18] sm:$0xff]  }
 0x1f6   : > { %7618 = vmatmul.mubr.msk.bf16.gmra.mrb[8].mxu1 %vm624_vm0, %v9619_v14  ;;  %v4393_v14 = vld [vmem:[#allocation2 + $0xd5] sm:$0xff] }
 0x1f7   : > { %7898 = vmatmul.mubr.msk.bf16.gmra.mrb[8].mxu0 %vm624_vm0, %v4448_v42  ;;  %7621 = vmatprep.mubr.msk.bf16.mxu1 %vm624_vm0, %v9621_v15  ;;  %v4394_v15 = vld [vmem:[#allocation2 + $0xdd] sm:$0xff]  ;;  %v4424_v42 = vld [vmem:[#allocation2 + $0x1cd] sm:$0xff] }
 0x1f8   : > { %7901 = vmatprep.mubr.msk.bf16.mxu0 %vm624_vm0, %v4449_v35  ;;  %v4452_v52 = vpack.c.bf16 %v4394_v15, %v4393_v14  ;;  %v4467_v4 = vpack.c.bf16 %v4424_v42, %v4423_v45  ;;  %v4431_v14 = vld [vmem:[#allocation2 + $0x205] sm:$0xff]  ;;  %v4432_v15 = vld [vmem:[#allocation2 + $0x20d] sm:$0xff] }
 0x1f9   : > { %v4471_v9 = vpack.c.bf16 %v4432_v15, %v4431_v14  ;;  %v4977_v45 = vld [vmem:[#allocation2 + $0xc6] sm:$0xff]  ;;  %v4978_v42 = vld [vmem:[#allocation2 + $0xce] sm:$0xff] }
 0x1fa   : > { %v4985_v14 = vld [vmem:[#allocation2 + $0x106] sm:$0xff]  ;;  %v4986_v15 = vld [vmem:[#allocation2 + $0x10e] sm:$0xff] }
 0x1fe   : > { %7622 = vmatmul.mubr.msk.bf16.gmra.mrb[12].mxu1 %vm624_vm0, %v9631_v19  ;;  %v4397_v19 = vld [vmem:[#allocation2 + $0xf5] sm:$0xff] }
 0x1ff   : > { %7902 = vmatmul.mubr.msk.bf16.gmra.mrb[12].mxu0 %vm624_vm0, %v4450_v43  ;;  %7625 = vmatprep.mubr.msk.bf16.mxu1 %vm624_vm0, %v9633_v23  ;;  %v4398_v23 = vld [vmem:[#allocation2 + $0xfd] sm:$0xff]  ;;  %v4469_v43 = vpack.c.bf16 %v4428_v46, %v4427_v8  ;;  %v4981_v8 = vld [vmem:[#allocation2 + $0xe6] sm:$0xff]  ;;  %v4982_v46 = vld [vmem:[#allocation2 + $0xee] sm:$0xff] }
 0x200   : > { %7905 = vmatprep.mubr.msk.bf16.mxu0 %vm624_vm0, %v4451_v44  ;;  %v4454_v21 = vpack.c.bf16 %v4398_v23, %v4397_v19  ;;  %v4430_v44 = vld [vmem:[#allocation2 + $0x1fd] sm:$0xff] }
 0x206   : > { %7626 = vmatmul.mubr.msk.bf16.gmra.mrb[16].mxu1 %vm624_vm0, %v9643_v30  ;;  %v4401_v30 = vld [vmem:[#allocation2 + $0x115] sm:$0xff] }
 0x207   : > { %7906 = vmatmul.mubr.msk.bf16.gmra.mrb[16].mxu0 %vm624_vm0, %v4452_v52  ;;  %7629 = vmatprep.mubr.msk.bf16.mxu1 %vm624_vm0, %v9645_v31  ;;  %v4402_v31 = vld [vmem:[#allocation2 + $0x11d] sm:$0xff]  ;;  %v4435_v52 = vld [vmem:[#allocation2 + $0x225] sm:$0xff] }
 0x208   : > { %7909 = vmatprep.mubr.msk.bf16.mxu0 %vm624_vm0, %v4453_v12  ;;  %v4456_v3 = vpack.c.bf16 %v4402_v31, %v4401_v30  ;;  %v4436_v12 = vld [vmem:[#allocation2 + $0x22d] sm:$0xff] }
 0x209   : > { %v4473_v23 = vpack.c.bf16 %v4436_v12, %v4435_v52  ;;  %v4440_v30 = vld [vmem:[#allocation2 + $0x24d] sm:$0xff] }
 0x20a   : > { %v4989_v52 = vld [vmem:[#allocation2 + $0x126] sm:$0xff]  ;;  %v4990_v12 = vld [vmem:[#allocation2 + $0x12e] sm:$0xff] }
 0x20e   : > { %7630 = vmatmul.mubr.msk.bf16.gmra.mrb[20].mxu1 %vm624_vm0, %v9655_v37  ;;  %v4405_v37 = vld [vmem:[#allocation2 + $0x135] sm:$0xff] }
 0x20f   : > { %7910 = vmatmul.mubr.msk.bf16.gmra.mrb[20].mxu0 %vm624_vm0, %v4454_v21  ;;  %7633 = vmatprep.mubr.msk.bf16.mxu1 %vm624_vm0, %v9657_v39  ;;  %v4406_v39 = vld [vmem:[#allocation2 + $0x13d] sm:$0xff]  ;;  %v2096_v21 = vld [vmem:[#allocation2 + $0x22a] sm:$0xff] }
 0x210   : > { %7913 = vmatprep.mubr.msk.bf16.mxu0 %vm624_vm0, %v4455_v26  ;;  %v4458_v13 = vpack.c.bf16 %v4406_v39, %v4405_v37  ;;  %v4439_v26 = vld [vmem:[#allocation2 + $0x245] sm:$0xff]  ;;  %v2131_v31 = vpack.c.bf16 %v2096_v21, %v2095_v18  ;;  %v4962_v39 = vld [vmem:[#allocation2 + $0x4e] sm:$0xff] }
 0x211   : > { %v4475_v1 = vpack.c.bf16 %v4440_v30, %v4439_v26  ;;  %v4961_v37 = vld [vmem:[#allocation2 + $0x46] sm:$0xff]  ;;  %v4994_v21 = vld [vmem:[#allocation2 + $0x14e] sm:$0xff] }
 0x212   : > { %v4993_v18 = vld [vmem:[#allocation2 + $0x146] sm:$0xff] }
 0x213   : > { %v5045_v30 = vpack.c.bf16 %v4994_v21, %v4993_v18 }
 0x216   : > { %7634 = vmatmul.mubr.msk.bf16.gmra.mrb[24].mxu1 %vm624_vm0, %v9667_v48  ;;  %v4409_v48 = vld [vmem:[#allocation2 + $0x155] sm:$0xff] }
 0x217   : > { %7914 = vmatmul.mubr.msk.bf16.gmra.mrb[24].mxu0 %vm624_vm0, %v4456_v3  ;;  %7637 = vmatprep.mubr.msk.bf16.mxu1 %vm624_vm0, %v9669_v50  ;;  %v4410_v50 = vld [vmem:[#allocation2 + $0x15d] sm:$0xff]  ;;  %v4441_v3 = vld [vmem:[#allocation2 + $0x255] sm:$0xff] }
 0x218   : > { %7917 = vmatprep.mubr.msk.bf16.mxu0 %vm624_vm0, %v4457_v5  ;;  %v4460_v17 = vpack.c.bf16 %v4410_v50, %v4409_v48  ;;  %v4442_v5 = vld [vmem:[#allocation2 + $0x25d] sm:$0xff]  ;;  %v4965_v50 = vld [vmem:[#allocation2 + $0x66] sm:$0xff] }
 0x219   : > { %v4476_v36 = vpack.c.bf16 %v4442_v5, %v4441_v3  ;;  %v4964_v48 = vld [vmem:[#allocation2 + $0x5e] sm:$0xff]  ;;  %v8744_v5 = vld [vmem:[%s10842_s3 + $0x30] sm:$0xff]  }
 0x21e   : > { %7638 = vmatmul.mubr.msk.bf16.gmra.mrb[28].mxu1 %vm624_vm0, %v9679_v55  ;;  %v4413_v55 = vld [vmem:[#allocation2 + $0x175] sm:$0xff] }
 0x21f   : > { %7918 = vmatmul.mubr.msk.bf16.gmra.mrb[28].mxu0 %vm624_vm0, %v4458_v13  ;;  %7641 = vmatprep.mubr.msk.bf16.mxu1 %vm624_vm0, %v9681_v49  ;;  %v4414_v49 = vld [vmem:[#allocation2 + $0x17d] sm:$0xff]  ;;  %v5029_v13 = vpack.c.bf16 %v4962_v39, %v4961_v37 }
 0x220   : > { %7921 = vmatprep.mubr.msk.bf16.mxu0 %vm624_vm0, %v4459_v56  ;;  %v4462_v25 = vpack.c.bf16 %v4414_v49, %v4413_v55  ;;  %v4963_v56 = vld [vmem:[#allocation2 + $0x56] sm:$0xff]  ;;  %v4968_v55 = vld [vmem:[#allocation2 + $0x7e] sm:$0xff]  ;;  %v4969_v49 = vld [vmem:[#allocation2 + $0x86] sm:$0xff] }
 0x221   : > { %v5030_v6 = vpack.c.bf16 %v4964_v48, %v4963_v56  ;;  %v4999_v37 = vld [vmem:[#allocation2 + $0x176] sm:$0xff]  ;;  %v5000_v39 = vld [vmem:[#allocation2 + $0x17e] sm:$0xff] }
 0x222   : > { %v5003_v56 = vld [vmem:[#allocation2 + $0x196] sm:$0xff]  ;;  %v5004_v48 = vld [vmem:[#allocation2 + $0x19e] sm:$0xff] }
 0x226   : > { %7642 = vmatmul.mubr.msk.bf16.gmra.mrb[32].mxu1 %vm624_vm0, %v9691_v63  ;;  %v4417_v63 = vld [vmem:[#allocation2 + $0x195] sm:$0xff] }
 0x227   : > { %7922 = vmatmul.mubr.msk.bf16.gmra.mrb[32].mxu0 %vm624_vm0, %v4460_v17  ;;  %7645 = vmatprep.mubr.msk.bf16.mxu1 %vm624_vm0, %v9693_v0  ;;  %v4418_v0 = vld [vmem:[#allocation2 + $0x19d] sm:$0xff]  ;;  %v5031_v17 = vpack.c.bf16 %v4966_v20, %v4965_v50  ;;  %v5005_v20 = vld [vmem:[#allocation2 + $0x1a6] sm:$0xff] }
 0x228   : > { %7925 = vmatprep.mubr.msk.bf16.mxu0 %vm624_vm0, %v4461_v51  ;;  %v4464_v60 = vpack.c.bf16 %v4418_v0, %v4417_v63  ;;  %v4967_v51 = vld [vmem:[#allocation2 + $0x76] sm:$0xff]  ;;  %v4972_v63 = vld [vmem:[#allocation2 + $0x9e] sm:$0xff]  ;;  %v4973_v0 = vld [vmem:[#allocation2 + $0xa6] sm:$0xff] }
 0x229   : > { %v5032_v32 = vpack.c.bf16 %v4968_v55, %v4967_v51  ;;  %v5050_v55 = vpack.c.bf16 %v5004_v48, %v5003_v56 }
 0x22e   : > { %7646 = vmatmul.mubr.msk.bf16.gmra.mrb[36].mxu1 %vm624_vm0, %v9703_v7  ;;  %v4421_v7 = vld [vmem:[#allocation2 + $0x1b5] sm:$0xff] }
 0x22f   : > { %7926 = vmatmul.mubr.msk.bf16.gmra.mrb[36].mxu0 %vm624_vm0, %v4462_v25  ;;  %7649 = vmatprep.mubr.msk.bf16.mxu1 %vm624_vm0, %v9705_v10  ;;  %v4422_v10 = vld [vmem:[#allocation2 + $0x1bd] sm:$0xff]  ;;  %v5033_v25 = vpack.c.bf16 %v4970_v11, %v4969_v49 }
 0x230   : > { %7929 = vmatprep.mubr.msk.bf16.mxu0 %vm624_vm0, %v4463_v29  ;;  %v4466_v35 = vpack.c.bf16 %v4422_v10, %v4421_v7  ;;  %v4971_v29 = vld [vmem:[#allocation2 + $0x96] sm:$0xff]  ;;  %v4976_v10 = vld [vmem:[#allocation2 + $0xbe] sm:$0xff] }
 0x231   : > { %v4975_v7 = vld [vmem:[#allocation2 + $0xb6] sm:$0xff] }
 0x236   : > { %7650 = vmatmul.mubr.msk.bf16.gmra.mrb[40].mxu1 %vm624_vm0, %v9715_v16  ;;  %v4425_v16 = vld [vmem:[#allocation2 + $0x1d5] sm:$0xff] }
 0x237   : > { %7930 = vmatmul.mubr.msk.bf16.gmra.mrb[40].mxu0 %vm624_vm0, %v4464_v60  ;;  %7653 = vmatprep.mubr.msk.bf16.mxu1 %vm624_vm0, %v9717_v22  ;;  %v4426_v22 = vld [vmem:[#allocation2 + $0x1dd] sm:$0xff]  ;;  %v5034_v60 = vpack.c.bf16 %v4972_v63, %v4971_v29 }
 0x238   : > { %7933 = vmatprep.mubr.msk.bf16.mxu0 %vm624_vm0, %v4465_v62  ;;  %v4468_v58 = vpack.c.bf16 %v4426_v22, %v4425_v16  ;;  %v5035_v62 = vpack.c.bf16 %v4974_v28, %v4973_v0  ;;  %v4979_v16 = vld [vmem:[#allocation2 + $0xd6] sm:$0xff]  ;;  %v4980_v22 = vld [vmem:[#allocation2 + $0xde] sm:$0xff]  ;;  %v5009_v0 = vld [vmem:[#allocation2 + $0x1c6] sm:$0xff] }
 0x239   : > { %v5008_v29 = vld [vmem:[#allocation2 + $0x1be] sm:$0xff]  ;;  %v5010_v28 = vld [vmem:[#allocation2 + $0x1ce] sm:$0xff] }
 0x23e   : > { %7654 = vmatmul.mubr.msk.bf16.gmra.mrb[44].mxu1 %vm624_vm0, %v9727_v27  ;;  %v8738_v27 = vld [vmem:[%s10842_s3] sm:$0xff]  }
 0x23f   : > { %7934 = vmatmul.mubr.msk.bf16.gmra.mrb[44].mxu0 %vm624_vm0, %v4466_v35  ;;  %7657 = vmatprep.mubr.msk.bf16.mxu1 %vm624_vm0, %v9729_v34  ;;  %v4429_v34 = vld [vmem:[#allocation2 + $0x1f5] sm:$0xff]  ;;  %v5036_v35 = vpack.c.bf16 %v4976_v10, %v4975_v7  ;;  %v5053_v10 = vpack.c.bf16 %v5010_v28, %v5009_v0 }
 0x240   : > { %7937 = vmatprep.mubr.msk.bf16.mxu0 %vm624_vm0, %v4467_v4  ;;  %8027 = vmatprep.subr.bf16.mxu1 %v8738_v27  ;;  %v4470_v2 = vpack.c.bf16 %v4430_v44, %v4429_v34  ;;  %v5037_v4 = vpack.c.bf16 %v4978_v42, %v4977_v45  ;;  %v4983_v34 = vld [vmem:[#allocation2 + $0xf6] sm:$0xff]  ;;  %v4984_v44 = vld [vmem:[#allocation2 + $0xfe] sm:$0xff] }
 0x241   : > { %8028 = vmatpush3.bf16.msra.mxu1 %v8738_v27  ;;  %v5039_v27 = vpack.c.bf16 %v4982_v46, %v4981_v8  ;;  %v5011_v45 = vld [vmem:[#allocation2 + $0x1d6] sm:$0xff]  ;;  %v5012_v42 = vld [vmem:[#allocation2 + $0x1de] sm:$0xff] }
 0x242   : > { %v5054_v46 = vpack.c.bf16 %v5012_v42, %v5011_v45 }
 0x246   : > { %7658 = vmatmul.mubr.msk.bf16.gmra.mrb[48].mxu1 %vm624_vm0, %v9739_v33  ;;  %v4433_v33 = vld [vmem:[#allocation2 + $0x215] sm:$0xff] }
 0x247   : > { %7938 = vmatmul.mubr.msk.bf16.gmra.mrb[48].mxu0 %vm624_vm0, %v4468_v58  ;;  %7661 = vmatprep.mubr.msk.bf16.mxu1 %vm624_vm0, %v9741_v47  ;;  %v4434_v47 = vld [vmem:[#allocation2 + $0x21d] sm:$0xff] }
 0x248   : > { %7941 = vmatprep.mubr.msk.bf16.mxu0 %vm624_vm0, %v4469_v43  ;;  %v4472_v19 = vpack.c.bf16 %v4434_v47, %v4433_v33  ;;  %v8742_v58 = vld [vmem:[%s10842_s3 + $0x20] sm:$0xff]   ;;  %v5038_v43 = vpack.c.bf16 %v4980_v22, %v4979_v16  ;;  %v4987_v33 = vld [vmem:[#allocation2 + $0x116] sm:$0xff]  ;;  %v5014_v16 = vld [vmem:[#allocation2 + $0x1ee] sm:$0xff] }
 0x249   : > { %v4988_v47 = vld [vmem:[#allocation2 + $0x11e] sm:$0xff] }
 0x24e   : > { %7662 = vmatmul.mubr.msk.bf16.gmra.mrb[52].mxu1 %vm624_vm0, %v9751_v41  ;;  %v4437_v41 = vld [vmem:[#allocation2 + $0x235] sm:$0xff] }
 0x24f   : > { %7942 = vmatmul.mubr.msk.bf16.gmra.mrb[52].mxu0 %vm624_vm0, %v4470_v2  ;;  %7665 = vmatprep.mubr.msk.bf16.mxu1 %vm624_vm0, %v9753_v61  ;;  %v8739_v61 = vld [vmem:[%s10842_s3 + $0x8] sm:$0xff]   ;;  %v5040_v2 = vpack.c.bf16 %v4984_v44, %v4983_v34  ;;  %v5016_v34 = vld [vmem:[#allocation2 + $0x1fe] sm:$0xff] }
 0x250   : > { %7945 = vmatprep.mubr.msk.bf16.mxu0 %vm624_vm0, %v4471_v9  ;;  %8029 = vmatprep.subr.bf16.mxu1 %v8739_v61  ;;  %v5041_v9 = vpack.c.bf16 %v4986_v15, %v4985_v14  ;;  %v5017_v14 = vld [vmem:[#allocation2 + $0x206] sm:$0xff]  ;;  %v5018_v15 = vld [vmem:[#allocation2 + $0x20e] sm:$0xff] }
 0x251   : > { %8030 = vmatpush3.bf16.msra.mxu1 %v8739_v61  ;;  %v4991_v61 = vld [vmem:[#allocation2 + $0x136] sm:$0xff] }
 0x256   : > { %7666 = vmatmul.mubr.msk.bf16.gmra.mrb[56].mxu1 %vm624_vm0, %v9763_v53  ;;  %v4474_v53 = vpack.c.bf16 %v4438_v57, %v4437_v41  ;;  %v5043_v41 = vpack.c.bf16 %v4990_v12, %v4989_v52  ;;  %v4992_v57 = vld [vmem:[#allocation2 + $0x13e] sm:$0xff]  ;;  %v5057_v52 = vpack.c.bf16 %v5018_v15, %v5017_v14  ;;  %v5019_v12 = vld [vmem:[#allocation2 + $0x216] sm:$0xff] }
 0x257   : > { %7946 = vmatmul.mubr.msk.bf16.gmra.mrb[56].mxu0 %vm624_vm0, %v4472_v19  ;;  %7669 = vmatprep.mubr.msk.bf16.mxu1 %vm624_vm0, %v9765_v24  ;;  %v2097_v24 = vld [vmem:[#allocation2 + $0x232] sm:$0xff]  ;;  %v5042_v19 = vpack.c.bf16 %v4988_v47, %v4987_v33  ;;  %v5044_v26 = vpack.c.bf16 %v4992_v57, %v4991_v61 }
 0x258   : > { %7949 = vmatprep.mubr.msk.bf16.mxu0 %vm624_vm0, %v4473_v23  ;;  %v2132_v54 = vpack.c.bf16 %v2098_v38, %v2097_v24  ;;  %v8743_v23 = vld [vmem:[%s10842_s3 + $0x28] sm:$0xff]  }
 0x259   : > { %v4998_v24 = vld [vmem:[#allocation2 + $0x16e] sm:$0xff] }
 0x25a   : > { %v5022_v61 = vld [vmem:[#allocation2 + $0x22e] sm:$0xff] }
 0x25e   : > { %7670 = vmatmul.mubr.msk.bf16.gmra.mrb[60].mxu1 %vm624_vm0, %v9774_v40  ;;  %v8740_v40 = vld [vmem:[%s10842_s3 + $0x10] sm:$0xff]  }
 0x25f   : > { %7950 = vmatmul.mubr.msk.bf16.gmra.mrb[60].mxu0 %vm624_vm0, %v4474_v53  ;;  %7673 = vmatprep.mubr.msk.bf16.mxu1 %vm624_vm0, %v2131_v31  ;;  %v4995_v53 = vld [vmem:[#allocation2 + $0x156] sm:$0xff]  ;;  %v4996_v31 = vld [vmem:[#allocation2 + $0x15e] sm:$0xff] }
 0x260   : > { %7953 = vmatprep.mubr.msk.bf16.mxu0 %vm624_vm0, %v4475_v1  ;;  %8031 = vmatprep.subr.bf16.mxu1 %v8740_v40  ;;  %v4997_v1 = vld [vmem:[#allocation2 + $0x166] sm:$0xff]  ;;  %v5046_v38 = vpack.c.bf16 %v4996_v31, %v4995_v53  ;;  %v5023_v53 = vld [vmem:[#allocation2 + $0x236] sm:$0xff]  ;;  %v5024_v31 = vld [vmem:[#allocation2 + $0x23e] sm:$0xff] }
 0x261   : > { %8032 = vmatpush3.bf16.msra.mxu1 %v8740_v40  ;;  %v5047_v3 = vpack.c.bf16 %v4998_v24, %v4997_v1  ;;  %v5025_v24 = vld [vmem:[#allocation2 + $0x246] sm:$0xff] }
 0x262   : > { %8033 = vmatprep.subr.bf16.mxu1 %v8741_v59 }
 0x265   : > { %8034 = vmatpush3.bf16.msra.mxu1 %v8741_v59 }
 0x266   : > { %7674 = vmatmul.mubr.msk.bf16.gmra.mrb[64].mxu1 %vm624_vm0, %v2132_v54  ;;  %8035 = vmatprep.subr.bf16.mxu1 %v8742_v58  ;;  %v5001_v54 = vld [vmem:[#allocation2 + $0x186] sm:$0xff] }
 0x267   : > { %7954 = vmatmul.mubr.msk.bf16.gmra.mrb[64].mxu0 %vm624_vm0, %v4476_v36  ;;  %v5002_v36 = vld [vmem:[#allocation2 + $0x18e] sm:$0xff] }
 0x268   : > { %7959 = vmatprep.mubr.msk.bf16.mxu0 %vm624_vm0, %v5029_v13  ;;  %v5048_v13 = vpack.c.bf16 %v5000_v39, %v4999_v37  ;;  %v5049_v40 = vpack.c.bf16 %v5002_v36, %v5001_v54  ;;  %v5060_v37 = vpack.c.bf16 %v5024_v31, %v5023_v53  ;;  %v5027_v36 = vld [vmem:[#allocation2 + $0x256] sm:$0xff] }
 0x269   : > { %8036 = vmatpush3.bf16.msra.mxu1 %v8742_v58 }
 0x26a   : > { %8037 = vmatprep.subr.bf16.mxu1 %v8743_v23 }
 0x26d   : > { %8038 = vmatpush3.bf16.msra.mxu1 %v8743_v23 }
 0x26e   : > { %8039 = vmatprep.subr.bf16.mxu1 %v8744_v5 }
 0x26f   : > { %7960 = vmatmul.mubr.msk.bf16.vlgmr.msra.gmra.mrb[0].mxu0 %vm624_vm0, %v5030_v6  ;;  %v5006_v6 = vld [vmem:[#allocation2 + $0x1ae] sm:$0xff] }
 0x270   : > { %7963 = vmatprep.mubr.msk.bf16.mxu0 %vm624_vm0, %v5031_v17  ;;  %v5051_v11 = vpack.c.bf16 %v5006_v6, %v5005_v20 }
 0x271   : > { %8040 = vmatpush3.bf16.msra.mxu1 %v8744_v5 }
 0x277   : > { %7964 = vmatmul.mubr.msk.bf16.gmra.mrb[4].mxu0 %vm624_vm0, %v5032_v32  ;;  %v8745_v32 = vld [vmem:[%s10842_s3 + $0x38] sm:$0xff]  }
 0x278   : > { %7967 = vmatprep.mubr.msk.bf16.mxu0 %vm624_vm0, %v5033_v25  ;;  %8041 = vmatprep.subr.bf16.mxu1 %v8745_v32  ;;  %v5007_v25 = vld [vmem:[#allocation2 + $0x1b6] sm:$0xff] }
 0x279   : > { %8042 = vmatpush3.bf16.msra.mxu1 %v8745_v32 }
 0x27f   : > { %7968 = vmatmul.mubr.msk.bf16.gmra.mrb[8].mxu0 %vm624_vm0, %v5034_v60 }
 0x280   : > { %7971 = vmatprep.mubr.msk.bf16.mxu0 %vm624_vm0, %v5035_v62  ;;  %v5052_v62 = vpack.c.bf16 %v5008_v29, %v5007_v25 }
 0x287   : > { %7972 = vmatmul.mubr.msk.bf16.gmra.mrb[12].mxu0 %vm624_vm0, %v5036_v35 }
 0x288   : > { %7975 = vmatprep.mubr.msk.bf16.mxu0 %vm624_vm0, %v5037_v4  ;;  %v5013_v4 = vld [vmem:[#allocation2 + $0x1e6] sm:$0xff] }
 0x28f   : > { %7976 = vmatmul.mubr.msk.bf16.gmra.mrb[16].mxu0 %vm624_vm0, %v5038_v43  ;;  %v5055_v43 = vpack.c.bf16 %v5014_v16, %v5013_v4 }
 0x290   : > { %7979 = vmatprep.mubr.msk.bf16.mxu0 %vm624_vm0, %v5039_v27  ;;  %v5015_v27 = vld [vmem:[#allocation2 + $0x1f6] sm:$0xff] }
 0x291   : > { %v5056_v33 = vpack.c.bf16 %v5016_v34, %v5015_v27 }
 0x297   : > { %7980 = vmatmul.mubr.msk.bf16.gmra.mrb[20].mxu0 %vm624_vm0, %v5040_v2 }
 0x298   : > { %7983 = vmatprep.mubr.msk.bf16.mxu0 %vm624_vm0, %v5041_v9 }
 0x29f   : > { %7984 = vmatmul.mubr.msk.bf16.gmra.mrb[24].mxu0 %vm624_vm0, %v5042_v19  ;;  %v5020_v19 = vld [vmem:[#allocation2 + $0x21e] sm:$0xff] }
 0x2a0   : > { %7987 = vmatprep.mubr.msk.bf16.mxu0 %vm624_vm0, %v5043_v41  ;;  %v5021_v41 = vld [vmem:[#allocation2 + $0x226] sm:$0xff]  ;;  %v5058_v21 = vpack.c.bf16 %v5020_v19, %v5019_v12 }
 0x2a7   : > { %7988 = vmatmul.mubr.msk.bf16.gmra.mrb[28].mxu0 %vm624_vm0, %v5044_v26 }
 0x2a8   : > { %7991 = vmatprep.mubr.msk.bf16.mxu0 %vm624_vm0, %v5045_v30  ;;  %v5059_v30 = vpack.c.bf16 %v5022_v61, %v5021_v41 }
 0x2af   : > { %7992 = vmatmul.mubr.msk.bf16.gmra.mrb[32].mxu0 %vm624_vm0, %v5046_v38  ;;  %v5026_v38 = vld [vmem:[#allocation2 + $0x24e] sm:$0xff] }
 0x2b0   : > { %7995 = vmatprep.mubr.msk.bf16.mxu0 %vm624_vm0, %v5047_v3  ;;  %v5061_v54 = vpack.c.bf16 %v5026_v38, %v5025_v24 }
 0x2b7   : > { %7996 = vmatmul.mubr.msk.bf16.gmra.mrb[36].mxu0 %vm624_vm0, %v5048_v13  ;;  %v5028_v13 = vld [vmem:[#allocation2 + $0x25e] sm:$0xff] }
 0x2b8   : > { %7999 = vmatprep.mubr.msk.bf16.mxu0 %vm624_vm0, %v5049_v40  ;;  %v5062_v20 = vpack.c.bf16 %v5028_v13, %v5027_v36 }
 0x2b9   : > { %v9922_v50 = vpop.f32.mrb[0].mxu1 }
 0x2ba   : > { %v9924_v17 = vpop.f32.mrb[1].mxu1 }
 0x2bb   : > { %v9926_v51 = vpop.f32.mrb[2].mxu1 }
 0x2bc   : > { %v9928_v49 = vpop.f32.mrb[3].mxu1 }
 0x2bf   : > { %8000 = vmatmul.mubr.msk.bf16.gmra.mrb[40].mxu0 %vm624_vm0, %v5050_v55 }
 0x2c0   : > { %8003 = vmatprep.mubr.msk.bf16.mxu0 %vm624_vm0, %v5051_v11 }
 0x2c1   : > { %v9935_v63 = vpop.f32.mrb[4].mxu1 }
 0x2c2   : > { %v9937_v59 = vpop.f32.mrb[5].mxu1 }
 0x2c3   : > { %v9939_v60 = vpop.f32.mrb[6].mxu1 }
 0x2c4   : > { %v9941_v7 = vpop.f32.mrb[7].mxu1 }
 0x2c7   : > { %8004 = vmatmul.mubr.msk.bf16.gmra.mrb[44].mxu0 %vm624_vm0, %v5052_v62 }
 0x2c8   : > { %8007 = vmatprep.mubr.msk.bf16.mxu0 %vm624_vm0, %v5053_v10 }
 0x2c9   : > { %v9945_v35 = vpop.f32.mrb[8].mxu1 }
 0x2ca   : > { %v9947_v22 = vpop.f32.mrb[9].mxu1 }
 0x2cb   : > { %v9949_v8 = vpop.f32.mrb[10].mxu1 }
 0x2cc   : > { %v9951_v58 = vpop.f32.mrb[11].mxu1 }
 0x2cf   : > { %8008 = vmatmul.mubr.msk.bf16.gmra.mrb[48].mxu0 %vm624_vm0, %v5054_v46 }
 0x2d0   : > { %8011 = vmatprep.mubr.msk.bf16.mxu0 %vm624_vm0, %v5055_v43 }
 0x2d1   : > { %v9955_v44 = vpop.f32.mrb[12].mxu1 }
 0x2d2   : > { %v9957_v2 = vpop.f32.mrb[13].mxu1 }
 0x2d3   : > { %v9959_v9 = vpop.f32.mrb[14].mxu1 }
 0x2d4   : > { %v9961_v47 = vpop.f32.mrb[15].mxu1 }
 0x2d7   : > { %8012 = vmatmul.mubr.msk.bf16.gmra.mrb[52].mxu0 %vm624_vm0, %v5056_v33 }
 0x2d8   : > { %8015 = vmatprep.mubr.msk.bf16.mxu0 %vm624_vm0, %v5057_v52 }
 0x2d9   : > { %v9965_v23 = vpop.f32.mrb[16].mxu1 }
 0x2da   : > { %v9967_v57 = vpop.f32.mrb[17].mxu1 }
 0x2db   : > { %v9969_v18 = vpop.f32.mrb[18].mxu1 }
 0x2dc   : > { %v9971_v26 = vpop.f32.mrb[19].mxu1 }
 0x2df   : > { %8016 = vmatmul.mubr.msk.bf16.gmra.mrb[56].mxu0 %vm624_vm0, %v5058_v21 }
 0x2e0   : > { %8019 = vmatprep.mubr.msk.bf16.mxu0 %vm624_vm0, %v5059_v30 }
 0x2e1   : > { %v9975_v1 = vpop.f32.mrb[20].mxu1 }
 0x2e2   : > { %v9977_v3 = vpop.f32.mrb[21].mxu1 }
 0x2e3   : > { %v9979_v5 = vpop.f32.mrb[22].mxu1 }
 0x2e4   : > { %v9981_v39 = vpop.f32.mrb[23].mxu1 }
 0x2e7   : > { %8020 = vmatmul.mubr.msk.bf16.gmra.mrb[60].mxu0 %vm624_vm0, %v5060_v37 }
 0x2e8   : > { %8023 = vmatprep.mubr.msk.bf16.mxu0 %vm624_vm0, %v5061_v54 }
 0x2e9   : > { %v9985_v40 = vpop.f32.mrb[24].mxu1 }
 0x2ea   : > { %v9987_v56 = vpop.f32.mrb[25].mxu1 }
 0x2eb   : > { %v9989_v48 = vpop.f32.mrb[26].mxu1 }
 0x2ec   : > { %v9991_v6 = vpop.f32.mrb[27].mxu1 }
 0x2ef   : > { %8024 = vmatmul.mubr.msk.bf16.gmra.mrb[64].mxu0 %vm624_vm0, %v5062_v20 }
 0x2f1   : > { %v9994_v55 = vpop.f32.mrb[28].mxu1 }
 0x2f2   : > { %v9996_v11 = vpop.f32.mrb[29].mxu1 }
 0x2f3   : > { %v9998_v32 = vpop.f32.mrb[30].mxu1 }
 0x2f4   : > { %v10000_v25 = vpop.f32.mrb[31].mxu1 }
 0x2f9   : > { %v10002_v29 = vpop.f32.mrb[32].mxu1 }
 0x2fa   : > { %v10004_v0 = vpop.f32.mrb[33].mxu1 }
 0x2fb   : > { %v10006_v28 = vpop.f32.mrb[34].mxu1 }
 0x2fc   : > { %v10008_v62 = vpop.f32.mrb[35].mxu1 }
 0x301   : > { %v10010_v10 = vpop.f32.mrb[36].mxu1 }
 0x302   : > { %v10012_v45 = vpop.f32.mrb[37].mxu1 }
 0x303   : > { %v10014_v42 = vpop.f32.mrb[38].mxu1 }
 0x304   : > { %v10016_v4 = vpop.f32.mrb[39].mxu1 }
 0x309   : > { %v10018_v16 = vpop.f32.mrb[40].mxu1 }
 0x30a   : > { %v10020_v46 = vpop.f32.mrb[41].mxu1 }
 0x30b   : > { %v10022_v43 = vpop.f32.mrb[42].mxu1 }
 0x30c   : > { %v10024_v27 = vpop.f32.mrb[43].mxu1 }
 0x311   : > { %v10026_v34 = vpop.f32.mrb[44].mxu1 }
 0x312   : > { %v10028_v14 = vpop.f32.mrb[45].mxu1 }
 0x313   : > { %v10030_v15 = vpop.f32.mrb[46].mxu1 }
 0x314   : > { %v10032_v33 = vpop.f32.mrb[47].mxu1 }
 0x315   : > { %10847 = vst [vmem:[#allocation9_spill] sm:$0xff] %v10032_v33 }
 0x319   : > { %v10034_v52 = vpop.f32.mrb[48].mxu1 }
 0x31a   : > { %10848 = vst [vmem:[#allocation10_spill] sm:$0xff] %v10034_v52  ;;  %v10036_v12 = vpop.f32.mrb[49].mxu1 }
 0x31b   : > { %10849 = vst [vmem:[#allocation11_spill] sm:$0xff] %v10036_v12  ;;  %v10038_v19 = vpop.f32.mrb[50].mxu1 }
 0x31c   : > { %10850 = vst [vmem:[#allocation12_spill] sm:$0xff] %v10038_v19  ;;  %v10040_v41 = vpop.f32.mrb[51].mxu1 }
 0x31d   : > { %10851 = vst [vmem:[#allocation13_spill] sm:$0xff] %v10040_v41 }
 0x321   : > { %v10042_v61 = vpop.f32.mrb[52].mxu1 }
 0x322   : > { %10852 = vst [vmem:[#allocation14_spill] sm:$0xff] %v10042_v61  ;;  %v10044_v21 = vpop.f32.mrb[53].mxu1 }
 0x323   : > { %10853 = vst [vmem:[#allocation15_spill] sm:$0xff] %v10044_v21  ;;  %v10046_v30 = vpop.f32.mrb[54].mxu1 }
 0x324   : > { %10854 = vst [vmem:[#allocation16_spill] sm:$0xff] %v10046_v30  ;;  %v10048_v53 = vpop.f32.mrb[55].mxu1 }
 0x325   : > { %10855 = vst [vmem:[#allocation17_spill] sm:$0xff] %v10048_v53 }
 0x329   : > { %v10050_v31 = vpop.f32.mrb[56].mxu1 }
 0x32a   : > { %10856 = vst [vmem:[#allocation18_spill] sm:$0xff] %v10050_v31  ;;  %v10052_v24 = vpop.f32.mrb[57].mxu1 }
 0x32b   : > { %10857 = vst [vmem:[#allocation19_spill] sm:$0xff] %v10052_v24  ;;  %v10054_v38 = vpop.f32.mrb[58].mxu1 }
 0x32c   : > { %10858 = vst [vmem:[#allocation20_spill] sm:$0xff] %v10054_v38  ;;  %v10056_v37 = vpop.f32.mrb[59].mxu1 }
 0x32d   : > { %10859 = vst [vmem:[#allocation21_spill] sm:$0xff] %v10056_v37  ;;  %v10077_v37 = vld [vmem:[%s10841_s2] ss:$0 sm:$0xff] }
 0x331   : > { %v10058_v54 = vpop.f32.mrb[60].mxu1 }
 0x332   : > { %10860 = vst [vmem:[#allocation22_spill] sm:$0xff] %v10058_v54  ;;  %v10060_v36 = vpop.f32.mrb[61].mxu1 }
 0x333   : > { %10861 = vst [vmem:[#allocation23_spill] sm:$0xff] %v10060_v36  ;;  %v10062_v13 = vpop.f32.mrb[62].mxu1 }
 0x334   : > { %10862 = vst [vmem:[#allocation24_spill] sm:$0xff] %v10062_v13  ;;  %v10064_v20 = vpop.f32.mrb[63].mxu1 }
 0x335   : > { %10863 = vst [vmem:[#allocation25_spill] sm:$0xff] %v10064_v20 }
 0x339   : > { %v10066_v21 = vpop.f32.mrb[64].mxu1 }
 0x33a   : > { %10864 = vst [vmem:[#allocation26_spill] sm:$0xff] %v10066_v21  ;;  %v10068_v30 = vpop.f32.mrb[65].mxu1 }
 0x33b   : > { %10865 = vst [vmem:[#allocation27_spill] sm:$0xff] %v10068_v30  ;;  %v10070_v53 = vpop.f32.mrb[66].mxu1 }
 0x33c   : > { %10866 = vst [vmem:[#allocation28_spill] sm:$0xff] %v10070_v53  ;;  %v10072_v31 = vpop.f32.mrb[67].mxu1 }
 0x33d   : > { %10867 = vst [vmem:[#allocation29_spill] sm:$0xff] %v10072_v31 }
 0x342   : > { %v7961_v24 = vpop.f32.mrb[0].mxu0 }
 0x343   : > { %v8111_v36 = vadd.f32 %v7961_v24, %v9922_v50  ;;  %v5208_v54 = vpop.f32.mrb[1].mxu0 }
 0x344   : > { %v8112_v13 = vadd.f32 %v5208_v54, %v9924_v17  ;;  %v7962_v20 = vpop.f32.mrb[2].mxu0 }
 0x345   : > { %v5556_v21 = vadd.f32 %v8111_v36, %v10077_v37  ;;  %v8113_v30 = vadd.f32 %v7962_v20, %v9926_v51  ;;  %v5211_v38 = vpop.f32.mrb[3].mxu0 }
 0x346   : > { %v5554_v53 = vadd.f32 %v8112_v13, %v10077_v37  ;;  %v8114_v31 = vadd.f32 %v5211_v38, %v9928_v49 }
 0x347   : > { %v5557_v61 = vadd.f32 %v8113_v30, %v10077_v37  ;;  %v5624_v19 = vmax.f32 %v5556_v21, 0.0 }
 0x348   : > { %v5555_v41 = vadd.f32 %v8114_v31, %v10077_v37  ;;  %v5622_v50 = vmax.f32 %v5554_v53, 0.0 }
 0x349   : > { %v5625_v12 = vmax.f32 %v5557_v61, 0.0 }
 0x34a   : > { %v5623_v24 = vmax.f32 %v5555_v41, 0.0  ;;  %v7965_v52 = vpop.f32.mrb[4].mxu0 }
 0x34b   : > { %v5691_v17 = vpack.c.bf16 %v5625_v12, %v5624_v19  ;;  %v8115_v54 = vadd.f32 %v7965_v52, %v9935_v63  ;;  %v5224_v36 = vpop.f32.mrb[5].mxu0 }
 0x34c   : > { %v8116_v51 = vadd.f32 %v5224_v36, %v9937_v59  ;;  %v7966_v20 = vpop.f32.mrb[6].mxu0  ;;  %v5690_v33 = vpack.c.bf16 %v5623_v24, %v5622_v50 }
 0x34d   : > { %v5560_v13 = vadd.f32 %v8115_v54, %v10077_v37  ;;  %v8117_v49 = vadd.f32 %v7966_v20, %v9939_v60  ;;  %v5227_v30 = vpop.f32.mrb[7].mxu0 }
 0x34e   : > { %v5558_v31 = vadd.f32 %v8116_v51, %v10077_v37  ;;  %v8118_v61 = vadd.f32 %v5227_v30, %v9941_v7  ;;  %8043 = vmatprep.mubr.bf16.mxu1 %v5690_v33 }
 0x34f   : > { %v5561_v41 = vadd.f32 %v8117_v49, %v10077_v37  ;;  %8044 = vmatmul.mubr.bf16.vlgmr.msra.gmra.mrb[68].mxu1 %v5691_v17  ;;  %v5628_v52 = vmax.f32 %v5560_v13, 0.0 }
 0x350   : > { %v5559_v63 = vadd.f32 %v8118_v61, %v10077_v37  ;;  %v5626_v59 = vmax.f32 %v5558_v31, 0.0 }
 0x351   : > { %v5629_v12 = vmax.f32 %v5561_v41, 0.0 }
 0x352   : > { %v5627_v19 = vmax.f32 %v5559_v63, 0.0  ;;  %v7969_v21 = vpop.f32.mrb[8].mxu0 }
 0x353   : > { %v8119_v53 = vadd.f32 %v7969_v21, %v9945_v35  ;;  %v5240_v38 = vpop.f32.mrb[9].mxu0  ;;  %v5693_v60 = vpack.c.bf16 %v5629_v12, %v5628_v52 }
 0x354   : > { %v8120_v50 = vadd.f32 %v5240_v38, %v9947_v22  ;;  %v7970_v24 = vpop.f32.mrb[10].mxu0  ;;  %v5692_v54 = vpack.c.bf16 %v5627_v19, %v5626_v59 }
 0x355   : > { %v5564_v7 = vadd.f32 %v8119_v53, %v10077_v37  ;;  %v8121_v33 = vadd.f32 %v7970_v24, %v9949_v8  ;;  %v5243_v17 = vpop.f32.mrb[11].mxu0 }
 0x356   : > { %v5562_v36 = vadd.f32 %v8120_v50, %v10077_v37  ;;  %v8122_v51 = vadd.f32 %v5243_v17, %v9951_v58  ;;  %8047 = vmatprep.mubr.bf16.mxu1 %v5692_v54 }
 0x357   : > { %v5565_v20 = vadd.f32 %v8121_v33, %v10077_v37  ;;  %8048 = vmatmul.mubr.bf16.gmra.mrb[72].mxu1 %v5693_v60  ;;  %v5632_v13 = vmax.f32 %v5564_v7, 0.0 }
 0x358   : > { %v5563_v35 = vadd.f32 %v8122_v51, %v10077_v37  ;;  %v5630_v22 = vmax.f32 %v5562_v36, 0.0 }
 0x359   : > { %v5633_v49 = vmax.f32 %v5565_v20, 0.0 }
 0x35a   : > { %v5631_v30 = vmax.f32 %v5563_v35, 0.0  ;;  %v7973_v31 = vpop.f32.mrb[12].mxu0 }
 0x35b   : > { %v8123_v61 = vadd.f32 %v7973_v31, %v9955_v44  ;;  %v5256_v41 = vpop.f32.mrb[13].mxu0  ;;  %v5695_v8 = vpack.c.bf16 %v5633_v49, %v5632_v13 }
 0x35c   : > { %v8124_v63 = vadd.f32 %v5256_v41, %v9957_v2  ;;  %v7974_v52 = vpop.f32.mrb[14].mxu0  ;;  %v5694_v12 = vpack.c.bf16 %v5631_v30, %v5630_v22 }
 0x35d   : > { %v5568_v58 = vadd.f32 %v8123_v61, %v10077_v37  ;;  %v8125_v59 = vadd.f32 %v7974_v52, %v9959_v9  ;;  %v5259_v19 = vpop.f32.mrb[15].mxu0 }
 0x35e   : > { %v5566_v21 = vadd.f32 %v8124_v63, %v10077_v37  ;;  %v8126_v53 = vadd.f32 %v5259_v19, %v9961_v47  ;;  %8051 = vmatprep.mubr.bf16.mxu1 %v5694_v12 }
 0x35f   : > { %v5569_v38 = vadd.f32 %v8125_v59, %v10077_v37  ;;  %8052 = vmatmul.mubr.bf16.gmra.mrb[76].mxu1 %v5695_v8  ;;  %v5636_v60 = vmax.f32 %v5568_v58, 0.0 }
 0x360   : > { %v5567_v44 = vadd.f32 %v8126_v53, %v10077_v37  ;;  %v5634_v2 = vmax.f32 %v5566_v21, 0.0 }
 0x361   : > { %v5637_v50 = vmax.f32 %v5569_v38, 0.0 }
 0x362   : > { %v5635_v24 = vmax.f32 %v5567_v44, 0.0  ;;  %v7977_v54 = vpop.f32.mrb[16].mxu0 }
 0x363   : > { %v8127_v7 = vadd.f32 %v7977_v54, %v9965_v23  ;;  %v5272_v33 = vpop.f32.mrb[17].mxu0  ;;  %v5697_v9 = vpack.c.bf16 %v5637_v50, %v5636_v60 }
 0x364   : > { %v8128_v17 = vadd.f32 %v5272_v33, %v9967_v57  ;;  %v7978_v36 = vpop.f32.mrb[18].mxu0  ;;  %v5696_v51 = vpack.c.bf16 %v5635_v24, %v5634_v2 }
 0x365   : > { %v5572_v47 = vadd.f32 %v8127_v7, %v10077_v37  ;;  %v8129_v20 = vadd.f32 %v7978_v36, %v9969_v18  ;;  %v5275_v35 = vpop.f32.mrb[19].mxu0 }
 0x366   : > { %v5570_v13 = vadd.f32 %v8128_v17, %v10077_v37  ;;  %v8130_v49 = vadd.f32 %v5275_v35, %v9971_v26  ;;  %8055 = vmatprep.mubr.bf16.mxu1 %v5696_v51 }
 0x367   : > { %v5573_v22 = vadd.f32 %v8129_v20, %v10077_v37  ;;  %8056 = vmatmul.mubr.bf16.gmra.mrb[80].mxu1 %v5697_v9  ;;  %v5640_v30 = vmax.f32 %v5572_v47, 0.0 }
 0x368   : > { %v5571_v23 = vadd.f32 %v8130_v49, %v10077_v37  ;;  %v5638_v57 = vmax.f32 %v5570_v13, 0.0 }
 0x369   : > { %v5641_v31 = vmax.f32 %v5573_v22, 0.0 }
 0x36a   : > { %v5639_v61 = vmax.f32 %v5571_v23, 0.0  ;;  %v7981_v41 = vpop.f32.mrb[20].mxu0 }
 0x36b   : > { %v8131_v8 = vadd.f32 %v7981_v41, %v9975_v1  ;;  %v5288_v63 = vpop.f32.mrb[21].mxu0  ;;  %v5699_v18 = vpack.c.bf16 %v5641_v31, %v5640_v30 }
 0x36c   : > { %v8132_v52 = vadd.f32 %v5288_v63, %v9977_v3  ;;  %v7982_v12 = vpop.f32.mrb[22].mxu0  ;;  %v5698_v58 = vpack.c.bf16 %v5639_v61, %v5638_v57 }
 0x36d   : > { %v5576_v26 = vadd.f32 %v8131_v8, %v10077_v37  ;;  %v8133_v59 = vadd.f32 %v7982_v12, %v9979_v5  ;;  %v5291_v19 = vpop.f32.mrb[23].mxu0 }
 0x36e   : > { %v5574_v21 = vadd.f32 %v8132_v52, %v10077_v37  ;;  %v8134_v53 = vadd.f32 %v5291_v19, %v9981_v39  ;;  %8059 = vmatprep.mubr.bf16.mxu1 %v5698_v58 }
 0x36f   : > { %v5577_v38 = vadd.f32 %v8133_v59, %v10077_v37  ;;  %8060 = vmatmul.mubr.bf16.gmra.mrb[84].mxu1 %v5699_v18  ;;  %v5644_v44 = vmax.f32 %v5576_v26, 0.0 }
 0x370   : > { %v5575_v1 = vadd.f32 %v8134_v53, %v10077_v37  ;;  %v5642_v3 = vmax.f32 %v5574_v21, 0.0 }
 0x371   : > { %v5645_v60 = vmax.f32 %v5577_v38, 0.0 }
 0x372   : > { %v5643_v50 = vmax.f32 %v5575_v1, 0.0  ;;  %v7985_v2 = vpop.f32.mrb[24].mxu0 }
 0x373   : > { %v8135_v24 = vadd.f32 %v7985_v2, %v9985_v40  ;;  %v5304_v54 = vpop.f32.mrb[25].mxu0  ;;  %v5701_v5 = vpack.c.bf16 %v5645_v60, %v5644_v44 }
 0x374   : > { %v8136_v7 = vadd.f32 %v5304_v54, %v9987_v56  ;;  %v7986_v33 = vpop.f32.mrb[26].mxu0  ;;  %v5700_v9 = vpack.c.bf16 %v5643_v50, %v5642_v3 }
 0x375   : > { %v5580_v39 = vadd.f32 %v8135_v24, %v10077_v37  ;;  %v8137_v17 = vadd.f32 %v7986_v33, %v9989_v48  ;;  %v5307_v36 = vpop.f32.mrb[27].mxu0 }
 0x376   : > { %v5578_v51 = vadd.f32 %v8136_v7, %v10077_v37  ;;  %v8138_v47 = vadd.f32 %v5307_v36, %v9991_v6  ;;  %8063 = vmatprep.mubr.bf16.mxu1 %v5700_v9 }
 0x377   : > { %v5581_v20 = vadd.f32 %v8137_v17, %v10077_v37  ;;  %8064 = vmatmul.mubr.bf16.gmra.mrb[88].mxu1 %v5701_v5  ;;  %v5648_v35 = vmax.f32 %v5580_v39, 0.0 }
 0x378   : > { %v5579_v40 = vadd.f32 %v8138_v47, %v10077_v37  ;;  %v5646_v56 = vmax.f32 %v5578_v51, 0.0 }
 0x379   : > { %v5649_v13 = vmax.f32 %v5581_v20, 0.0 }
 0x37a   : > { %v5647_v49 = vmax.f32 %v5579_v40, 0.0  ;;  %v7989_v22 = vpop.f32.mrb[28].mxu0 }
 0x37b   : > { %v8139_v23 = vadd.f32 %v7989_v22, %v9994_v55  ;;  %v5320_v30 = vpop.f32.mrb[29].mxu0  ;;  %v5703_v48 = vpack.c.bf16 %v5649_v13, %v5648_v35 }
 0x37c   : > { %v8140_v31 = vadd.f32 %v5320_v30, %v9996_v11  ;;  %v7990_v57 = vpop.f32.mrb[30].mxu0  ;;  %v5702_v61 = vpack.c.bf16 %v5647_v49, %v5646_v56 }
 0x37d   : > { %v5584_v6 = vadd.f32 %v8139_v23, %v10077_v37  ;;  %v8141_v41 = vadd.f32 %v7990_v57, %v9998_v32  ;;  %v5323_v8 = vpop.f32.mrb[31].mxu0 }
 0x37e   : > { %v5582_v63 = vadd.f32 %v8140_v31, %v10077_v37  ;;  %v8142_v18 = vadd.f32 %v5323_v8, %v10000_v25  ;;  %8067 = vmatprep.mubr.bf16.mxu1 %v5702_v61 }
 0x37f   : > { %v5585_v52 = vadd.f32 %v8141_v41, %v10077_v37  ;;  %8068 = vmatmul.mubr.bf16.gmra.mrb[92].mxu1 %v5703_v48  ;;  %v5652_v12 = vmax.f32 %v5584_v6, 0.0 }
 0x380   : > { %v5583_v55 = vadd.f32 %v8142_v18, %v10077_v37  ;;  %v5650_v11 = vmax.f32 %v5582_v63, 0.0 }
 0x381   : > { %v5653_v58 = vmax.f32 %v5585_v52, 0.0 }
 0x382   : > { %v5651_v26 = vmax.f32 %v5583_v55, 0.0  ;;  %v7993_v59 = vpop.f32.mrb[32].mxu0 }
 0x383   : > { %v8143_v19 = vadd.f32 %v7993_v59, %v10002_v29  ;;  %v5336_v21 = vpop.f32.mrb[33].mxu0  ;;  %v5705_v32 = vpack.c.bf16 %v5653_v58, %v5652_v12 }
 0x384   : > { %v8144_v53 = vadd.f32 %v5336_v21, %v10004_v0  ;;  %v7994_v38 = vpop.f32.mrb[34].mxu0  ;;  %v5704_v1 = vpack.c.bf16 %v5651_v26, %v5650_v11 }
 0x385   : > { %v5588_v25 = vadd.f32 %v8143_v19, %v10077_v37  ;;  %v8145_v44 = vadd.f32 %v7994_v38, %v10006_v28  ;;  %v5339_v60 = vpop.f32.mrb[35].mxu0  ;;  %v10868_v38 = vld [vmem:[#allocation9_spill] sm:$0xff] }
 0x386   : > { %v5586_v3 = vadd.f32 %v8144_v53, %v10077_v37  ;;  %v8146_v50 = vadd.f32 %v5339_v60, %v10008_v62  ;;  %8071 = vmatprep.mubr.bf16.mxu1 %v5704_v1 }
 0x387   : > { %v5589_v2 = vadd.f32 %v8145_v44, %v10077_v37  ;;  %8072 = vmatmul.mubr.bf16.gmra.mrb[96].mxu1 %v5705_v32  ;;  %v5656_v24 = vmax.f32 %v5588_v25, 0.0 }
 0x388   : > { %v5587_v29 = vadd.f32 %v8146_v50, %v10077_v37  ;;  %v5654_v0 = vmax.f32 %v5586_v3, 0.0 }
 0x389   : > { %v5657_v54 = vmax.f32 %v5589_v2, 0.0  ;;  %v10869_v2 = vld [vmem:[#allocation10_spill] sm:$0xff] }
 0x38a   : > { %v5655_v5 = vmax.f32 %v5587_v29, 0.0  ;;  %v7997_v7 = vpop.f32.mrb[36].mxu0 }
 0x38b   : > { %v8147_v33 = vadd.f32 %v7997_v7, %v10010_v10  ;;  %v5352_v9 = vpop.f32.mrb[37].mxu0  ;;  %v5707_v28 = vpack.c.bf16 %v5657_v54, %v5656_v24  ;;  %v10870_v54 = vld [vmem:[#allocation11_spill] sm:$0xff] }
 0x38c   : > { %v8148_v39 = vadd.f32 %v5352_v9, %v10012_v45  ;;  %v7998_v17 = vpop.f32.mrb[38].mxu0  ;;  %v5706_v36 = vpack.c.bf16 %v5655_v5, %v5654_v0  ;;  %v10871_v9 = vld [vmem:[#allocation12_spill] sm:$0xff] }
 0x38d   : > { %v5592_v62 = vadd.f32 %v8147_v33, %v10077_v37  ;;  %v8149_v51 = vadd.f32 %v7998_v17, %v10014_v42  ;;  %v5355_v47 = vpop.f32.mrb[39].mxu0 }
 0x38e   : > { %v5590_v20 = vadd.f32 %v8148_v39, %v10077_v37  ;;  %v8150_v40 = vadd.f32 %v5355_v47, %v10016_v4  ;;  %8075 = vmatprep.mubr.bf16.mxu1 %v5706_v36  ;;  %v10872_v36 = vld [vmem:[#allocation13_spill] sm:$0xff] }
 0x38f   : > { %v5593_v35 = vadd.f32 %v8149_v51, %v10077_v37  ;;  %8076 = vmatmul.mubr.bf16.gmra.mrb[100].mxu1 %v5707_v28  ;;  %v5660_v13 = vmax.f32 %v5592_v62, 0.0 }
 0x390   : > { %v5591_v10 = vadd.f32 %v8150_v40, %v10077_v37  ;;  %v5658_v45 = vmax.f32 %v5590_v20, 0.0 }
 0x391   : > { %v5661_v56 = vmax.f32 %v5593_v35, 0.0 }
 0x392   : > { %v5659_v49 = vmax.f32 %v5591_v10, 0.0  ;;  %v8001_v22 = vpop.f32.mrb[40].mxu0 }
 0x393   : > { %v8151_v23 = vadd.f32 %v8001_v22, %v10018_v16  ;;  %v5368_v30 = vpop.f32.mrb[41].mxu0  ;;  %v5709_v42 = vpack.c.bf16 %v5661_v56, %v5660_v13  ;;  %v10873_v56 = vld [vmem:[#allocation14_spill] sm:$0xff] }
 0x394   : > { %v8152_v48 = vadd.f32 %v5368_v30, %v10020_v46  ;;  %v8002_v31 = vpop.f32.mrb[42].mxu0  ;;  %v5708_v57 = vpack.c.bf16 %v5659_v49, %v5658_v45 }
 0x395   : > { %v5596_v4 = vadd.f32 %v8151_v23, %v10077_v37  ;;  %v8153_v61 = vadd.f32 %v8002_v31, %v10022_v43  ;;  %v5371_v6 = vpop.f32.mrb[43].mxu0  ;;  %v10874_v23 = vld [vmem:[#allocation15_spill] sm:$0xff] }
 0x396   : > { %v5594_v41 = vadd.f32 %v8152_v48, %v10077_v37  ;;  %v8154_v8 = vadd.f32 %v5371_v6, %v10024_v27  ;;  %8079 = vmatprep.mubr.bf16.mxu1 %v5708_v57  ;;  %v10875_v57 = vld [vmem:[#allocation16_spill] sm:$0xff] }
 0x397   : > { %v5597_v63 = vadd.f32 %v8153_v61, %v10077_v37  ;;  %8080 = vmatmul.mubr.bf16.gmra.mrb[104].mxu1 %v5709_v42  ;;  %v5664_v18 = vmax.f32 %v5596_v4, 0.0 }
 0x398   : > { %v5595_v16 = vadd.f32 %v8154_v8, %v10077_v37  ;;  %v5662_v46 = vmax.f32 %v5594_v41, 0.0  ;;  %v10876_v41 = vld [vmem:[#allocation17_spill] sm:$0xff] }
 0x399   : > { %v5665_v52 = vmax.f32 %v5597_v63, 0.0 }
 0x39a   : > { %v5663_v55 = vmax.f32 %v5595_v16, 0.0  ;;  %v8005_v12 = vpop.f32.mrb[44].mxu0 }
 0x39b   : > { %v8155_v58 = vadd.f32 %v8005_v12, %v10026_v34  ;;  %v5384_v11 = vpop.f32.mrb[45].mxu0  ;;  %v5711_v43 = vpack.c.bf16 %v5665_v52, %v5664_v18 }
 0x39c   : > { %v8156_v26 = vadd.f32 %v5384_v11, %v10028_v14  ;;  %v8006_v59 = vpop.f32.mrb[46].mxu0  ;;  %v5710_v19 = vpack.c.bf16 %v5663_v55, %v5662_v46 }
 0x39d   : > { %v5600_v27 = vadd.f32 %v8155_v58, %v10077_v37  ;;  %v8157_v21 = vadd.f32 %v8006_v59, %v10030_v15  ;;  %v5387_v32 = vpop.f32.mrb[47].mxu0  ;;  %v10877_v58 = vld [vmem:[#allocation18_spill] sm:$0xff]  ;;  %v10878_v59 = vld [vmem:[#allocation19_spill] sm:$0xff] }
 0x39e   : > { %v5598_v53 = vadd.f32 %v8156_v26, %v10077_v37  ;;  %v8158_v1 = vadd.f32 %v5387_v32, %v10868_v38  ;;  %8083 = vmatprep.mubr.bf16.mxu1 %v5710_v19 }
 0x39f   : > { %v5601_v25 = vadd.f32 %v8157_v21, %v10077_v37  ;;  %8084 = vmatmul.mubr.bf16.gmra.mrb[108].mxu1 %v5711_v43  ;;  %v5668_v44 = vmax.f32 %v5600_v27, 0.0 }
 0x3a0   : > { %v5599_v34 = vadd.f32 %v8158_v1, %v10077_v37  ;;  %v5666_v14 = vmax.f32 %v5598_v53, 0.0  ;;  %v10879_v53 = vld [vmem:[#allocation20_spill] sm:$0xff] }
 0x3a1   : > { %v5669_v60 = vmax.f32 %v5601_v25, 0.0 }
 0x3a2   : > { %v5667_v3 = vmax.f32 %v5599_v34, 0.0  ;;  %v8009_v50 = vpop.f32.mrb[48].mxu0  ;;  %v10880_v34 = vld [vmem:[#allocation21_spill] sm:$0xff] }
 0x3a3   : > { %v8159_v29 = vadd.f32 %v8009_v50, %v10869_v2  ;;  %v5400_v24 = vpop.f32.mrb[49].mxu0  ;;  %v5713_v15 = vpack.c.bf16 %v5669_v60, %v5668_v44 }
 0x3a4   : > { %v8160_v0 = vadd.f32 %v5400_v24, %v10870_v54  ;;  %v8010_v5 = vpop.f32.mrb[50].mxu0  ;;  %v5712_v7 = vpack.c.bf16 %v5667_v3, %v5666_v14 }
 0x3a5   : > { %v5604_v33 = vadd.f32 %v8159_v29, %v10077_v37  ;;  %v8161_v28 = vadd.f32 %v8010_v5, %v10871_v9  ;;  %v5403_v39 = vpop.f32.mrb[51].mxu0 }
 0x3a6   : > { %v5602_v17 = vadd.f32 %v8160_v0, %v10077_v37  ;;  %v8162_v62 = vadd.f32 %v5403_v39, %v10872_v36  ;;  %8087 = vmatprep.mubr.bf16.mxu1 %v5712_v7  ;;  %v10882_v7 = vld [vmem:[#allocation23_spill] sm:$0xff] }
 0x3a7   : > { %v5605_v51 = vadd.f32 %v8161_v28, %v10077_v37  ;;  %8088 = vmatmul.mubr.bf16.gmra.mrb[112].mxu1 %v5713_v15  ;;  %v5672_v20 = vmax.f32 %v5604_v33, 0.0  ;;  %v10881_v15 = vld [vmem:[#allocation22_spill] sm:$0xff] }
 0x3a8   : > { %v5603_v47 = vadd.f32 %v8162_v62, %v10077_v37  ;;  %v5670_v35 = vmax.f32 %v5602_v17, 0.0  ;;  %v10883_v17 = vld [vmem:[#allocation24_spill] sm:$0xff] }
 0x3a9   : > { %v5673_v40 = vmax.f32 %v5605_v51, 0.0 }
 0x3aa   : > { %v5671_v10 = vmax.f32 %v5603_v47, 0.0  ;;  %v8013_v13 = vpop.f32.mrb[52].mxu0  ;;  %v10884_v47 = vld [vmem:[#allocation25_spill] sm:$0xff] }
 0x3ab   : > { %v8163_v45 = vadd.f32 %v8013_v13, %v10873_v56  ;;  %v5416_v49 = vpop.f32.mrb[53].mxu0  ;;  %v5715_v22 = vpack.c.bf16 %v5673_v40, %v5672_v20 }
 0x3ac   : > { %v8164_v30 = vadd.f32 %v5416_v49, %v10874_v23  ;;  %v8014_v42 = vpop.f32.mrb[54].mxu0  ;;  %v5714_v48 = vpack.c.bf16 %v5671_v10, %v5670_v35 }
 0x3ad   : > { %v5608_v31 = vadd.f32 %v8163_v45, %v10077_v37  ;;  %v8165_v4 = vadd.f32 %v8014_v42, %v10875_v57  ;;  %v5419_v61 = vpop.f32.mrb[55].mxu0 }
 0x3ae   : > { %v5606_v6 = vadd.f32 %v8164_v30, %v10077_v37  ;;  %v8166_v8 = vadd.f32 %v5419_v61, %v10876_v41  ;;  %8091 = vmatprep.mubr.bf16.mxu1 %v5714_v48  ;;  %v10886_v48 = vld [vmem:[#allocation27_spill] sm:$0xff] }
 0x3af   : > { %v5609_v63 = vadd.f32 %v8165_v4, %v10077_v37  ;;  %8092 = vmatmul.mubr.bf16.gmra.mrb[116].mxu1 %v5715_v22  ;;  %v5676_v18 = vmax.f32 %v5608_v31, 0.0  ;;  %v10885_v22 = vld [vmem:[#allocation26_spill] sm:$0xff] }
 0x3b0   : > { %v5607_v16 = vadd.f32 %v8166_v8, %v10077_v37  ;;  %v5674_v46 = vmax.f32 %v5606_v6, 0.0  ;;  %v10887_v6 = vld [vmem:[#allocation28_spill] sm:$0xff] }
 0x3b1   : > { %v5677_v52 = vmax.f32 %v5609_v63, 0.0 }
 0x3b2   : > { %v5675_v55 = vmax.f32 %v5607_v16, 0.0  ;;  %v8017_v12 = vpop.f32.mrb[56].mxu0  ;;  %v10888_v16 = vld [vmem:[#allocation29_spill] sm:$0xff] }
 0x3b3   : > { %v8167_v11 = vadd.f32 %v8017_v12, %v10877_v58  ;;  %v5432_v43 = vpop.f32.mrb[57].mxu0  ;;  %v5717_v26 = vpack.c.bf16 %v5677_v52, %v5676_v18 }
 0x3b4   : > { %v8168_v19 = vadd.f32 %v5432_v43, %v10878_v59  ;;  %v8018_v27 = vpop.f32.mrb[58].mxu0  ;;  %v5716_v21 = vpack.c.bf16 %v5675_v55, %v5674_v46  ;;  %v10218_v59 = vld [vmem:[%s10843_s4] ss:$0 sm:$0xff] }
 0x3b5   : > { %v5612_v32 = vadd.f32 %v8167_v11, %v10077_v37  ;;  %v8169_v38 = vadd.f32 %v8018_v27, %v10879_v53  ;;  %v5435_v1 = vpop.f32.mrb[59].mxu0 }
 0x3b6   : > { %v5610_v25 = vadd.f32 %v8168_v19, %v10077_v37  ;;  %v8170_v44 = vadd.f32 %v5435_v1, %v10880_v34  ;;  %8095 = vmatprep.mubr.bf16.mxu1 %v5716_v21 }
 0x3b7   : > { %v5613_v60 = vadd.f32 %v8169_v38, %v10077_v37  ;;  %8096 = vmatmul.mubr.bf16.gmra.mrb[120].mxu1 %v5717_v26  ;;  %v5680_v3 = vmax.f32 %v5612_v32, 0.0 }
 0x3b8   : > { %v5611_v14 = vadd.f32 %v8170_v44, %v10077_v37  ;;  %v5678_v2 = vmax.f32 %v5610_v25, 0.0 }
 0x3b9   : > { %v5681_v50 = vmax.f32 %v5613_v60, 0.0 }
 0x3ba   : > { %v5679_v29 = vmax.f32 %v5611_v14, 0.0  ;;  %v8021_v24 = vpop.f32.mrb[60].mxu0 }
 0x3bb   : > { %v8171_v54 = vadd.f32 %v8021_v24, %v10881_v15  ;;  %v5448_v0 = vpop.f32.mrb[61].mxu0  ;;  %v5719_v5 = vpack.c.bf16 %v5681_v50, %v5680_v3 }
 0x3bc   : > { %v8172_v33 = vadd.f32 %v5448_v0, %v10882_v7  ;;  %v8022_v9 = vpop.f32.mrb[62].mxu0  ;;  %v5718_v28 = vpack.c.bf16 %v5679_v29, %v5678_v2 }
 0x3bd   : > { %v5616_v39 = vadd.f32 %v8171_v54, %v10077_v37  ;;  %v8173_v36 = vadd.f32 %v8022_v9, %v10883_v17  ;;  %v5451_v62 = vpop.f32.mrb[63].mxu0 }
 0x3be   : > { %v5614_v51 = vadd.f32 %v8172_v33, %v10077_v37  ;;  %v8174_v20 = vadd.f32 %v5451_v62, %v10884_v47  ;;  %8099 = vmatprep.mubr.bf16.mxu1 %v5718_v28 }
 0x3bf   : > { %v5617_v40 = vadd.f32 %v8173_v36, %v10077_v37  ;;  %8100 = vmatmul.mubr.bf16.gmra.mrb[124].mxu1 %v5719_v5  ;;  %v5684_v10 = vmax.f32 %v5616_v39, 0.0 }
 0x3c0   : > { %v5615_v35 = vadd.f32 %v8174_v20, %v10077_v37  ;;  %v5682_v56 = vmax.f32 %v5614_v51, 0.0  ;;  %v6100_v51 = vlaneseq }
 0x3c1   : > { %v5685_v13 = vmax.f32 %v5617_v40, 0.0 }
 0x3c2   : > { %v5683_v45 = vmax.f32 %v5615_v35, 0.0  ;;  %v8025_v49 = vpop.f32.mrb[64].mxu0 }
 0x3c3   : > { %v8175_v23 = vadd.f32 %v8025_v49, %v10885_v22  ;;  %v5464_v30 = vpop.f32.mrb[65].mxu0  ;;  %v5721_v42 = vpack.c.bf16 %v5685_v13, %v5684_v10 }
 0x3c4   : > { %v8176_v31 = vadd.f32 %v5464_v30, %v10886_v48  ;;  %v8026_v57 = vpop.f32.mrb[66].mxu0  ;;  %v5720_v4 = vpack.c.bf16 %v5683_v45, %v5682_v56  ;;  %v6101_v30 = vand.u32 127, %v6100_v51 }
 0x3c5   : > { %v5620_v61 = vadd.f32 %v8175_v23, %v10077_v37  ;;  %v8177_v41 = vadd.f32 %v8026_v57, %v10887_v6  ;;  %v5467_v8 = vpop.f32.mrb[67].mxu0 }
 0x3c6   : > { %v5618_v63 = vadd.f32 %v8176_v31, %v10077_v37  ;;  %v8178_v18 = vadd.f32 %v5467_v8, %v10888_v16  ;;  %8103 = vmatprep.mubr.bf16.mxu1 %v5720_v4  ;;  %vm6102_vm1 = vcmp.ge.s32.totalorder %v6101_v30, 54  ;;  %vm6103_vm2 = vcmp.lt.s32.totalorder %v6101_v30, 63 }
 0x3c7   : > { %v5621_v52 = vadd.f32 %v8177_v41, %v10077_v37  ;;  %8104 = vmatmul.mubr.bf16.gmra.mrb[128].mxu1 %v5721_v42  ;;  %v5688_v55 = vmax.f32 %v5620_v61, 0.0  ;;  %vm10280_vm3 = vmand %vm6102_vm1, %vm6103_vm2 }
 0x3c8   : > { %v5619_v46 = vadd.f32 %v8178_v18, %v10077_v37  ;;  %v5686_v58 = vmax.f32 %v5618_v63, 0.0 }
 0x3c9   : > { %v5689_v12 = vmax.f32 %v5621_v52, 0.0 }
 0x3ca   : > { %v5687_v11 = vmax.f32 %v5619_v46, 0.0 }
 0x3cb   : > { %v5723_v43 = vpack.c.bf16 %v5689_v12, %v5688_v55 }
 0x3cc   : > { %v5722_v26 = vpack.c.bf16 %v5687_v11, %v5686_v58 }
 0x3ce   : > { %8107 = vmatprep.mubr.bf16.mxu1 %v5722_v26 }
 0x3cf   : > { %8108 = vmatmul.mubr.bf16.gmra.mrb[132].mxu1 %v5723_v43 }
 0x422   : > { %v8045_v19 = vpop.f32.mrb[68].mxu1 }
 0x423   : > { %v10221_v27 = vadd.f32 %v8045_v19, %v10218_v59  ;;  %v5829_v21 = vpop.f32.mrb[69].mxu1 }
 0x424   : > { %v10224_v37 = vadd.f32 %v10218_v59, %v5829_v21  ;;  %v8046_v32 = vpop.f32.mrb[70].mxu1 }
 0x425   : > { %v6107_v53 = vsub.f32 0.0, %v10221_v27  ;;  %v10228_v38 = vadd.f32 %v8046_v32, %v10218_v59  ;;  %v5832_v1 = vpop.f32.mrb[71].mxu1 }
 0x426   : > { %v6105_v25 = vsub.f32 0.0, %v10224_v37  ;;  %v10232_v34 = vadd.f32 %v10218_v59, %v5832_v1 }
 0x427   : > { %v6177_v44 = vmul.f32 1.442695, %v6107_v53  ;;  %v6108_v60 = vsub.f32 0.0, %v10228_v38 }
 0x428   : > { %v6173_v14 = vmul.f32 1.442695, %v6105_v25  ;;  %v6106_v3 = vsub.f32 0.0, %v10232_v34 }
 0x429   : > { %8746 = vpow2.f32 %v6177_v44  ;;  %v6179_v50 = vmul.f32 1.442695, %v6108_v60 }
 0x42a   : > { %8748 = vpow2.f32 %v6173_v14  ;;  %v6175_v2 = vmul.f32 1.442695, %v6106_v3  ;;  %v8049_v29 = vpop.f32.mrb[72].mxu1 }
 0x42b   : > { %8750 = vpow2.f32 %v6179_v50  ;;  %v10237_v24 = vadd.f32 %v8049_v29, %v10218_v59  ;;  %v5845_v15 = vpop.f32.mrb[73].mxu1 }
 0x42c   : > { %8752 = vpow2.f32 %v6175_v2  ;;  %v10240_v54 = vadd.f32 %v10218_v59, %v5845_v15  ;;  %v8050_v0 = vpop.f32.mrb[74].mxu1 }
 0x42d   : > { %v6111_v5 = vsub.f32 0.0, %v10237_v24  ;;  %v10244_v7 = vadd.f32 %v8050_v0, %v10218_v59  ;;  %v5848_v33 = vpop.f32.mrb[75].mxu1 }
 0x42e   : > { %v6109_v9 = vsub.f32 0.0, %v10240_v54  ;;  %v10248_v28 = vadd.f32 %v10218_v59, %v5848_v33 }
 0x42f   : > { %v6185_v39 = vmul.f32 1.442695, %v6111_v5  ;;  %v6112_v17 = vsub.f32 0.0, %v10244_v7 }
 0x430   : > { %v6181_v36 = vmul.f32 1.442695, %v6109_v9  ;;  %v6110_v62 = vsub.f32 0.0, %v10248_v28 }
 0x431   : > { %8754 = vpow2.f32 %v6185_v39  ;;  %v6187_v47 = vmul.f32 1.442695, %v6112_v17 }
 0x432   : > { %8756 = vpow2.f32 %v6181_v36  ;;  %v6183_v20 = vmul.f32 1.442695, %v6110_v62  ;;  %v8053_v40 = vpop.f32.mrb[76].mxu1 }
 0x433   : > { %v8747_v35 = vpop.eup %8746  ;;  %8758 = vpow2.f32 %v6187_v47  ;;  %v10253_v10 = vadd.f32 %v8053_v40, %v10218_v59  ;;  %v5861_v13 = vpop.f32.mrb[77].mxu1 }
 0x434   : > { %v8749_v56 = vpop.eup %8748  ;;  %v6311_v45 = vadd.f32 1.0, %v8747_v35  ;;  %8760 = vpow2.f32 %v6183_v20  ;;  %v10256_v49 = vadd.f32 %v10218_v59, %v5861_v13  ;;  %v8054_v22 = vpop.f32.mrb[78].mxu1 }
 0x435   : > { %v8751_v23 = vpop.eup %8750  ;;  %v6309_v42 = vadd.f32 1.0, %v8749_v56  ;;  %v6115_v48 = vsub.f32 0.0, %v10253_v10  ;;  %v10260_v31 = vadd.f32 %v8054_v22, %v10218_v59  ;;  %v5864_v57 = vpop.f32.mrb[79].mxu1 }
 0x436   : > { %v8753_v4 = vpop.eup %8752  ;;  %8762 = vrcp.f32 %v6311_v45  ;;  %v6312_v61 = vadd.f32 1.0, %v8751_v23  ;;  %v6113_v6 = vsub.f32 0.0, %v10256_v49  ;;  %v10264_v41 = vadd.f32 %v10218_v59, %v5864_v57 }
 0x437   : > { %8764 = vrcp.f32 %v6309_v42  ;;  %v6310_v8 = vadd.f32 1.0, %v8753_v4  ;;  %v6193_v63 = vmul.f32 1.442695, %v6115_v48  ;;  %v6116_v16 = vsub.f32 0.0, %v10260_v31 }
 0x438   : > { %8766 = vrcp.f32 %v6312_v61  ;;  %v6189_v18 = vmul.f32 1.442695, %v6113_v6  ;;  %v6114_v52 = vsub.f32 0.0, %v10264_v41 }
 0x439   : > { %8768 = vrcp.f32 %v6310_v8  ;;  %v6195_v46 = vmul.f32 1.442695, %v6116_v16 }
 0x43a   : > { %8770 = vpow2.f32 %v6193_v63  ;;  %v6191_v55 = vmul.f32 1.442695, %v6114_v52  ;;  %v8057_v12 = vpop.f32.mrb[80].mxu1 }
 0x43b   : > { %v8755_v58 = vpop.eup %8754  ;;  %8772 = vpow2.f32 %v6189_v18  ;;  %v10269_v11 = vadd.f32 %v8057_v12, %v10218_v59  ;;  %v5877_v43 = vpop.f32.mrb[81].mxu1 }
 0x43c   : > { %v8757_v26 = vpop.eup %8756  ;;  %v6315_v19 = vadd.f32 1.0, %v8755_v58  ;;  %8774 = vpow2.f32 %v6195_v46  ;;  %v10272_v21 = vadd.f32 %v10218_v59, %v5877_v43  ;;  %v8058_v32 = vpop.f32.mrb[82].mxu1 }
 0x43d   : > { %v8759_v53 = vpop.eup %8758  ;;  %v6313_v1 = vadd.f32 1.0, %v8757_v26  ;;  %8776 = vpow2.f32 %v6191_v55  ;;  %v6119_v25 = vsub.f32 0.0, %v10269_v11  ;;  %v10276_v44 = vadd.f32 %v8058_v32, %v10218_v59  ;;  %v5880_v60 = vpop.f32.mrb[83].mxu1 }
 0x43e   : > { %v8761_v14 = vpop.eup %8760  ;;  %8778 = vrcp.f32 %v6315_v19  ;;  %v6316_v50 = vadd.f32 1.0, %v8759_v53  ;;  %v6117_v2 = vsub.f32 0.0, %v10272_v21  ;;  %v10286_v29 = vadd.f32 %v10218_v59, %v5880_v60 }
 0x43f   : > { %8780 = vrcp.f32 %v6313_v1  ;;  %v6314_v15 = vadd.f32 1.0, %v8761_v14  ;;  %v6201_v0 = vmul.f32 1.442695, %v6119_v25  ;;  %v6120_v5 = vsub.f32 0.0, %v10276_v44 }
 0x440   : > { %v8763_v33 = vpop.eup %8762  ;;  %8782 = vrcp.f32 %v6316_v50  ;;  %v6197_v9 = vmul.f32 1.442695, %v6117_v2  ;;  %v6118_v39 = vsub.f32 0.0, %v10286_v29 }
 0x441   : > { %v8765_v17 = vpop.eup %8764  ;;  %v6447_v36 = vsel %vm10280_vm3, %v8763_v33, %v10221_v27  ;;  %8784 = vrcp.f32 %v6314_v15  ;;  %v6203_v62 = vmul.f32 1.442695, %v6120_v5 }
 0x442   : > { %v8767_v51 = vpop.eup %8766  ;;  %6515 = vst [vmem:[%s9311_s10 + $0x10] sm:$0xff] %v6447_v36  ;;  %v6445_v47 = vsel %vm10280_vm3, %v8765_v17, %v10224_v37  ;;  %8786 = vpow2.f32 %v6201_v0  ;;  %v6199_v20 = vmul.f32 1.442695, %v6118_v39  ;;  %v8061_v40 = vpop.f32.mrb[84].mxu1 }
 0x443   : > { %v8769_v35 = vpop.eup %8768  ;;  %6513 = vst [vmem:[%s9311_s10] sm:$0xff] %v6445_v47  ;;  %v6448_v13 = vsel %vm10280_vm3, %v8767_v51, %v10228_v38  ;;  %8788 = vpow2.f32 %v6197_v9  ;;  %v10302_v27 = vadd.f32 %v8061_v40, %v10218_v59  ;;  %v5893_v56 = vpop.f32.mrb[85].mxu1 }
 0x444   : > { %v8771_v45 = vpop.eup %8770  ;;  %6516 = vst [vmem:[%s9311_s10 + $0x18] sm:$0xff] %v6448_v13  ;;  %v6446_v37 = vsel %vm10280_vm3, %v8769_v35, %v10232_v34  ;;  %8790 = vpow2.f32 %v6203_v62  ;;  %v10309_v22 = vadd.f32 %v10218_v59, %v5893_v56  ;;  %v8062_v23 = vpop.f32.mrb[86].mxu1 }
 0x445   : > { %v8773_v30 = vpop.eup %8772  ;;  %6514 = vst [vmem:[%s9311_s10 + $0x8] sm:$0xff] %v6446_v37  ;;  %v6319_v42 = vadd.f32 1.0, %v8771_v45  ;;  %8792 = vpow2.f32 %v6199_v20  ;;  %v6123_v38 = vsub.f32 0.0, %v10302_v27  ;;  %v10314_v48 = vadd.f32 %v8062_v23, %v10218_v59  ;;  %v5896_v57 = vpop.f32.mrb[87].mxu1 }
 0x446   : > { %v8775_v4 = vpop.eup %8774  ;;  %v6317_v61 = vadd.f32 1.0, %v8773_v30  ;;  %v6121_v6 = vsub.f32 0.0, %v10309_v22  ;;  %v10318_v34 = vadd.f32 %v10218_v59, %v5896_v57 }
 0x447   : > { %v8777_v8 = vpop.eup %8776  ;;  %8794 = vrcp.f32 %v6319_v42  ;;  %v6320_v63 = vadd.f32 1.0, %v8775_v4  ;;  %v6209_v16 = vmul.f32 1.442695, %v6123_v38  ;;  %v6124_v18 = vsub.f32 0.0, %v10314_v48 }
 0x448   : > { %v8779_v52 = vpop.eup %8778  ;;  %8796 = vrcp.f32 %v6317_v61  ;;  %v6318_v46 = vadd.f32 1.0, %v8777_v8  ;;  %v6205_v55 = vmul.f32 1.442695, %v6121_v6  ;;  %v6122_v12 = vsub.f32 0.0, %v10318_v34 }
 0x449   : > { %v8781_v58 = vpop.eup %8780  ;;  %v6451_v43 = vsel %vm10280_vm3, %v8779_v52, %v10237_v24  ;;  %8798 = vrcp.f32 %v6320_v63  ;;  %v6211_v26 = vmul.f32 1.442695, %v6124_v18 }
 0x44a   : > { %v8783_v19 = vpop.eup %8782  ;;  %6519 = vst [vmem:[%s9311_s10 + $0x30] sm:$0xff] %v6451_v43  ;;  %v6449_v32 = vsel %vm10280_vm3, %v8781_v58, %v10240_v54  ;;  %8800 = vrcp.f32 %v6318_v46  ;;  %v6207_v53 = vmul.f32 1.442695, %v6122_v12  ;;  %v8065_v1 = vpop.f32.mrb[88].mxu1 }
 0x44b   : > { %v8785_v25 = vpop.eup %8784  ;;  %6517 = vst [vmem:[%s9311_s10 + $0x20] sm:$0xff] %v6449_v32  ;;  %v6452_v60 = vsel %vm10280_vm3, %v8783_v19, %v10244_v7  ;;  %8802 = vpow2.f32 %v6209_v16  ;;  %v10334_v24 = vadd.f32 %v8065_v1, %v10218_v59  ;;  %v5909_v14 = vpop.f32.mrb[89].mxu1 }
 0x44c   : > { %v8787_v50 = vpop.eup %8786  ;;  %6520 = vst [vmem:[%s9311_s10 + $0x38] sm:$0xff] %v6452_v60  ;;  %v6450_v54 = vsel %vm10280_vm3, %v8785_v25, %v10248_v28  ;;  %8804 = vpow2.f32 %v6205_v55  ;;  %v10341_v2 = vadd.f32 %v10218_v59, %v5909_v14  ;;  %v8066_v15 = vpop.f32.mrb[90].mxu1 }
 0x44d   : > { %v8789_v0 = vpop.eup %8788  ;;  %6518 = vst [vmem:[%s9311_s10 + $0x28] sm:$0xff] %v6450_v54  ;;  %v6323_v5 = vadd.f32 1.0, %v8787_v50  ;;  %8806 = vpow2.f32 %v6211_v26  ;;  %v6127_v7 = vsub.f32 0.0, %v10334_v24  ;;  %v10346_v33 = vadd.f32 %v8066_v15, %v10218_v59  ;;  %v5912_v9 = vpop.f32.mrb[91].mxu1 }
 0x44e   : > { %v8791_v39 = vpop.eup %8790  ;;  %v6321_v17 = vadd.f32 1.0, %v8789_v0  ;;  %8808 = vpow2.f32 %v6207_v53  ;;  %v6125_v28 = vsub.f32 0.0, %v10341_v2  ;;  %v10350_v36 = vadd.f32 %v10218_v59, %v5912_v9 }
 0x44f   : > { %v8793_v62 = vpop.eup %8792  ;;  %8810 = vrcp.f32 %v6323_v5  ;;  %v6324_v51 = vadd.f32 1.0, %v8791_v39  ;;  %v6217_v47 = vmul.f32 1.442695, %v6127_v7  ;;  %v6128_v20 = vsub.f32 0.0, %v10346_v33 }
 0x450   : > { %8812 = vrcp.f32 %v6321_v17  ;;  %v6322_v40 = vadd.f32 1.0, %v8793_v62  ;;  %v6213_v35 = vmul.f32 1.442695, %v6125_v28  ;;  %v6126_v13 = vsub.f32 0.0, %v10350_v36 }
 0x451   : > { %v8795_v56 = vpop.eup %8794  ;;  %8814 = vrcp.f32 %v6324_v51  ;;  %v6219_v45 = vmul.f32 1.442695, %v6128_v20 }
 0x452   : > { %v8797_v37 = vpop.eup %8796  ;;  %v6455_v23 = vsel %vm10280_vm3, %v8795_v56, %v10253_v10  ;;  %8816 = vrcp.f32 %v6322_v40  ;;  %v6215_v30 = vmul.f32 1.442695, %v6126_v13  ;;  %v8069_v42 = vpop.f32.mrb[92].mxu1 }
 0x453   : > { %v8799_v38 = vpop.eup %8798  ;;  %6523 = vst [vmem:[%s9311_s10 + $0x50] sm:$0xff] %v6455_v23  ;;  %v6453_v57 = vsel %vm10280_vm3, %v8797_v37, %v10256_v49  ;;  %8818 = vpow2.f32 %v6217_v47  ;;  %v10362_v4 = vadd.f32 %v8069_v42, %v10218_v59  ;;  %v5925_v61 = vpop.f32.mrb[93].mxu1 }
 0x454   : > { %v8801_v6 = vpop.eup %8800  ;;  %6521 = vst [vmem:[%s9311_s10 + $0x40] sm:$0xff] %v6453_v57  ;;  %v6456_v10 = vsel %vm10280_vm3, %v8799_v38, %v10260_v31  ;;  %8820 = vpow2.f32 %v6213_v35  ;;  %v10369_v8 = vadd.f32 %v10218_v59, %v5925_v61  ;;  %v8070_v63 = vpop.f32.mrb[94].mxu1 }
 0x455   : > { %v8803_v16 = vpop.eup %8802  ;;  %6524 = vst [vmem:[%s9311_s10 + $0x58] sm:$0xff] %v6456_v10  ;;  %v6454_v49 = vsel %vm10280_vm3, %v8801_v6, %v10264_v41  ;;  %8822 = vpow2.f32 %v6219_v45  ;;  %v6131_v18 = vsub.f32 0.0, %v10362_v4  ;;  %v10377_v52 = vadd.f32 %v8070_v63, %v10218_v59  ;;  %v5928_v46 = vpop.f32.mrb[95].mxu1 }
 0x456   : > { %v8805_v55 = vpop.eup %8804  ;;  %6522 = vst [vmem:[%s9311_s10 + $0x48] sm:$0xff] %v6454_v49  ;;  %v6327_v31 = vadd.f32 1.0, %v8803_v16  ;;  %8824 = vpow2.f32 %v6215_v30  ;;  %v6129_v12 = vsub.f32 0.0, %v10369_v8  ;;  %v10382_v58 = vadd.f32 %v10218_v59, %v5928_v46 }
 0x457   : > { %v8807_v43 = vpop.eup %8806  ;;  %v6325_v26 = vadd.f32 1.0, %v8805_v55  ;;  %v6132_v41 = vsub.f32 0.0, %v10377_v52  ;;  %v6225_v53 = vmul.f32 1.442695, %v6131_v18 }
 0x458   : > { %v8809_v19 = vpop.eup %8808  ;;  %8826 = vrcp.f32 %v6327_v31  ;;  %v6328_v32 = vadd.f32 1.0, %v8807_v43  ;;  %v6130_v1 = vsub.f32 0.0, %v10382_v58  ;;  %v6221_v14 = vmul.f32 1.442695, %v6129_v12 }
 0x459   : > { %v8811_v25 = vpop.eup %8810  ;;  %8828 = vrcp.f32 %v6325_v26  ;;  %v6326_v60 = vadd.f32 1.0, %v8809_v19  ;;  %v6227_v15 = vmul.f32 1.442695, %v6132_v41 }
 0x45a   : > { %v8813_v50 = vpop.eup %8812  ;;  %v6459_v54 = vsel %vm10280_vm3, %v8811_v25, %v10269_v11  ;;  %8830 = vrcp.f32 %v6328_v32  ;;  %v8073_v0 = vpop.f32.mrb[96].mxu1  ;;  %v6223_v9 = vmul.f32 1.442695, %v6130_v1 }
 0x45b   : > { %v8815_v5 = vpop.eup %8814  ;;  %6527 = vst [vmem:[%s9311_s10 + $0x70] sm:$0xff] %v6459_v54  ;;  %v6457_v7 = vsel %vm10280_vm3, %v8813_v50, %v10272_v21  ;;  %8832 = vrcp.f32 %v6326_v60  ;;  %v10394_v39 = vadd.f32 %v8073_v0, %v10218_v59  ;;  %v5941_v17 = vpop.f32.mrb[97].mxu1 }
 0x45c   : > { %v8817_v28 = vpop.eup %8816  ;;  %6525 = vst [vmem:[%s9311_s10 + $0x60] sm:$0xff] %v6457_v7  ;;  %v6460_v11 = vsel %vm10280_vm3, %v8815_v5, %v10276_v44  ;;  %8834 = vpow2.f32 %v6225_v53  ;;  %v10401_v62 = vadd.f32 %v10218_v59, %v5941_v17  ;;  %v8074_v51 = vpop.f32.mrb[98].mxu1 }
 0x45d   : > { %v8819_v47 = vpop.eup %8818  ;;  %6528 = vst [vmem:[%s9311_s10 + $0x78] sm:$0xff] %v6460_v11  ;;  %v6458_v21 = vsel %vm10280_vm3, %v8817_v28, %v10286_v29  ;;  %8836 = vpow2.f32 %v6221_v14  ;;  %v6135_v20 = vsub.f32 0.0, %v10394_v39  ;;  %v10409_v40 = vadd.f32 %v8074_v51, %v10218_v59  ;;  %v5944_v35 = vpop.f32.mrb[99].mxu1 }
 0x45e   : > { %v8821_v13 = vpop.eup %8820  ;;  %6526 = vst [vmem:[%s9311_s10 + $0x68] sm:$0xff] %v6458_v21  ;;  %v6331_v44 = vadd.f32 1.0, %v8819_v47  ;;  %8838 = vpow2.f32 %v6227_v15  ;;  %v6133_v56 = vsub.f32 0.0, %v10401_v62  ;;  %v10414_v45 = vadd.f32 %v10218_v59, %v5944_v35 }
 0x45f   : > { %v8823_v37 = vpop.eup %8822  ;;  %v6329_v23 = vadd.f32 1.0, %v8821_v13  ;;  %8840 = vpow2.f32 %v6223_v9  ;;  %v6136_v29 = vsub.f32 0.0, %v10409_v40  ;;  %v6233_v38 = vmul.f32 1.442695, %v6135_v20 }
 0x460   : > { %v8825_v30 = vpop.eup %8824  ;;  %8842 = vrcp.f32 %v6331_v44  ;;  %v6332_v42 = vadd.f32 1.0, %v8823_v37  ;;  %v6134_v57 = vsub.f32 0.0, %v10414_v45  ;;  %v6229_v6 = vmul.f32 1.442695, %v6133_v56 }
 0x461   : > { %8844 = vrcp.f32 %v6329_v23  ;;  %v6330_v61 = vadd.f32 1.0, %v8825_v30  ;;  %v6235_v63 = vmul.f32 1.442695, %v6136_v29 }
 0x462   : > { %v8827_v10 = vpop.eup %8826  ;;  %8846 = vrcp.f32 %v6332_v42  ;;  %v8077_v16 = vpop.f32.mrb[100].mxu1  ;;  %v6231_v46 = vmul.f32 1.442695, %v6134_v57 }
 0x463   : > { %v8829_v49 = vpop.eup %8828  ;;  %v6463_v18 = vsel %vm10280_vm3, %v8827_v10, %v10302_v27  ;;  %8848 = vrcp.f32 %v6330_v61  ;;  %v10422_v55 = vadd.f32 %v8077_v16, %v10218_v59  ;;  %v5957_v31 = vpop.f32.mrb[101].mxu1 }
 0x464   : > { %v8831_v12 = vpop.eup %8830  ;;  %6531 = vst [vmem:[%s9311_s10 + $0x90] sm:$0xff] %v6463_v18  ;;  %v6461_v43 = vsel %vm10280_vm3, %v8829_v49, %v10309_v22  ;;  %8850 = vpow2.f32 %v6233_v38  ;;  %v10429_v26 = vadd.f32 %v10218_v59, %v5957_v31  ;;  %v8078_v41 = vpop.f32.mrb[102].mxu1 }
 0x465   : > { %v8833_v27 = vpop.eup %8832  ;;  %6529 = vst [vmem:[%s9311_s10 + $0x80] sm:$0xff] %v6461_v43  ;;  %v6464_v19 = vsel %vm10280_vm3, %v8831_v12, %v10314_v48  ;;  %8852 = vpow2.f32 %v6229_v6  ;;  %v6139_v32 = vsub.f32 0.0, %v10422_v55  ;;  %v10437_v53 = vadd.f32 %v8078_v41, %v10218_v59  ;;  %v5960_v1 = vpop.f32.mrb[103].mxu1 }
 0x466   : > { %v8835_v22 = vpop.eup %8834  ;;  %6532 = vst [vmem:[%s9311_s10 + $0x98] sm:$0xff] %v6464_v19  ;;  %v6462_v25 = vsel %vm10280_vm3, %v8833_v27, %v10318_v34  ;;  %8854 = vpow2.f32 %v6235_v63  ;;  %v6137_v60 = vsub.f32 0.0, %v10429_v26  ;;  %v10445_v14 = vadd.f32 %v10218_v59, %v5960_v1 }
 0x467   : > { %v8837_v48 = vpop.eup %8836  ;;  %6530 = vst [vmem:[%s9311_s10 + $0x88] sm:$0xff] %v6462_v25  ;;  %v6335_v50 = vadd.f32 1.0, %v8835_v22  ;;  %8856 = vpow2.f32 %v6231_v46  ;;  %v6140_v54 = vsub.f32 0.0, %v10437_v53  ;;  %v6241_v9 = vmul.f32 1.442695, %v6139_v32 }
 0x468   : > { %v8839_v15 = vpop.eup %8838  ;;  %v6333_v0 = vadd.f32 1.0, %v8837_v48  ;;  %v6138_v5 = vsub.f32 0.0, %v10445_v14  ;;  %v6237_v11 = vmul.f32 1.442695, %v6137_v60 }
 0x469   : > { %v8841_v7 = vpop.eup %8840  ;;  %8858 = vrcp.f32 %v6335_v50  ;;  %v6336_v34 = vadd.f32 1.0, %v8839_v15  ;;  %v6243_v20 = vmul.f32 1.442695, %v6140_v54 }
 0x46a   : > { %v8843_v17 = vpop.eup %8842  ;;  %8860 = vrcp.f32 %v6333_v0  ;;  %v6334_v28 = vadd.f32 1.0, %v8841_v7  ;;  %v8081_v51 = vpop.f32.mrb[104].mxu1  ;;  %v6239_v37 = vmul.f32 1.442695, %v6138_v5 }
 0x46b   : > { %v8845_v47 = vpop.eup %8844  ;;  %v6467_v21 = vsel %vm10280_vm3, %v8843_v17, %v10334_v24  ;;  %8862 = vrcp.f32 %v6336_v34  ;;  %v10454_v35 = vadd.f32 %v8081_v51, %v10218_v59  ;;  %v5973_v13 = vpop.f32.mrb[105].mxu1 }
 0x46c   : > { %v8847_v44 = vpop.eup %8846  ;;  %6535 = vst [vmem:[%s9311_s10 + $0xb0] sm:$0xff] %v6467_v21  ;;  %v6465_v56 = vsel %vm10280_vm3, %v8845_v47, %v10341_v2  ;;  %8864 = vrcp.f32 %v6334_v28  ;;  %v10461_v23 = vadd.f32 %v10218_v59, %v5973_v13  ;;  %v8082_v24 = vpop.f32.mrb[106].mxu1 }
 0x46d   : > { %v8849_v29 = vpop.eup %8848  ;;  %6533 = vst [vmem:[%s9311_s10 + $0xa0] sm:$0xff] %v6465_v56  ;;  %v6468_v30 = vsel %vm10280_vm3, %v8847_v44, %v10346_v33  ;;  %8866 = vpow2.f32 %v6241_v9  ;;  %v6143_v42 = vsub.f32 0.0, %v10454_v35  ;;  %v10469_v38 = vadd.f32 %v8082_v24, %v10218_v59  ;;  %v5976_v2 = vpop.f32.mrb[107].mxu1 }
 0x46e   : > { %v8851_v57 = vpop.eup %8850  ;;  %6536 = vst [vmem:[%s9311_s10 + $0xb8] sm:$0xff] %v6468_v30  ;;  %v6466_v61 = vsel %vm10280_vm3, %v8849_v29, %v10350_v36  ;;  %8868 = vpow2.f32 %v6237_v11  ;;  %v6141_v6 = vsub.f32 0.0, %v10461_v23  ;;  %v10477_v10 = vadd.f32 %v10218_v59, %v5976_v2 }
 0x46f   : > { %v8853_v33 = vpop.eup %8852  ;;  %6534 = vst [vmem:[%s9311_s10 + $0xa8] sm:$0xff] %v6466_v61  ;;  %v6339_v63 = vadd.f32 1.0, %v8851_v57  ;;  %8870 = vpow2.f32 %v6243_v20  ;;  %v6144_v16 = vsub.f32 0.0, %v10469_v38  ;;  %v6249_v12 = vmul.f32 1.442695, %v6143_v42 }
 0x470   : > { %v8855_v49 = vpop.eup %8854  ;;  %v6337_v18 = vadd.f32 1.0, %v8853_v33  ;;  %8872 = vpow2.f32 %v6239_v37  ;;  %v6142_v46 = vsub.f32 0.0, %v10477_v10  ;;  %v6245_v41 = vmul.f32 1.442695, %v6141_v6 }
 0x471   : > { %v8857_v31 = vpop.eup %8856  ;;  %8874 = vrcp.f32 %v6339_v63  ;;  %v6340_v36 = vadd.f32 1.0, %v8855_v49  ;;  %v6251_v32 = vmul.f32 1.442695, %v6144_v16 }
 0x472   : > { %8876 = vrcp.f32 %v6337_v18  ;;  %v6338_v43 = vadd.f32 1.0, %v8857_v31  ;;  %v8085_v27 = vpop.f32.mrb[108].mxu1  ;;  %v6247_v48 = vmul.f32 1.442695, %v6142_v46 }
 0x473   : > { %v8859_v19 = vpop.eup %8858  ;;  %8878 = vrcp.f32 %v6340_v36  ;;  %v10483_v1 = vadd.f32 %v8085_v27, %v10218_v59  ;;  %v5989_v22 = vpop.f32.mrb[109].mxu1 }
 0x474   : > { %v8861_v25 = vpop.eup %8860  ;;  %v6471_v60 = vsel %vm10280_vm3, %v8859_v19, %v10362_v4  ;;  %8880 = vrcp.f32 %v6338_v43  ;;  %v10489_v50 = vadd.f32 %v10218_v59, %v5989_v22  ;;  %v8086_v54 = vpop.f32.mrb[110].mxu1 }
 0x475   : > { %v8863_v15 = vpop.eup %8862  ;;  %6539 = vst [vmem:[%s9311_s10 + $0xd0] sm:$0xff] %v6471_v60  ;;  %v6469_v0 = vsel %vm10280_vm3, %v8861_v25, %v10369_v8  ;;  %8882 = vpow2.f32 %v6249_v12  ;;  %v6147_v5 = vsub.f32 0.0, %v10483_v1  ;;  %v10497_v7 = vadd.f32 %v8086_v54, %v10218_v59  ;;  %v5992_v4 = vpop.f32.mrb[111].mxu1 }
 0x476   : > { %v8865_v34 = vpop.eup %8864  ;;  %6537 = vst [vmem:[%s9311_s10 + $0xc0] sm:$0xff] %v6469_v0  ;;  %v6472_v9 = vsel %vm10280_vm3, %v8863_v15, %v10377_v52  ;;  %8884 = vpow2.f32 %v6245_v41  ;;  %v6145_v17 = vsub.f32 0.0, %v10489_v50  ;;  %v10505_v28 = vadd.f32 %v10218_v59, %v5992_v4 }
 0x477   : > { %v8867_v8 = vpop.eup %8866  ;;  %6540 = vst [vmem:[%s9311_s10 + $0xd8] sm:$0xff] %v6472_v9  ;;  %v6470_v11 = vsel %vm10280_vm3, %v8865_v34, %v10382_v58  ;;  %8886 = vpow2.f32 %v6251_v32  ;;  %v6257_v51 = vmul.f32 1.442695, %v6147_v5  ;;  %v6148_v47 = vsub.f32 0.0, %v10497_v7 }
 0x478   : > { %v8869_v21 = vpop.eup %8868  ;;  %6538 = vst [vmem:[%s9311_s10 + $0xc8] sm:$0xff] %v6470_v11  ;;  %v6343_v20 = vadd.f32 1.0, %v8867_v8  ;;  %8888 = vpow2.f32 %v6247_v48  ;;  %v6146_v52 = vsub.f32 0.0, %v10505_v28  ;;  %v6253_v24 = vmul.f32 1.442695, %v6145_v17 }
 0x479   : > { %v8871_v13 = vpop.eup %8870  ;;  %v6341_v44 = vadd.f32 1.0, %v8869_v21  ;;  %8890 = vpow2.f32 %v6257_v51  ;;  %v6259_v42 = vmul.f32 1.442695, %v6148_v47 }
 0x47a   : > { %v8873_v56 = vpop.eup %8872  ;;  %8892 = vrcp.f32 %v6343_v20  ;;  %v6344_v37 = vadd.f32 1.0, %v8871_v13  ;;  %v8089_v29 = vpop.f32.mrb[112].mxu1  ;;  %v6255_v33 = vmul.f32 1.442695, %v6146_v52 }
 0x47b   : > { %v8875_v58 = vpop.eup %8874  ;;  %8894 = vrcp.f32 %v6341_v44  ;;  %v6342_v30 = vadd.f32 1.0, %v8873_v56  ;;  %v10515_v2 = vadd.f32 %v8089_v29, %v10218_v59  ;;  %v6005_v57 = vpop.f32.mrb[113].mxu1 }
 0x47c   : > { %v8877_v61 = vpop.eup %8876  ;;  %v6475_v6 = vsel %vm10280_vm3, %v8875_v58, %v10394_v39  ;;  %8896 = vrcp.f32 %v6344_v37  ;;  %v10521_v63 = vadd.f32 %v10218_v59, %v6005_v57  ;;  %v8090_v16 = vpop.f32.mrb[114].mxu1 }
 0x47d   : > { %v8879_v49 = vpop.eup %8878  ;;  %6543 = vst [vmem:[%s9311_s10 + $0xf0] sm:$0xff] %v6475_v6  ;;  %v6473_v18 = vsel %vm10280_vm3, %v8877_v61, %v10401_v62  ;;  %8898 = vrcp.f32 %v6342_v30  ;;  %v6151_v46 = vsub.f32 0.0, %v10515_v2  ;;  %v10529_v31 = vadd.f32 %v8090_v16, %v10218_v59  ;;  %v6008_v39 = vpop.f32.mrb[115].mxu1 }
 0x47e   : > { %v8881_v36 = vpop.eup %8880  ;;  %6541 = vst [vmem:[%s9311_s10 + $0xe0] sm:$0xff] %v6473_v18  ;;  %v6476_v12 = vsel %vm10280_vm3, %v8879_v49, %v10409_v40  ;;  %8900 = vpow2.f32 %v6253_v24  ;;  %v6149_v43 = vsub.f32 0.0, %v10521_v63  ;;  %v10537_v41 = vadd.f32 %v10218_v59, %v6008_v39 }
 0x47f   : > { %v8883_v62 = vpop.eup %8882  ;;  %6544 = vst [vmem:[%s9311_s10 + $0xf8] sm:$0xff] %v6476_v12  ;;  %v6474_v27 = vsel %vm10280_vm3, %v8881_v36, %v10414_v45  ;;  %8902 = vpow2.f32 %v6259_v42  ;;  %v6265_v19 = vmul.f32 1.442695, %v6151_v46  ;;  %v6152_v32 = vsub.f32 0.0, %v10529_v31 }
 0x480   : > { %v8885_v22 = vpop.eup %8884  ;;  %6542 = vst [vmem:[%s9311_s10 + $0xe8] sm:$0xff] %v6474_v27  ;;  %v6347_v25 = vadd.f32 1.0, %v8883_v62  ;;  %8904 = vpow2.f32 %v6255_v33  ;;  %v6150_v40 = vsub.f32 0.0, %v10537_v41  ;;  %v6261_v0 = vmul.f32 1.442695, %v6149_v43 }
 0x481   : > { %v8887_v60 = vpop.eup %8886  ;;  %v6345_v48 = vadd.f32 1.0, %v8885_v22  ;;  %8906 = vpow2.f32 %v6265_v19  ;;  %v6267_v34 = vmul.f32 1.442695, %v6152_v32 }
 0x482   : > { %v8889_v54 = vpop.eup %8888  ;;  %8908 = vrcp.f32 %v6347_v25  ;;  %v6348_v15 = vadd.f32 1.0, %v8887_v60  ;;  %v8093_v5 = vpop.f32.mrb[116].mxu1  ;;  %v6263_v51 = vmul.f32 1.442695, %v6150_v40 }
 0x483   : > { %v8891_v4 = vpop.eup %8890  ;;  %8910 = vrcp.f32 %v6345_v48  ;;  %v6346_v45 = vadd.f32 1.0, %v8889_v54  ;;  %v10547_v9 = vadd.f32 %v8093_v5, %v10218_v59  ;;  %v6021_v17 = vpop.f32.mrb[117].mxu1  ;;  %v10591_v48 = vld [vmem:[%s10843_s4] ss:$0 sm:$0xff] }
 0x484   : > { %v8893_v8 = vpop.eup %8892  ;;  %8912 = vrcp.f32 %v6348_v15  ;;  %v6351_v11 = vadd.f32 1.0, %v8891_v4  ;;  %v10550_v47 = vadd.f32 %v10218_v59, %v6021_v17  ;;  %v8094_v21 = vpop.f32.mrb[118].mxu1 }
 0x485   : > { %v8895_v20 = vpop.eup %8894  ;;  %v6479_v52 = vsel %vm10280_vm3, %v8893_v8, %v10422_v55  ;;  %8914 = vrcp.f32 %v6346_v45  ;;  %v6155_v13 = vsub.f32 0.0, %v10547_v9  ;;  %v10557_v44 = vadd.f32 %v8094_v21, %v10218_v59  ;;  %v6024_v56 = vpop.f32.mrb[119].mxu1 }
 0x486   : > { %v8897_v37 = vpop.eup %8896  ;;  %6547 = vst [vmem:[%s9311_s10 + $0x110] sm:$0xff] %v6479_v52  ;;  %v6477_v24 = vsel %vm10280_vm3, %v8895_v20, %v10429_v26  ;;  %8916 = vrcp.f32 %v6351_v11  ;;  %v6153_v29 = vsub.f32 0.0, %v10550_v47  ;;  %v10565_v55 = vadd.f32 %v10218_v59, %v6024_v56 }
 0x487   : > { %v8899_v58 = vpop.eup %8898  ;;  %6545 = vst [vmem:[%s9311_s10 + $0x100] sm:$0xff] %v6477_v24  ;;  %v6480_v30 = vsel %vm10280_vm3, %v8897_v37, %v10437_v53  ;;  %8918 = vpow2.f32 %v6261_v0  ;;  %v6273_v42 = vmul.f32 1.442695, %v6155_v13  ;;  %v6156_v57 = vsub.f32 0.0, %v10557_v44 }
 0x488   : > { %v8901_v61 = vpop.eup %8900  ;;  %6548 = vst [vmem:[%s9311_s10 + $0x118] sm:$0xff] %v6480_v30  ;;  %v6478_v26 = vsel %vm10280_vm3, %v8899_v58, %v10445_v14  ;;  %8920 = vpow2.f32 %v6267_v34  ;;  %v6154_v6 = vsub.f32 0.0, %v10565_v55  ;;  %v6269_v53 = vmul.f32 1.442695, %v6153_v29 }
 0x489   : > { %v8903_v33 = vpop.eup %8902  ;;  %6546 = vst [vmem:[%s9311_s10 + $0x108] sm:$0xff] %v6478_v26  ;;  %v6349_v16 = vadd.f32 1.0, %v8901_v61  ;;  %8922 = vpow2.f32 %v6263_v51  ;;  %v6275_v12 = vmul.f32 1.442695, %v6156_v57 }
 0x48a   : > { %v8905_v49 = vpop.eup %8904  ;;  %v6352_v18 = vadd.f32 1.0, %v8903_v33  ;;  %8924 = vpow2.f32 %v6273_v42  ;;  %v8097_v46 = vpop.f32.mrb[120].mxu1  ;;  %v6271_v19 = vmul.f32 1.442695, %v6154_v6 }
 0x48b   : > { %v8907_v39 = vpop.eup %8906  ;;  %8926 = vrcp.f32 %v6349_v16  ;;  %v6350_v36 = vadd.f32 1.0, %v8905_v49  ;;  %v10579_v43 = vadd.f32 %v8097_v46, %v10218_v59  ;;  %v6037_v14 = vpop.f32.mrb[121].mxu1 }
 0x48c   : > { %v8909_v62 = vpop.eup %8908  ;;  %8928 = vrcp.f32 %v6352_v18  ;;  %v6355_v27 = vadd.f32 1.0, %v8907_v39  ;;  %v10582_v32 = vadd.f32 %v10218_v59, %v6037_v14  ;;  %v8098_v22 = vpop.f32.mrb[122].mxu1 }
 0x48d   : > { %v8911_v25 = vpop.eup %8910  ;;  %v6483_v40 = vsel %vm10280_vm3, %v8909_v62, %v10454_v35  ;;  %8930 = vrcp.f32 %v6350_v36  ;;  %v6159_v60 = vsub.f32 0.0, %v10579_v43  ;;  %v10594_v54 = vadd.f32 %v10591_v48, %v8098_v22  ;;  %v6040_v59 = vpop.f32.mrb[123].mxu1 }
 0x48e   : > { %v8913_v15 = vpop.eup %8912  ;;  %6551 = vst [vmem:[%s9311_s10 + $0x130] sm:$0xff] %v6483_v40  ;;  %v6481_v0 = vsel %vm10280_vm3, %v8911_v25, %v10461_v23  ;;  %8932 = vrcp.f32 %v6355_v27  ;;  %v6157_v35 = vsub.f32 0.0, %v10582_v32  ;;  %v10602_v5 = vadd.f32 %v10591_v48, %v6040_v59 }
 0x48f   : > { %v8915_v4 = vpop.eup %8914  ;;  %6549 = vst [vmem:[%s9311_s10 + $0x120] sm:$0xff] %v6481_v0  ;;  %v6484_v45 = vsel %vm10280_vm3, %v8913_v15, %v10469_v38  ;;  %8934 = vpow2.f32 %v6269_v53  ;;  %v6281_v34 = vmul.f32 1.442695, %v6159_v60  ;;  %v6160_v17 = vsub.f32 0.0, %v10594_v54 }
 0x490   : > { %v8917_v8 = vpop.eup %8916  ;;  %6552 = vst [vmem:[%s9311_s10 + $0x138] sm:$0xff] %v6484_v45  ;;  %v6482_v23 = vsel %vm10280_vm3, %v8915_v4, %v10477_v10  ;;  %8936 = vpow2.f32 %v6275_v12  ;;  %v6277_v11 = vmul.f32 1.442695, %v6157_v35  ;;  %v6158_v51 = vsub.f32 0.0, %v10602_v5 }
 0x491   : > { %v8919_v21 = vpop.eup %8918  ;;  %6550 = vst [vmem:[%s9311_s10 + $0x128] sm:$0xff] %v6482_v23  ;;  %v6487_v38 = vsel %vm10280_vm3, %v8917_v8, %v10483_v1  ;;  %8938 = vpow2.f32 %v6271_v19  ;;  %v6283_v10 = vmul.f32 1.442695, %v6160_v17 }
 0x492   : > { %v8921_v20 = vpop.eup %8920  ;;  %6555 = vst [vmem:[%s9311_s10 + $0x150] sm:$0xff] %v6487_v38  ;;  %v6353_v52 = vadd.f32 1.0, %v8919_v21  ;;  %8940 = vpow2.f32 %v6281_v34  ;;  %v8101_v13 = vpop.f32.mrb[124].mxu1  ;;  %v6279_v42 = vmul.f32 1.442695, %v6158_v51 }
 0x493   : > { %v8923_v56 = vpop.eup %8922  ;;  %v6356_v37 = vadd.f32 1.0, %v8921_v20  ;;  %8942 = vpow2.f32 %v6277_v11  ;;  %v10620_v24 = vadd.f32 %v10591_v48, %v8101_v13  ;;  %v6053_v29 = vpop.f32.mrb[125].mxu1 }
 0x494   : > { %v8925_v58 = vpop.eup %8924  ;;  %8944 = vrcp.f32 %v6353_v52  ;;  %v6354_v30 = vadd.f32 1.0, %v8923_v56  ;;  %v10623_v1 = vadd.f32 %v10591_v48, %v6053_v29  ;;  %v8102_v57 = vpop.f32.mrb[126].mxu1 }
 0x495   : > { %v8927_v61 = vpop.eup %8926  ;;  %8946 = vrcp.f32 %v6356_v37  ;;  %v6359_v26 = vadd.f32 1.0, %v8925_v58  ;;  %v6163_v6 = vsub.f32 0.0, %v10620_v24  ;;  %v10627_v33 = vadd.f32 %v10591_v48, %v8102_v57  ;;  %v6056_v16 = vpop.f32.mrb[127].mxu1 }
 0x496   : > { %v8929_v49 = vpop.eup %8928  ;;  %v6485_v18 = vsel %vm10280_vm3, %v8927_v61, %v10489_v50  ;;  %8948 = vrcp.f32 %v6354_v30  ;;  %v6161_v53 = vsub.f32 0.0, %v10623_v1  ;;  %v10634_v46 = vadd.f32 %v10591_v48, %v6056_v16 }
 0x497   : > { %v8931_v39 = vpop.eup %8930  ;;  %6553 = vst [vmem:[%s9311_s10 + $0x140] sm:$0xff] %v6485_v18  ;;  %v6488_v36 = vsel %vm10280_vm3, %v8929_v49, %v10497_v7  ;;  %8950 = vrcp.f32 %v6359_v26  ;;  %v6289_v12 = vmul.f32 1.442695, %v6163_v6  ;;  %v6164_v14 = vsub.f32 0.0, %v10627_v33 }
 0x498   : > { %v8933_v62 = vpop.eup %8932  ;;  %6556 = vst [vmem:[%s9311_s10 + $0x158] sm:$0xff] %v6488_v36  ;;  %v6486_v50 = vsel %vm10280_vm3, %v8931_v39, %v10505_v28  ;;  %8952 = vpow2.f32 %v6283_v10  ;;  %v6285_v27 = vmul.f32 1.442695, %v6161_v53  ;;  %v6162_v19 = vsub.f32 0.0, %v10634_v46 }
 0x499   : > { %v8935_v22 = vpop.eup %8934  ;;  %6554 = vst [vmem:[%s9311_s10 + $0x148] sm:$0xff] %v6486_v50  ;;  %v6491_v7 = vsel %vm10280_vm3, %v8933_v62, %v10515_v2  ;;  %8954 = vpow2.f32 %v6279_v42  ;;  %v6291_v28 = vmul.f32 1.442695, %v6164_v14 }
 0x49a   : > { %v8937_v25 = vpop.eup %8936  ;;  %6559 = vst [vmem:[%s9311_s10 + $0x170] sm:$0xff] %v6491_v7  ;;  %v6357_v40 = vadd.f32 1.0, %v8935_v22  ;;  %8956 = vpow2.f32 %v6289_v12  ;;  %v8105_v60 = vpop.f32.mrb[128].mxu1  ;;  %v6287_v34 = vmul.f32 1.442695, %v6162_v19 }
 0x49b   : > { %v8939_v59 = vpop.eup %8938  ;;  %v6360_v15 = vadd.f32 1.0, %v8937_v25  ;;  %8958 = vpow2.f32 %v6285_v27  ;;  %v10652_v0 = vadd.f32 %v10591_v48, %v8105_v60  ;;  %v6069_v35 = vpop.f32.mrb[129].mxu1 }
 0x49c   : > { %v8941_v4 = vpop.eup %8940  ;;  %8960 = vrcp.f32 %v6357_v40  ;;  %v6358_v45 = vadd.f32 1.0, %v8939_v59  ;;  %v10655_v2 = vadd.f32 %v10591_v48, %v6069_v35  ;;  %v8106_v17 = vpop.f32.mrb[130].mxu1 }
 0x49d   : > { %v8943_v8 = vpop.eup %8942  ;;  %8962 = vrcp.f32 %v6360_v15  ;;  %v6363_v23 = vadd.f32 1.0, %v8941_v4  ;;  %v6167_v11 = vsub.f32 0.0, %v10652_v0  ;;  %v10659_v51 = vadd.f32 %v10591_v48, %v8106_v17  ;;  %v6072_v21 = vpop.f32.mrb[131].mxu1 }
 0x49e   : > { %v8945_v38 = vpop.eup %8944  ;;  %8964 = vrcp.f32 %v6358_v45  ;;  %v6361_v20 = vadd.f32 1.0, %v8943_v8  ;;  %v6165_v52 = vsub.f32 0.0, %v10655_v2  ;;  %v10663_v13 = vadd.f32 %v10591_v48, %v6072_v21 }
 0x49f   : > { %v8947_v56 = vpop.eup %8946  ;;  %v6489_v37 = vsel %vm10280_vm3, %v8945_v38, %v10521_v63  ;;  %8966 = vrcp.f32 %v6363_v23  ;;  %v6297_v10 = vmul.f32 1.442695, %v6167_v11  ;;  %v6168_v29 = vsub.f32 0.0, %v10659_v51 }
 0x4a0   : > { %v8949_v58 = vpop.eup %8948  ;;  %6557 = vst [vmem:[%s9311_s10 + $0x160] sm:$0xff] %v6489_v37  ;;  %v6492_v30 = vsel %vm10280_vm3, %v8947_v56, %v10529_v31  ;;  %8968 = vrcp.f32 %v6361_v20  ;;  %v6293_v42 = vmul.f32 1.442695, %v6165_v52  ;;  %v6166_v57 = vsub.f32 0.0, %v10663_v13 }
 0x4a1   : > { %v8951_v61 = vpop.eup %8950  ;;  %6560 = vst [vmem:[%s9311_s10 + $0x178] sm:$0xff] %v6492_v30  ;;  %v6490_v63 = vsel %vm10280_vm3, %v8949_v58, %v10537_v41  ;;  %8970 = vpow2.f32 %v6291_v28  ;;  %v6299_v18 = vmul.f32 1.442695, %v6168_v29 }
 0x4a2   : > { %v8953_v26 = vpop.eup %8952  ;;  %6558 = vst [vmem:[%s9311_s10 + $0x168] sm:$0xff] %v6490_v63  ;;  %v6495_v6 = vsel %vm10280_vm3, %v8951_v61, %v10547_v9  ;;  %8972 = vpow2.f32 %v6287_v34  ;;  %v8109_v16 = vpop.f32.mrb[132].mxu1  ;;  %v6295_v12 = vmul.f32 1.442695, %v6166_v57 }
 0x4a3   : > { %v8955_v31 = vpop.eup %8954  ;;  %6563 = vst [vmem:[%s9311_s10 + $0x190] sm:$0xff] %v6495_v6  ;;  %v6364_v49 = vadd.f32 1.0, %v8953_v26  ;;  %8974 = vpow2.f32 %v6297_v10  ;;  %v10684_v53 = vadd.f32 %v10591_v48, %v8109_v16  ;;  %v6085_v39 = vpop.f32.mrb[133].mxu1 }
 0x4a4   : > { %v8957_v36 = vpop.eup %8956  ;;  %v6362_v41 = vadd.f32 1.0, %v8955_v31  ;;  %8976 = vpow2.f32 %v6293_v42  ;;  %v10687_v14 = vadd.f32 %v10591_v48, %v6085_v39  ;;  %v8110_v62 = vpop.f32.mrb[134].mxu1 }
 0x4a5   : > { %v8959_v9 = vpop.eup %8958  ;;  %8978 = vrcp.f32 %v6364_v49  ;;  %v6367_v50 = vadd.f32 1.0, %v8957_v36  ;;  %v6171_v27 = vsub.f32 0.0, %v10684_v53  ;;  %v10691_v19 = vadd.f32 %v10591_v48, %v8110_v62  ;;  %v6088_v22 = vpop.f32.mrb[135].mxu1 }
 0x4a6   : > { %v8961_v7 = vpop.eup %8960  ;;  %8980 = vrcp.f32 %v6362_v41  ;;  %v6365_v25 = vadd.f32 1.0, %v8959_v9  ;;  %v6169_v40 = vsub.f32 0.0, %v10687_v14  ;;  %v10695_v60 = vadd.f32 %v10591_v48, %v6088_v22 }
 0x4a7   : > { %v8963_v59 = vpop.eup %8962  ;;  %v6493_v15 = vsel %vm10280_vm3, %v8961_v7, %v10550_v47  ;;  %8982 = vrcp.f32 %v6367_v50  ;;  %v6305_v28 = vmul.f32 1.442695, %v6171_v27  ;;  %v6172_v35 = vsub.f32 0.0, %v10691_v19 }
 0x4a8   : > { %v8965_v4 = vpop.eup %8964  ;;  %6561 = vst [vmem:[%s9311_s10 + $0x180] sm:$0xff] %v6493_v15  ;;  %v6496_v45 = vsel %vm10280_vm3, %v8963_v59, %v10557_v44  ;;  %8984 = vrcp.f32 %v6365_v25  ;;  %v6301_v48 = vmul.f32 1.442695, %v6169_v40  ;;  %v6170_v44 = vsub.f32 0.0, %v10695_v60 }
 0x4a9   : > { %v8967_v34 = vpop.eup %8966  ;;  %6564 = vst [vmem:[%s9311_s10 + $0x198] sm:$0xff] %v6496_v45  ;;  %v6494_v47 = vsel %vm10280_vm3, %v8965_v4, %v10565_v55  ;;  %8986 = vpow2.f32 %v6299_v18  ;;  %v6307_v17 = vmul.f32 1.442695, %v6172_v35 }
 0x4aa   : > { %v8969_v8 = vpop.eup %8968  ;;  %6562 = vst [vmem:[%s9311_s10 + $0x188] sm:$0xff] %v6494_v47  ;;  %v6499_v23 = vsel %vm10280_vm3, %v8967_v34, %v10579_v43  ;;  %8988 = vpow2.f32 %v6295_v12  ;;  %v6303_v37 = vmul.f32 1.442695, %v6170_v44 }
 0x4ab   : > { %v8971_v11 = vpop.eup %8970  ;;  %6567 = vst [vmem:[%s9311_s10 + $0x1b0] sm:$0xff] %v6499_v23  ;;  %v6497_v21 = vsel %vm10280_vm3, %v8969_v8, %v10582_v32  ;;  %8990 = vpow2.f32 %v6305_v28 }
 0x4ac   : > { %v8973_v38 = vpop.eup %8972  ;;  %6565 = vst [vmem:[%s9311_s10 + $0x1a0] sm:$0xff] %v6497_v21  ;;  %v6368_v55 = vadd.f32 1.0, %v8971_v11  ;;  %8992 = vpow2.f32 %v6301_v48 }
 0x4ad   : > { %v8975_v20 = vpop.eup %8974  ;;  %v6366_v52 = vadd.f32 1.0, %v8973_v38  ;;  %8994 = vpow2.f32 %v6307_v17 }
 0x4ae   : > { %v8977_v43 = vpop.eup %8976  ;;  %8996 = vrcp.f32 %v6368_v55  ;;  %v6371_v56 = vadd.f32 1.0, %v8975_v20 }
 0x4af   : > { %v8979_v10 = vpop.eup %8978  ;;  %8998 = vrcp.f32 %v6366_v52  ;;  %v6369_v29 = vadd.f32 1.0, %v8977_v43 }
 0x4b0   : > { %v8981_v32 = vpop.eup %8980  ;;  %v6500_v58 = vsel %vm10280_vm3, %v8979_v10, %v10594_v54  ;;  %9000 = vrcp.f32 %v6371_v56 }
 0x4b1   : > { %v8983_v30 = vpop.eup %8982  ;;  %6568 = vst [vmem:[%s9311_s10 + $0x1b8] sm:$0xff] %v6500_v58  ;;  %v6498_v42 = vsel %vm10280_vm3, %v8981_v32, %v10602_v5  ;;  %9002 = vrcp.f32 %v6369_v29 }
 0x4b2   : > { %v8985_v57 = vpop.eup %8984  ;;  %6566 = vst [vmem:[%s9311_s10 + $0x1a8] sm:$0xff] %v6498_v42  ;;  %v6503_v61 = vsel %vm10280_vm3, %v8983_v30, %v10620_v24  ;;  %9004 = vpow2.f32 %v6303_v37 }
 0x4b3   : > { %v8987_v63 = vpop.eup %8986  ;;  %6571 = vst [vmem:[%s9311_s10 + $0x1d0] sm:$0xff] %v6503_v61  ;;  %v6501_v54 = vsel %vm10280_vm3, %v8985_v57, %v10623_v1 }
 0x4b4   : > { %v8989_v26 = vpop.eup %8988  ;;  %6569 = vst [vmem:[%s9311_s10 + $0x1c0] sm:$0xff] %v6501_v54  ;;  %v6372_v6 = vadd.f32 1.0, %v8987_v63 }
 0x4b5   : > { %v8991_v16 = vpop.eup %8990  ;;  %v6370_v5 = vadd.f32 1.0, %v8989_v26 }
 0x4b6   : > { %v8993_v31 = vpop.eup %8992  ;;  %9006 = vrcp.f32 %v6372_v6  ;;  %v6375_v49 = vadd.f32 1.0, %v8991_v16 }
 0x4b7   : > { %v8995_v18 = vpop.eup %8994  ;;  %9008 = vrcp.f32 %v6370_v5  ;;  %v6373_v24 = vadd.f32 1.0, %v8993_v31 }
 0x4b8   : > { %v8997_v39 = vpop.eup %8996  ;;  %9010 = vrcp.f32 %v6375_v49  ;;  %v6376_v36 = vadd.f32 1.0, %v8995_v18 }
 0x4b9   : > { %v8999_v1 = vpop.eup %8998  ;;  %v6504_v41 = vsel %vm10280_vm3, %v8997_v39, %v10627_v33  ;;  %9012 = vrcp.f32 %v6373_v24 }
 0x4ba   : > { %v9001_v12 = vpop.eup %9000  ;;  %6572 = vst [vmem:[%s9311_s10 + $0x1d8] sm:$0xff] %v6504_v41  ;;  %v6502_v62 = vsel %vm10280_vm3, %v8999_v1, %v10634_v46  ;;  %9014 = vrcp.f32 %v6376_v36 }
 0x4bb   : > { %v9003_v9 = vpop.eup %9002  ;;  %6570 = vst [vmem:[%s9311_s10 + $0x1c8] sm:$0xff] %v6502_v62  ;;  %v6507_v50 = vsel %vm10280_vm3, %v9001_v12, %v10652_v0 }
 0x4bc   : > { %v9005_v27 = vpop.eup %9004  ;;  %6575 = vst [vmem:[%s9311_s10 + $0x1f0] sm:$0xff] %v6507_v50  ;;  %v6505_v33 = vsel %vm10280_vm3, %v9003_v9, %v10655_v2 }
 0x4bd   : > { %6573 = vst [vmem:[%s9311_s10 + $0x1e0] sm:$0xff] %v6505_v33  ;;  %v6374_v22 = vadd.f32 1.0, %v9005_v27 }
 0x4bf   : > { %9016 = vrcp.f32 %v6374_v22 }
 0x4c0   : > { %v9007_v46 = vpop.eup %9006 }
 0x4c1   : > { %v9009_v7 = vpop.eup %9008  ;;  %v6508_v0 = vsel %vm10280_vm3, %v9007_v46, %v10659_v51 }
 0x4c2   : > { %v9011_v25 = vpop.eup %9010  ;;  %6576 = vst [vmem:[%s9311_s10 + $0x1f8] sm:$0xff] %v6508_v0  ;;  %v6506_v2 = vsel %vm10280_vm3, %v9009_v7, %v10663_v13 }
 0x4c3   : > { %v9013_v40 = vpop.eup %9012  ;;  %6574 = vst [vmem:[%s9311_s10 + $0x1e8] sm:$0xff] %v6506_v2  ;;  %v6511_v59 = vsel %vm10280_vm3, %v9011_v25, %v10684_v53 }
 0x4c4   : > { %v9015_v15 = vpop.eup %9014  ;;  %6579 = vst [vmem:[%s9311_s10 + $0x210] sm:$0xff] %v6511_v59  ;;  %v6509_v51 = vsel %vm10280_vm3, %v9013_v40, %v10687_v14 }
 0x4c5   : > { %6577 = vst [vmem:[%s9311_s10 + $0x200] sm:$0xff] %v6509_v51  ;;  %v6512_v13 = vsel %vm10280_vm3, %v9015_v15, %v10691_v19 }
 0x4c6   : > { %6580 = vst [vmem:[%s9311_s10 + $0x218] sm:$0xff] %v6512_v13 }
 0x4c9   : > { %v9017_v53 = vpop.eup %9016 }
 0x4ca   : > { %v6510_v14 = vsel %vm10280_vm3, %v9017_v53, %v10695_v60 }
 0x4cb   : > { %6578 = vst [vmem:[%s9311_s10 + $0x208] sm:$0xff] %v6510_v14 }
 0x4cc   : > { %9032 = shalt.err (!%p9029_p4)
}
 0x4cd   : > { %s9033_s14 = scalar_lea.hbm %s10777_s16, 8704  ;;  %s9037_s12 = scalar_lea.hbm %s10844_s5, 34816 }
 0x4ce   : > { %p9034_p6 = scmp.ne.s32.totalorder %s10777_s16, %s9033_s14  ;;  %p9038_p10 = scmp.lt.u32.totalorder %s10777_s16, %s10844_s5 }
 0x4cf   : > { %p9039_p11 = scmp.lt.u32.totalorder %s9037_s12, %s9033_s14  ;;  %p9041_p13 = scmp.lt.u32.totalorder %s9033_s14, %s10777_s16 }
 0x4d0   : > { %p9035_p8 = pnand %p9034_p6, %p9203_p5 }
 0x4d1   : > { %p9040_p12 = por %p9039_p11, %p9038_p10 }
 0x4d2   : > { %p9036_p9 = pneg %p9035_p8 }
 0x4d3   : > { %p9042_p0 = por %p9041_p13, %p9040_p12 }
 0x4d5   : > { %p9043_p1 = pnand %p9042_p0, %p9036_p9 }
 0x4d7   : > { %9046 = shalt.err (!%p9043_p1)
}
 0x4d8   : > { %s9118_s17 = smov 128   ;;  %s9119_s29 = smov 8  }
 0x4d9   : > { %8656 = dma.vmem_to_hbm [thread:$0]  (%p9203_p5), %s10779_s22, 8704, %s10777_s16, %s10787_s26, %s9118_s17, %s9118_s17, %s9119_s29  }
 0x4da PF: > { %p8662_p2 = scmp.ge.s32.totalorder %s9115_s25, 2  ;;  %s6612_s30 = sand.u32 1, %s9087_s18  }
 0x4db   : > { %s6613_s9 = scalar_lea.sflag [#allocation5], %s6612_s30 }
 0x4dc   : > { %p8659_p3 = pnand %p8662_p2, %p9209_p7 }
 0x4de   : > { %9082 = dma.done.wait (!%p8659_p3), %s6613_s9, 8704  }
 0x4df   : > { %9084 = vsyncadd (!%p8659_p3), %s6613_s9, 4294958592  ;;  %s18_s25 = sadd.s32 1, %s9115_s25   ;;  %s10891_s18 = smov %s9091_s19 }
 0x4e0   : > { %p15_p4 = scmp.ge.s32.totalorder %s18_s25, 6   ;;  %s10892_s19 = smov %s9095_s20 }
 0x4e1   : > { %s10893_s20 = smov %s9219_s13  ;;  %s10894_s21 = smov %s9107_s23 }
 0x4e2   : > { %s10895_s22 = smov %s9111_s24  ;;  %s10896_s23 = smov %s10899_s27 }
 0x4e3   : > { %s10897_s24 = smov %s10903_s28  ;;  %17 = sbr.rel (!%p15_p4) target bundleno = 5 (0x5), region = 128 }
 0x4ea   :  { %6618 = vsyncpa [#allocation5], 1 }
 0x4eb   :  { %6620 = vsyncpa [#allocation5 + $0x1], 1 }
 0x4ec   :  { %6621 = vsyncmov [#allocation3] }
 0x4ef   :  { %s6622_s7 = vpop.sfrf %6621 }
 0x4f0   :  { %p7038_p5 = scmp.ne.s32.totalorder %s6622_s7, 0 }
 0x4f2   :  { %6626 = shalt.err (%p7038_p5)  }

</bundles_post_ra>
